<compile_context>
chip_gen: v7x
topology: tpu7x:2x2x1
jax: 0.10.0
libtpu: 0.0.40
codegen_flags: <defaults>
</compile_context>

<pallas_src>
import math
from collections import namedtuple

import jax
import jax.numpy as jnp
from jax.experimental import pallas as pl
from jax.experimental.pallas import tpu as pltpu

# ----------------------------- config -------------------------------------
DIM = 32
HEADS = 4                 # encoder attention heads
MEM_HEADS = 4             # mem_update_attn_heads
DEPTH = 2                 # encoder depth
NUM_MEM = 4               # num_memory_slots
NUM_MEM_UPDATES = 1
FF_MULT = 4
NUM_TOKENS = 256
BATCH = 2
SEQ = 8
LN_EPS = 1e-5
DIM_HEAD = DIM // HEADS
MEM_DIM_HEAD = DIM // MEM_HEADS
DIM_FF = DIM * FF_MULT
MASK_VALUE = float(-jnp.finfo(jnp.float32).max)

N_LN = 3 * DEPTH + 2      # per-layer (ln1,ln2,ln3) + final enc LN + mem-ff LN
N_ATTN = 2 * DEPTH + 1    # per-layer (self, cross) + mem-updater
N_FF = DEPTH + 1          # per-layer FFN + memory FFN

EncOnlyResults = namedtuple("EncOnlyResults", ["enc_out", "mem"])


# ----------------------------- fused Pallas kernel --------------------------

def _memformer_kernel(
        x_ref,          # (BS, SEQ, DIM)        this step's embeddings
        mem0_ref,       # (NUM_MEM, DIM)        initial memory (batch-shared)
        rel_bias_ref,   # (DEPTH, HEADS, SEQ, SEQ)
        ln_ref,         # (N_LN, 2, 1, DIM)     [gamma, beta]
        attn_w_ref,     # (N_ATTN, DIM, 4*DIM)  [Wq|Wk|Wv|Wo]
        attn_b_ref,     # (N_ATTN, 1, 4*DIM)    [bq|bk|bv|bo]
        ff_w1_ref,      # (N_FF, DIM, DIM_FF)
        ff_b1_ref,      # (N_FF, 1, DIM_FF)
        ff_w2_ref,      # (N_FF, DIM_FF, DIM)
        ff_b2_ref,      # (N_FF, 1, DIM)
        gru_w_ref,      # (2, DIM, 3*DIM)       [r|z|n]; idx0=input, idx1=hidden
        gru_b_ref,      # (2, 1, 3*DIM)
        enc_out_ref,    # (BS, SEQ, DIM)
        mem_out_ref):   # (BS, NUM_MEM, DIM)
    f32 = jnp.float32
    BS = x_ref.shape[0]
    R = BS * SEQ

    def mm(a, b):
        return jnp.dot(a, b, preferred_element_type=f32)

    def mm_t(a, b):     # a @ b^T
        return jax.lax.dot_general(a, b, (((1,), (1,)), ((), ())),
                                   preferred_element_type=f32)

    def layer_norm(x, idx):
        g = ln_ref[idx, 0]
        b = ln_ref[idx, 1]
        mu = jnp.mean(x, axis=-1, keepdims=True)
        var = jnp.mean(x * x, axis=-1, keepdims=True) - mu * mu   # single pass
        return (x - mu) * jax.lax.rsqrt(var + LN_EPS) * g + b

    def softmax_rows(s):
        p = jnp.exp(s - jnp.max(s, axis=-1, keepdims=True))
        return p * pl.reciprocal(jnp.sum(p, axis=-1, keepdims=True), approx=True)

    def ffn(xn, idx):
        h = mm(xn, ff_w1_ref[idx]) + ff_b1_ref[idx]
        # TODO(synk): PyTorch nn.GELU() is erf-exact; tanh-approx GELU used here (~1e-3 diff).
        h = jax.nn.gelu(h, approximate=True)
        return mm(h, ff_w2_ref[idx]) + ff_b2_ref[idx]

    scale = float(DIM_HEAD) ** -0.5
    mscale = float(MEM_DIM_HEAD) ** -0.5

    # Fold batch rows into sublanes: all batch-independent ops run on (R, DIM).
    x = x_ref[...].reshape(R, DIM)
    mem0 = mem0_ref[...]

    # ----------------------------- encoder ---------------------------------
    for l in range(DEPTH):
        # --- PreNorm self-attention (fused QKV; per-head lane slices only for scores) ---
        w = attn_w_ref[2 * l]
        b = attn_b_ref[2 * l]
        xn = layer_norm(x, 3 * l + 0)
        full = mm(xn, w) + b                                     # (R, 4D): q|k|v|junk
        q = full[:, :DIM]
        k = full[:, DIM:2 * DIM]
        v = full[:, 2 * DIM:3 * DIM]
        batch_out = []
        for bi in range(BS):
            r0 = bi * SEQ
            heads = []
            for h in range(HEADS):
                c0 = h * DIM_HEAD
                qh = q[r0:r0 + SEQ, c0:c0 + DIM_HEAD]
                kh = k[r0:r0 + SEQ, c0:c0 + DIM_HEAD]
                vh = v[r0:r0 + SEQ, c0:c0 + DIM_HEAD]
                p = softmax_rows(mm_t(qh, kh) * scale + rel_bias_ref[l, h])
                heads.append(mm(p, vh))                          # (SEQ, dh)
            batch_out.append(jnp.concatenate(heads, axis=-1))    # (SEQ, DIM)
        o = batch_out[0] if BS == 1 else jnp.concatenate(batch_out, axis=0)
        x = x + mm(o, w[:, 3 * DIM:]) + b[:, 3 * DIM:]           # fused single Wo

        # --- PreNorm cross-attention to the (batch-shared) initial memory slots ---
        w = attn_w_ref[2 * l + 1]
        b = attn_b_ref[2 * l + 1]
        xn = layer_norm(x, 3 * l + 1)
        qfull = mm(xn, w) + b                                    # only q lanes used
        mfull = mm(mem0, w) + b                                  # K/V once per layer (shared)
        q = qfull[:, :DIM]
        k = mfull[:, DIM:2 * DIM]
        v = mfull[:, 2 * DIM:3 * DIM]
        heads = []
        for h in range(HEADS):
            c0 = h * DIM_HEAD
            qh = q[:, c0:c0 + DIM_HEAD]                          # (R, dh): all batches at once
            kh = k[:, c0:c0 + DIM_HEAD]                          # (NUM_MEM, dh)
            vh = v[:, c0:c0 + DIM_HEAD]
            p = softmax_rows(mm_t(qh, kh) * scale)               # (R, NUM_MEM)
            heads.append(mm(p, vh))
        o = jnp.concatenate(heads, axis=-1)
        x = x + mm(o, w[:, 3 * DIM:]) + b[:, 3 * DIM:]

        # --- PreNorm feed-forward ---
        x = x + ffn(layer_norm(x, 3 * l + 2), l)

    enc = layer_norm(x, 3 * DEPTH)
    enc_out_ref[...] = enc.reshape(BS, SEQ, DIM)

    # ------------------------- memory update --------------------------------
    # mask = [eye(NUM_MEM) | all-true(SEQ)] built in-kernel; the concatenated KV
    # [mems ; enc] is handled with a split-KV softmax (no concat/mask slab).
    w = attn_w_ref[2 * DEPTH]
    b = attn_b_ref[2 * DEPTH]
    enc_kv = mm(enc, w) + b          # encoder K/V: hoisted (head/update-independent)
    mem = mem0 if BS == 1 else jnp.concatenate([mem0] * BS, axis=0)   # (BS*NUM_MEM, DIM)

    rows_i = jax.lax.broadcasted_iota(jnp.int32, (NUM_MEM, NUM_MEM), 0)
    cols_i = jax.lax.broadcasted_iota(jnp.int32, (NUM_MEM, NUM_MEM), 1)
    eye = rows_i == cols_i

    for _ in range(NUM_MEM_UPDATES):
        prev = mem
        mfull = mm(mem, w) + b                                   # q|k|v for memory rows
        q = mfull[:, :DIM]
        km = mfull[:, DIM:2 * DIM]
        vm = mfull[:, 2 * DIM:3 * DIM]
        batch_out = []
        for bi in range(BS):
            m0 = bi * NUM_MEM
            e0 = bi * SEQ
            heads = []
            for h in range(MEM_HEADS):
                c0 = h * MEM_DIM_HEAD
                qh = q[m0:m0 + NUM_MEM, c0:c0 + MEM_DIM_HEAD]
                kmh = km[m0:m0 + NUM_MEM, c0:c0 + MEM_DIM_HEAD]
                vmh = vm[m0:m0 + NUM_MEM, c0:c0 + MEM_DIM_HEAD]
                keh = enc_kv[e0:e0 + SEQ, DIM + c0:DIM + c0 + MEM_DIM_HEAD]
                veh = enc_kv[e0:e0 + SEQ, 2 * DIM + c0:2 * DIM + c0 + MEM_DIM_HEAD]
                sm = jnp.where(eye, mm_t(qh, kmh) * mscale, MASK_VALUE)   # (NM, NM)
                se = mm_t(qh, keh) * mscale                               # (NM, SEQ)
                mx = jnp.maximum(jnp.max(sm, axis=-1, keepdims=True),
                                 jnp.max(se, axis=-1, keepdims=True))
                pm = jnp.exp(sm - mx)
                pe = jnp.exp(se - mx)
                den = (jnp.sum(pm, axis=-1, keepdims=True) +
                       jnp.sum(pe, axis=-1, keepdims=True))
                oh = (mm(pm, vmh) + mm(pe, veh)) * pl.reciprocal(den, approx=True)
                heads.append(oh)
            batch_out.append(jnp.concatenate(heads, axis=-1))
        upd = batch_out[0] if BS == 1 else jnp.concatenate(batch_out, axis=0)
        upd = mm(upd, w[:, 3 * DIM:]) + b[:, 3 * DIM:]

        # nn.GRUCell(updated, prev) — two fused gate matmuls, static lane slices.
        # TODO(synk): synthetic weights use x @ W[gate]; real PyTorch checkpoints
        # store (3H, D) W_ih/W_hh (x @ W^T) and would need a transpose/reorder.
        gi = mm(upd, gru_w_ref[0]) + gru_b_ref[0]                # (rows, 3D)
        gh = mm(prev, gru_w_ref[1]) + gru_b_ref[1]
        r = jax.nn.sigmoid(gi[:, :DIM] + gh[:, :DIM])
        z = jax.nn.sigmoid(gi[:, DIM:2 * DIM] + gh[:, DIM:2 * DIM])
        n = jnp.tanh(gi[:, 2 * DIM:] + r * gh[:, 2 * DIM:])
        mem = (1.0 - z) * n + z * prev

        # Residual(PreNorm(FeedForward))
        mem = mem + ffn(layer_norm(mem, 3 * DEPTH + 1), DEPTH)

    mem_out_ref[...] = mem.reshape(BS, NUM_MEM, DIM)


# ----------------------------- glue (plain JAX) -----------------------------

def _whole_spec(a):
    """Full-array BlockSpec with a constant index map (weight stays put)."""
    zeros = (0,) * a.ndim
    return pl.BlockSpec(a.shape, lambda i, _z=zeros: _z)


def _pack_attn(p):
    """Natural (wq, wkv, wo) layout -> one lane-dense [Wq|Wk|Wv|Wo] slab."""
    d = p["wq"].shape[0]
    wk, wv = p["wkv"][:, :d], p["wkv"][:, d:]
    bk, bv = p["bkv"][:d], p["bkv"][d:]
    w = jnp.concatenate([p["wq"], wk, wv, p["wo"]], axis=1)      # (D, 4D)
    b = jnp.concatenate([p["bq"], bk, bv, p["bo"]])[None, :]     # (1, 4D)
    return w, b


def relative_position_bucket(relative_position, num_buckets=32, max_distance=128):
    # non-causal bucketing (T5-style), as in memformer encoder self-attention
    num_buckets = num_buckets // 2
    n = -relative_position
    ret = (n < 0).astype(jnp.int32) * num_buckets
    n = jnp.abs(n)
    max_exact = num_buckets // 2
    is_small = n < max_exact
    nf = jnp.maximum(n.astype(jnp.float32), 1.0)
    val_if_large = max_exact + (jnp.log(nf / max_exact) /
                                math.log(max_distance / max_exact) *
                                (num_buckets - max_exact)).astype(jnp.int32)
    val_if_large = jnp.minimum(val_if_large, num_buckets - 1)
    return ret + jnp.where(is_small, n, val_if_large)


def rel_pos_bias(rel_emb, n_q, n_k):
    rel = jnp.arange(n_k)[None, :] - jnp.arange(n_q)[:, None]
    buckets = relative_position_bucket(rel)
    bias = rel_emb[buckets]                     # (n_q, n_k, heads) — gather stays in glue
    return jnp.transpose(bias, (2, 0, 1))       # (heads, n_q, n_k)


def memformer_forward(params, src, seqs_per_step=None):
    b, n = src.shape
    assert n == SEQ
    if seqs_per_step is None:
        # Default keeps a 2-way parallel grid so v7x megacore shards the batch;
        # on single-TC v5e/v6e pass seqs_per_step=b to fold the whole batch
        # into one grid step (sublane packing, half the serial instructions).
        seqs_per_step = max(1, b // 2)
    assert b % seqs_per_step == 0   # TODO(synk): pad ragged batches
    steps = b // seqs_per_step

    # token embedding / rel-pos-bucket gathers stay in JAX glue (data-dependent gathers)
    x = params["token_emb"][src].astype(jnp.float32)             # (B, SEQ, DIM)

    layers = params["enc_layers"]
    rel_bias = jnp.stack([rel_pos_bias(l["rel_emb"], SEQ, SEQ) for l in layers])

    # LN slab: per-layer (ln1, ln2, ln3), then final encoder LN, then mem-ff LN.
    ln_list = []
    for l in layers:
        ln_list += [l["ln1"], l["ln2"], l["ln3"]]
    ln_list += [params["enc_norm"], params["mem_ff_ln"]]
    ln_gb = jnp.stack([jnp.stack([g, bb]) for (g, bb) in ln_list])[:, :, None, :]

    # Attention slab: per-layer (self, cross), then the memory-updater attention.
    attn_list = []
    for l in layers:
        attn_list += [_pack_attn(l["self_attn"]), _pack_attn(l["cross_attn"])]
    attn_list.append(_pack_attn(params["mem_updater"]))
    attn_w = jnp.stack([w for w, _ in attn_list])                # (N_ATTN, D, 4D)
    attn_b = jnp.stack([bb for _, bb in attn_list])              # (N_ATTN, 1, 4D)

    # FFN slab: per-layer FFN, then the memory FFN.
    ff_list = [l["ff"] for l in layers] + [params["mem_ff"]]
    ff_w1 = jnp.stack([f[0] for f in ff_list])
    ff_b1 = jnp.stack([f[1][None, :] for f in ff_list])
    ff_w2 = jnp.stack([f[2] for f in ff_list])
    ff_b2 = jnp.stack([f[3][None, :] for f in ff_list])

    # GRU slab: gates packed along lanes [r|z|n]; idx0 = input, idx1 = hidden.
    gru_w = jnp.stack([jnp.transpose(params["gru_wih"], (1, 0, 2)).reshape(DIM, 3 * DIM),
                       jnp.transpose(params["gru_whh"], (1, 0, 2)).reshape(DIM, 3 * DIM)])
    gru_b = jnp.stack([params["gru_bih"].reshape(1, 3 * DIM),
                       params["gru_bhh"].reshape(1, 3 * DIM)])

    inputs = [x, params["memory_slots"], rel_bias, ln_gb, attn_w, attn_b,
              ff_w1, ff_b1, ff_w2, ff_b2, gru_w, gru_b]

    in_specs = [pl.BlockSpec((seqs_per_step, SEQ, DIM), lambda i: (i, 0, 0))]
    in_specs += [_whole_spec(a) for a in inputs[1:]]

    enc, mems = pl.pallas_call(
        _memformer_kernel,
        grid=(steps,),
        in_specs=in_specs,
        out_specs=(pl.BlockSpec((seqs_per_step, SEQ, DIM), lambda i: (i, 0, 0)),
                   pl.BlockSpec((seqs_per_step, NUM_MEM, DIM), lambda i: (i, 0, 0))),
        out_shape=(jax.ShapeDtypeStruct((b, SEQ, DIM), jnp.float32),
                   jax.ShapeDtypeStruct((b, NUM_MEM, DIM), jnp.float32)),
        compiler_params=pltpu.CompilerParams(dimension_semantics=("parallel",)),
    )(*inputs)

    # TODO(synk): decoder / AutoregressiveWrapper path skipped (encoder_only=True config).
    return EncOnlyResults(enc, mems)


# ----------------------------- deterministic params ------------------------

def init_params(key):
    keys = iter(jax.random.split(key, 64))

    def nk():
        return next(keys)

    def lin(d_in, d_out):
        return (jax.random.normal(nk(), (d_in, d_out), jnp.float32) * 0.02,
                jnp.zeros((d_out,), jnp.float32))

    def ln(d):
        return (jnp.ones((d,), jnp.float32), jnp.zeros((d,), jnp.float32))

    def attn(d):
        wq, bq = lin(d, d)
        wkv, bkv = lin(d, 2 * d)
        wo, bo = lin(d, d)
        return dict(wq=wq, bq=bq, wkv=wkv, bkv=bkv, wo=wo, bo=bo)

    enc_layers = []
    for _ in range(DEPTH):
        enc_layers.append(dict(
            rel_emb=jax.random.normal(nk(), (32, HEADS), jnp.float32) * 0.02,
            ln1=ln(DIM), self_attn=attn(DIM),
            ln2=ln(DIM), cross_attn=attn(DIM),
            ln3=ln(DIM), ff=lin(DIM, DIM_FF) + lin(DIM_FF, DIM),
        ))

    return dict(
        token_emb=jax.random.normal(nk(), (NUM_TOKENS, DIM), jnp.float32) * 0.02,
        enc_layers=enc_layers,
        enc_norm=ln(DIM),
        memory_slots=jax.random.normal(nk(), (NUM_MEM, DIM), jnp.float32),
        mem_updater=attn(DIM),
        gru_wih=jax.random.normal(nk(), (3, DIM, DIM), jnp.float32) * 0.02,
        gru_whh=jax.random.normal(nk(), (3, DIM, DIM), jnp.float32) * 0.02,
        gru_bih=jnp.zeros((3, 1, DIM), jnp.float32),
        gru_bhh=jnp.zeros((3, 1, DIM), jnp.float32),
        mem_ff_ln=ln(DIM),
        mem_ff=lin(DIM, DIM_FF) + lin(DIM_FF, DIM),
    )


if __name__ == "__main__":
    key = jax.random.PRNGKey(0)
    kp, kd = jax.random.split(key)
    params = init_params(kp)
    src = jax.random.randint(kd, (BATCH, SEQ), 0, NUM_TOKENS, dtype=jnp.int32)

    enc_out, mem = jax.jit(memformer_forward)(params, src)
    jax.block_until_ready((enc_out, mem))

    assert enc_out.shape == (BATCH, SEQ, DIM)
    assert mem.shape == (BATCH, NUM_MEM, DIM)
    assert bool(jnp.all(jnp.isfinite(enc_out))) and bool(jnp.all(jnp.isfinite(mem)))
    print("KERNEL_OK")
</pallas_src>

<mosaic_0001>
module attributes {stable_mosaic.version = 11 : i64} {
  func.func @_memformer_kernel(%arg0: i32, %arg1: memref<1x8x32xf32, #tpu.memory_space<vmem>>, %arg2: memref<4x32xf32, #tpu.memory_space<vmem>>, %arg3: memref<2x4x8x8xf32, #tpu.memory_space<vmem>>, %arg4: memref<8x2x1x32xf32, #tpu.memory_space<vmem>>, %arg5: memref<5x32x128xf32, #tpu.memory_space<vmem>>, %arg6: memref<5x1x128xf32, #tpu.memory_space<vmem>>, %arg7: memref<3x32x128xf32, #tpu.memory_space<vmem>>, %arg8: memref<3x1x128xf32, #tpu.memory_space<vmem>>, %arg9: memref<3x128x32xf32, #tpu.memory_space<vmem>>, %arg10: memref<3x1x32xf32, #tpu.memory_space<vmem>>, %arg11: memref<2x32x96xf32, #tpu.memory_space<vmem>>, %arg12: memref<2x1x96xf32, #tpu.memory_space<vmem>>, %arg13: memref<1x8x32xf32, #tpu.memory_space<vmem>>, %arg14: memref<1x4x32xf32, #tpu.memory_space<vmem>>) attributes {dimension_semantics = [#tpu.dimension_semantics<parallel>], iteration_bounds = array<i64: 2>, scalar_prefetch = 0 : i64, scratch_operands = 0 : i64, tpu.core_type = #tpu.core_type<tc>, window_params = [{transform_indices = @transform_0, window_bounds = array<i64: 1, 8, 32>}, {pipeline_mode = #tpu.pipeline_mode<synchronous>, transform_indices = @transform_1, window_bounds = array<i64: 4, 32>}, {pipeline_mode = #tpu.pipeline_mode<synchronous>, transform_indices = @transform_2, window_bounds = array<i64: 2, 4, 8, 8>}, {pipeline_mode = #tpu.pipeline_mode<synchronous>, transform_indices = @transform_3, window_bounds = array<i64: 8, 2, 1, 32>}, {pipeline_mode = #tpu.pipeline_mode<synchronous>, transform_indices = @transform_4, window_bounds = array<i64: 5, 32, 128>}, {pipeline_mode = #tpu.pipeline_mode<synchronous>, transform_indices = @transform_5, window_bounds = array<i64: 5, 1, 128>}, {pipeline_mode = #tpu.pipeline_mode<synchronous>, transform_indices = @transform_6, window_bounds = array<i64: 3, 32, 128>}, {pipeline_mode = #tpu.pipeline_mode<synchronous>, transform_indices = @transform_7, window_bounds = array<i64: 3, 1, 128>}, {pipeline_mode = #tpu.pipeline_mode<synchronous>, transform_indices = @transform_8, window_bounds = array<i64: 3, 128, 32>}, {pipeline_mode = #tpu.pipeline_mode<synchronous>, transform_indices = @transform_9, window_bounds = array<i64: 3, 1, 32>}, {pipeline_mode = #tpu.pipeline_mode<synchronous>, transform_indices = @transform_10, window_bounds = array<i64: 2, 32, 96>}, {pipeline_mode = #tpu.pipeline_mode<synchronous>, transform_indices = @transform_11, window_bounds = array<i64: 2, 1, 96>}, {transform_indices = @transform_12, window_bounds = array<i64: 1, 8, 32>}, {transform_indices = @transform_13, window_bounds = array<i64: 1, 4, 32>}]} {
    %c0 = arith.constant 0 : index
    %c0_0 = arith.constant 0 : index
    %c0_1 = arith.constant 0 : index
    %0 = vector.load %arg1[%c0, %c0_0, %c0_1] : memref<1x8x32xf32, #tpu.memory_space<vmem>>, vector<1x8x32xf32>
    %1 = vector.shape_cast %0 : vector<1x8x32xf32> to vector<8x32xf32>
    %c0_2 = arith.constant 0 : index
    %c0_3 = arith.constant 0 : index
    %2 = vector.load %arg2[%c0_2, %c0_3] : memref<4x32xf32, #tpu.memory_space<vmem>>, vector<4x32xf32>
    %c0_4 = arith.constant 0 : index
    %c0_5 = arith.constant 0 : index
    %c0_6 = arith.constant 0 : index
    %3 = vector.load %arg5[%c0_4, %c0_5, %c0_6] : memref<5x32x128xf32, #tpu.memory_space<vmem>>, vector<1x32x128xf32>
    %4 = vector.shape_cast %3 : vector<1x32x128xf32> to vector<32x128xf32>
    %c0_7 = arith.constant 0 : index
    %c0_8 = arith.constant 0 : index
    %c0_9 = arith.constant 0 : index
    %5 = vector.load %arg6[%c0_7, %c0_8, %c0_9] : memref<5x1x128xf32, #tpu.memory_space<vmem>>, vector<1x1x128xf32>
    %6 = vector.shape_cast %5 : vector<1x1x128xf32> to vector<1x128xf32>
    %c0_10 = arith.constant 0 : index
    %c0_11 = arith.constant 0 : index
    %c0_12 = arith.constant 0 : index
    %c0_13 = arith.constant 0 : index
    %7 = vector.load %arg4[%c0_10, %c0_11, %c0_12, %c0_13] : memref<8x2x1x32xf32, #tpu.memory_space<vmem>>, vector<1x1x1x32xf32>
    %8 = vector.shape_cast %7 : vector<1x1x1x32xf32> to vector<1x32xf32>
    %c0_14 = arith.constant 0 : index
    %c1 = arith.constant 1 : index
    %c0_15 = arith.constant 0 : index
    %c0_16 = arith.constant 0 : index
    %9 = vector.load %arg4[%c0_14, %c1, %c0_15, %c0_16] : memref<8x2x1x32xf32, #tpu.memory_space<vmem>>, vector<1x1x1x32xf32>
    %10 = vector.shape_cast %9 : vector<1x1x1x32xf32> to vector<1x32xf32>
    %cst = arith.constant dense<0.000000e+00> : vector<8xf32>
    %11 = vector.multi_reduction <add>, %1, %cst [1] : vector<8x32xf32> to vector<8xf32>
    %12 = vector.shape_cast %11 : vector<8xf32> to vector<8x1xf32>
    %cst_17 = arith.constant 3.200000e+01 : f32
    %13 = vector.broadcast %cst_17 : f32 to vector<8x1xf32>
    %14 = arith.divf %12, %13 : vector<8x1xf32>
    %15 = arith.mulf %1, %1 : vector<8x32xf32>
    %cst_18 = arith.constant dense<0.000000e+00> : vector<8xf32>
    %16 = vector.multi_reduction <add>, %15, %cst_18 [1] : vector<8x32xf32> to vector<8xf32>
    %17 = vector.shape_cast %16 : vector<8xf32> to vector<8x1xf32>
    %cst_19 = arith.constant 3.200000e+01 : f32
    %18 = vector.broadcast %cst_19 : f32 to vector<8x1xf32>
    %19 = arith.divf %17, %18 : vector<8x1xf32>
    %20 = arith.mulf %14, %14 : vector<8x1xf32>
    %21 = arith.subf %19, %20 : vector<8x1xf32>
    %22 = vector.broadcast %14 : vector<8x1xf32> to vector<8x32xf32>
    %23 = arith.subf %1, %22 : vector<8x32xf32>
    %cst_20 = arith.constant 9.99999974E-6 : f32
    %24 = vector.broadcast %cst_20 : f32 to vector<8x1xf32>
    %25 = arith.addf %21, %24 : vector<8x1xf32>
    %26 = math.rsqrt %25 : vector<8x1xf32>
    %27 = vector.broadcast %26 : vector<8x1xf32> to vector<8x32xf32>
    %28 = arith.mulf %23, %27 : vector<8x32xf32>
    %29 = vector.broadcast %8 : vector<1x32xf32> to vector<8x32xf32>
    %30 = arith.mulf %28, %29 : vector<8x32xf32>
    %31 = vector.broadcast %10 : vector<1x32xf32> to vector<8x32xf32>
    %32 = arith.addf %30, %31 : vector<8x32xf32>
    %cst_21 = arith.constant dense<0.000000e+00> : vector<8x128xf32>
    %33 = tpu.matmul %32, %4, %cst_21 {dimension_numbers = #tpu.dot_dimension_numbers<[1], [0], [0], [1], [0, 0, 1, 1], [], []>} : vector<8x32xf32>, vector<32x128xf32>, vector<8x128xf32> -> vector<8x128xf32>
    %34 = vector.broadcast %6 : vector<1x128xf32> to vector<8x128xf32>
    %35 = arith.addf %33, %34 : vector<8x128xf32>
    %36 = vector.extract_strided_slice %35 {offsets = [0, 0], sizes = [8, 32], strides = [1, 1]} : vector<8x128xf32> to vector<8x32xf32>
    %37 = vector.extract_strided_slice %35 {offsets = [0, 32], sizes = [8, 32], strides = [1, 1]} : vector<8x128xf32> to vector<8x32xf32>
    %38 = vector.extract_strided_slice %35 {offsets = [0, 64], sizes = [8, 32], strides = [1, 1]} : vector<8x128xf32> to vector<8x32xf32>
    %39 = vector.extract_strided_slice %36 {offsets = [0, 0], sizes = [8, 8], strides = [1, 1]} : vector<8x32xf32> to vector<8x8xf32>
    %40 = vector.extract_strided_slice %37 {offsets = [0, 0], sizes = [8, 8], strides = [1, 1]} : vector<8x32xf32> to vector<8x8xf32>
    %41 = vector.extract_strided_slice %38 {offsets = [0, 0], sizes = [8, 8], strides = [1, 1]} : vector<8x32xf32> to vector<8x8xf32>
    %cst_22 = arith.constant dense<0.000000e+00> : vector<8x8xf32>
    %42 = tpu.matmul %39, %40, %cst_22 {dimension_numbers = #tpu.dot_dimension_numbers<[1], [1], [0], [0], [0, 0, 1, 0], [], []>} : vector<8x8xf32>, vector<8x8xf32>, vector<8x8xf32> -> vector<8x8xf32>
    %cst_23 = arith.constant 0.353553385 : f32
    %43 = vector.broadcast %cst_23 : f32 to vector<8x8xf32>
    %44 = arith.mulf %42, %43 : vector<8x8xf32>
    %c0_24 = arith.constant 0 : index
    %c0_25 = arith.constant 0 : index
    %c0_26 = arith.constant 0 : index
    %c0_27 = arith.constant 0 : index
    %45 = vector.load %arg3[%c0_24, %c0_25, %c0_26, %c0_27] : memref<2x4x8x8xf32, #tpu.memory_space<vmem>>, vector<1x1x8x8xf32>
    %46 = vector.shape_cast %45 : vector<1x1x8x8xf32> to vector<8x8xf32>
    %47 = arith.addf %44, %46 : vector<8x8xf32>
    %cst_28 = arith.constant dense<0xFF800000> : vector<8xf32>
    %48 = vector.multi_reduction <maximumf>, %47, %cst_28 [1] : vector<8x8xf32> to vector<8xf32>
    %49 = vector.shape_cast %48 : vector<8xf32> to vector<8x1xf32>
    %50 = vector.broadcast %49 : vector<8x1xf32> to vector<8x8xf32>
    %51 = arith.subf %47, %50 : vector<8x8xf32>
    %52 = math.exp %51 : vector<8x8xf32>
    %cst_29 = arith.constant dense<0.000000e+00> : vector<8xf32>
    %53 = vector.multi_reduction <add>, %52, %cst_29 [1] : vector<8x8xf32> to vector<8xf32>
    %54 = vector.shape_cast %53 : vector<8xf32> to vector<8x1xf32>
    %55 = tpu.reciprocal %54 {approx = true} : vector<8x1xf32> -> vector<8x1xf32>
    %56 = vector.broadcast %55 : vector<8x1xf32> to vector<8x8xf32>
    %57 = arith.mulf %52, %56 : vector<8x8xf32>
    %cst_30 = arith.constant dense<0.000000e+00> : vector<8x8xf32>
    %58 = tpu.matmul %57, %41, %cst_30 {dimension_numbers = #tpu.dot_dimension_numbers<[1], [0], [0], [1], [0, 0, 1, 1], [], []>} : vector<8x8xf32>, vector<8x8xf32>, vector<8x8xf32> -> vector<8x8xf32>
    %59 = vector.extract_strided_slice %36 {offsets = [0, 8], sizes = [8, 8], strides = [1, 1]} : vector<8x32xf32> to vector<8x8xf32>
    %60 = vector.extract_strided_slice %37 {offsets = [0, 8], sizes = [8, 8], strides = [1, 1]} : vector<8x32xf32> to vector<8x8xf32>
    %61 = vector.extract_strided_slice %38 {offsets = [0, 8], sizes = [8, 8], strides = [1, 1]} : vector<8x32xf32> to vector<8x8xf32>
    %cst_31 = arith.constant dense<0.000000e+00> : vector<8x8xf32>
    %62 = tpu.matmul %59, %60, %cst_31 {dimension_numbers = #tpu.dot_dimension_numbers<[1], [1], [0], [0], [0, 0, 1, 0], [], []>} : vector<8x8xf32>, vector<8x8xf32>, vector<8x8xf32> -> vector<8x8xf32>
    %cst_32 = arith.constant 0.353553385 : f32
    %63 = vector.broadcast %cst_32 : f32 to vector<8x8xf32>
    %64 = arith.mulf %62, %63 : vector<8x8xf32>
    %c0_33 = arith.constant 0 : index
    %c1_34 = arith.constant 1 : index
    %c0_35 = arith.constant 0 : index
    %c0_36 = arith.constant 0 : index
    %65 = vector.load %arg3[%c0_33, %c1_34, %c0_35, %c0_36] : memref<2x4x8x8xf32, #tpu.memory_space<vmem>>, vector<1x1x8x8xf32>
    %66 = vector.shape_cast %65 : vector<1x1x8x8xf32> to vector<8x8xf32>
    %67 = arith.addf %64, %66 : vector<8x8xf32>
    %cst_37 = arith.constant dense<0xFF800000> : vector<8xf32>
    %68 = vector.multi_reduction <maximumf>, %67, %cst_37 [1] : vector<8x8xf32> to vector<8xf32>
    %69 = vector.shape_cast %68 : vector<8xf32> to vector<8x1xf32>
    %70 = vector.broadcast %69 : vector<8x1xf32> to vector<8x8xf32>
    %71 = arith.subf %67, %70 : vector<8x8xf32>
    %72 = math.exp %71 : vector<8x8xf32>
    %cst_38 = arith.constant dense<0.000000e+00> : vector<8xf32>
    %73 = vector.multi_reduction <add>, %72, %cst_38 [1] : vector<8x8xf32> to vector<8xf32>
    %74 = vector.shape_cast %73 : vector<8xf32> to vector<8x1xf32>
    %75 = tpu.reciprocal %74 {approx = true} : vector<8x1xf32> -> vector<8x1xf32>
    %76 = vector.broadcast %75 : vector<8x1xf32> to vector<8x8xf32>
    %77 = arith.mulf %72, %76 : vector<8x8xf32>
    %cst_39 = arith.constant dense<0.000000e+00> : vector<8x8xf32>
    %78 = tpu.matmul %77, %61, %cst_39 {dimension_numbers = #tpu.dot_dimension_numbers<[1], [0], [0], [1], [0, 0, 1, 1], [], []>} : vector<8x8xf32>, vector<8x8xf32>, vector<8x8xf32> -> vector<8x8xf32>
    %79 = vector.extract_strided_slice %36 {offsets = [0, 16], sizes = [8, 8], strides = [1, 1]} : vector<8x32xf32> to vector<8x8xf32>
    %80 = vector.extract_strided_slice %37 {offsets = [0, 16], sizes = [8, 8], strides = [1, 1]} : vector<8x32xf32> to vector<8x8xf32>
    %81 = vector.extract_strided_slice %38 {offsets = [0, 16], sizes = [8, 8], strides = [1, 1]} : vector<8x32xf32> to vector<8x8xf32>
    %cst_40 = arith.constant dense<0.000000e+00> : vector<8x8xf32>
    %82 = tpu.matmul %79, %80, %cst_40 {dimension_numbers = #tpu.dot_dimension_numbers<[1], [1], [0], [0], [0, 0, 1, 0], [], []>} : vector<8x8xf32>, vector<8x8xf32>, vector<8x8xf32> -> vector<8x8xf32>
    %cst_41 = arith.constant 0.353553385 : f32
    %83 = vector.broadcast %cst_41 : f32 to vector<8x8xf32>
    %84 = arith.mulf %82, %83 : vector<8x8xf32>
    %c0_42 = arith.constant 0 : index
    %c2 = arith.constant 2 : index
    %c0_43 = arith.constant 0 : index
    %c0_44 = arith.constant 0 : index
    %85 = vector.load %arg3[%c0_42, %c2, %c0_43, %c0_44] : memref<2x4x8x8xf32, #tpu.memory_space<vmem>>, vector<1x1x8x8xf32>
    %86 = vector.shape_cast %85 : vector<1x1x8x8xf32> to vector<8x8xf32>
    %87 = arith.addf %84, %86 : vector<8x8xf32>
    %cst_45 = arith.constant dense<0xFF800000> : vector<8xf32>
    %88 = vector.multi_reduction <maximumf>, %87, %cst_45 [1] : vector<8x8xf32> to vector<8xf32>
    %89 = vector.shape_cast %88 : vector<8xf32> to vector<8x1xf32>
    %90 = vector.broadcast %89 : vector<8x1xf32> to vector<8x8xf32>
    %91 = arith.subf %87, %90 : vector<8x8xf32>
    %92 = math.exp %91 : vector<8x8xf32>
    %cst_46 = arith.constant dense<0.000000e+00> : vector<8xf32>
    %93 = vector.multi_reduction <add>, %92, %cst_46 [1] : vector<8x8xf32> to vector<8xf32>
    %94 = vector.shape_cast %93 : vector<8xf32> to vector<8x1xf32>
    %95 = tpu.reciprocal %94 {approx = true} : vector<8x1xf32> -> vector<8x1xf32>
    %96 = vector.broadcast %95 : vector<8x1xf32> to vector<8x8xf32>
    %97 = arith.mulf %92, %96 : vector<8x8xf32>
    %cst_47 = arith.constant dense<0.000000e+00> : vector<8x8xf32>
    %98 = tpu.matmul %97, %81, %cst_47 {dimension_numbers = #tpu.dot_dimension_numbers<[1], [0], [0], [1], [0, 0, 1, 1], [], []>} : vector<8x8xf32>, vector<8x8xf32>, vector<8x8xf32> -> vector<8x8xf32>
    %99 = vector.extract_strided_slice %36 {offsets = [0, 24], sizes = [8, 8], strides = [1, 1]} : vector<8x32xf32> to vector<8x8xf32>
    %100 = vector.extract_strided_slice %37 {offsets = [0, 24], sizes = [8, 8], strides = [1, 1]} : vector<8x32xf32> to vector<8x8xf32>
    %101 = vector.extract_strided_slice %38 {offsets = [0, 24], sizes = [8, 8], strides = [1, 1]} : vector<8x32xf32> to vector<8x8xf32>
    %cst_48 = arith.constant dense<0.000000e+00> : vector<8x8xf32>
    %102 = tpu.matmul %99, %100, %cst_48 {dimension_numbers = #tpu.dot_dimension_numbers<[1], [1], [0], [0], [0, 0, 1, 0], [], []>} : vector<8x8xf32>, vector<8x8xf32>, vector<8x8xf32> -> vector<8x8xf32>
    %cst_49 = arith.constant 0.353553385 : f32
    %103 = vector.broadcast %cst_49 : f32 to vector<8x8xf32>
    %104 = arith.mulf %102, %103 : vector<8x8xf32>
    %c0_50 = arith.constant 0 : index
    %c3 = arith.constant 3 : index
    %c0_51 = arith.constant 0 : index
    %c0_52 = arith.constant 0 : index
    %105 = vector.load %arg3[%c0_50, %c3, %c0_51, %c0_52] : memref<2x4x8x8xf32, #tpu.memory_space<vmem>>, vector<1x1x8x8xf32>
    %106 = vector.shape_cast %105 : vector<1x1x8x8xf32> to vector<8x8xf32>
    %107 = arith.addf %104, %106 : vector<8x8xf32>
    %cst_53 = arith.constant dense<0xFF800000> : vector<8xf32>
    %108 = vector.multi_reduction <maximumf>, %107, %cst_53 [1] : vector<8x8xf32> to vector<8xf32>
    %109 = vector.shape_cast %108 : vector<8xf32> to vector<8x1xf32>
    %110 = vector.broadcast %109 : vector<8x1xf32> to vector<8x8xf32>
    %111 = arith.subf %107, %110 : vector<8x8xf32>
    %112 = math.exp %111 : vector<8x8xf32>
    %cst_54 = arith.constant dense<0.000000e+00> : vector<8xf32>
    %113 = vector.multi_reduction <add>, %112, %cst_54 [1] : vector<8x8xf32> to vector<8xf32>
    %114 = vector.shape_cast %113 : vector<8xf32> to vector<8x1xf32>
    %115 = tpu.reciprocal %114 {approx = true} : vector<8x1xf32> -> vector<8x1xf32>
    %116 = vector.broadcast %115 : vector<8x1xf32> to vector<8x8xf32>
    %117 = arith.mulf %112, %116 : vector<8x8xf32>
    %cst_55 = arith.constant dense<0.000000e+00> : vector<8x8xf32>
    %118 = tpu.matmul %117, %101, %cst_55 {dimension_numbers = #tpu.dot_dimension_numbers<[1], [0], [0], [1], [0, 0, 1, 1], [], []>} : vector<8x8xf32>, vector<8x8xf32>, vector<8x8xf32> -> vector<8x8xf32>
    %119 = tpu.concatenate %58, %78, %98, %118 in 1 : vector<8x8xf32>, vector<8x8xf32>, vector<8x8xf32>, vector<8x8xf32> -> vector<8x32xf32>
    %120 = vector.extract_strided_slice %4 {offsets = [0, 96], sizes = [32, 32], strides = [1, 1]} : vector<32x128xf32> to vector<32x32xf32>
    %cst_56 = arith.constant dense<0.000000e+00> : vector<8x32xf32>
    %121 = tpu.matmul %119, %120, %cst_56 {dimension_numbers = #tpu.dot_dimension_numbers<[1], [0], [0], [1], [0, 0, 1, 1], [], []>} : vector<8x32xf32>, vector<32x32xf32>, vector<8x32xf32> -> vector<8x32xf32>
    %122 = arith.addf %1, %121 : vector<8x32xf32>
    %123 = vector.extract_strided_slice %6 {offsets = [0, 96], sizes = [1, 32], strides = [1, 1]} : vector<1x128xf32> to vector<1x32xf32>
    %124 = vector.broadcast %123 : vector<1x32xf32> to vector<8x32xf32>
    %125 = arith.addf %122, %124 : vector<8x32xf32>
    %c1_57 = arith.constant 1 : index
    %c0_58 = arith.constant 0 : index
    %c0_59 = arith.constant 0 : index
    %126 = vector.load %arg5[%c1_57, %c0_58, %c0_59] : memref<5x32x128xf32, #tpu.memory_space<vmem>>, vector<1x32x128xf32>
    %127 = vector.shape_cast %126 : vector<1x32x128xf32> to vector<32x128xf32>
    %c1_60 = arith.constant 1 : index
    %c0_61 = arith.constant 0 : index
    %c0_62 = arith.constant 0 : index
    %128 = vector.load %arg6[%c1_60, %c0_61, %c0_62] : memref<5x1x128xf32, #tpu.memory_space<vmem>>, vector<1x1x128xf32>
    %129 = vector.shape_cast %128 : vector<1x1x128xf32> to vector<1x128xf32>
    %c1_63 = arith.constant 1 : index
    %c0_64 = arith.constant 0 : index
    %c0_65 = arith.constant 0 : index
    %c0_66 = arith.constant 0 : index
    %130 = vector.load %arg4[%c1_63, %c0_64, %c0_65, %c0_66] : memref<8x2x1x32xf32, #tpu.memory_space<vmem>>, vector<1x1x1x32xf32>
    %131 = vector.shape_cast %130 : vector<1x1x1x32xf32> to vector<1x32xf32>
    %c1_67 = arith.constant 1 : index
    %c1_68 = arith.constant 1 : index
    %c0_69 = arith.constant 0 : index
    %c0_70 = arith.constant 0 : index
    %132 = vector.load %arg4[%c1_67, %c1_68, %c0_69, %c0_70] : memref<8x2x1x32xf32, #tpu.memory_space<vmem>>, vector<1x1x1x32xf32>
    %133 = vector.shape_cast %132 : vector<1x1x1x32xf32> to vector<1x32xf32>
    %cst_71 = arith.constant dense<0.000000e+00> : vector<8xf32>
    %134 = vector.multi_reduction <add>, %125, %cst_71 [1] : vector<8x32xf32> to vector<8xf32>
    %135 = vector.shape_cast %134 : vector<8xf32> to vector<8x1xf32>
    %cst_72 = arith.constant 3.200000e+01 : f32
    %136 = vector.broadcast %cst_72 : f32 to vector<8x1xf32>
    %137 = arith.divf %135, %136 : vector<8x1xf32>
    %138 = arith.mulf %125, %125 : vector<8x32xf32>
    %cst_73 = arith.constant dense<0.000000e+00> : vector<8xf32>
    %139 = vector.multi_reduction <add>, %138, %cst_73 [1] : vector<8x32xf32> to vector<8xf32>
    %140 = vector.shape_cast %139 : vector<8xf32> to vector<8x1xf32>
    %cst_74 = arith.constant 3.200000e+01 : f32
    %141 = vector.broadcast %cst_74 : f32 to vector<8x1xf32>
    %142 = arith.divf %140, %141 : vector<8x1xf32>
    %143 = arith.mulf %137, %137 : vector<8x1xf32>
    %144 = arith.subf %142, %143 : vector<8x1xf32>
    %145 = vector.broadcast %137 : vector<8x1xf32> to vector<8x32xf32>
    %146 = arith.subf %125, %145 : vector<8x32xf32>
    %cst_75 = arith.constant 9.99999974E-6 : f32
    %147 = vector.broadcast %cst_75 : f32 to vector<8x1xf32>
    %148 = arith.addf %144, %147 : vector<8x1xf32>
    %149 = math.rsqrt %148 : vector<8x1xf32>
    %150 = vector.broadcast %149 : vector<8x1xf32> to vector<8x32xf32>
    %151 = arith.mulf %146, %150 : vector<8x32xf32>
    %152 = vector.broadcast %131 : vector<1x32xf32> to vector<8x32xf32>
    %153 = arith.mulf %151, %152 : vector<8x32xf32>
    %154 = vector.broadcast %133 : vector<1x32xf32> to vector<8x32xf32>
    %155 = arith.addf %153, %154 : vector<8x32xf32>
    %cst_76 = arith.constant dense<0.000000e+00> : vector<8x128xf32>
    %156 = tpu.matmul %155, %127, %cst_76 {dimension_numbers = #tpu.dot_dimension_numbers<[1], [0], [0], [1], [0, 0, 1, 1], [], []>} : vector<8x32xf32>, vector<32x128xf32>, vector<8x128xf32> -> vector<8x128xf32>
    %157 = vector.broadcast %129 : vector<1x128xf32> to vector<8x128xf32>
    %158 = arith.addf %156, %157 : vector<8x128xf32>
    %cst_77 = arith.constant dense<0.000000e+00> : vector<4x128xf32>
    %159 = tpu.matmul %2, %127, %cst_77 {dimension_numbers = #tpu.dot_dimension_numbers<[1], [0], [0], [1], [0, 0, 1, 1], [], []>} : vector<4x32xf32>, vector<32x128xf32>, vector<4x128xf32> -> vector<4x128xf32>
    %160 = vector.broadcast %129 : vector<1x128xf32> to vector<4x128xf32>
    %161 = arith.addf %159, %160 : vector<4x128xf32>
    %162 = vector.extract_strided_slice %158 {offsets = [0, 0], sizes = [8, 32], strides = [1, 1]} : vector<8x128xf32> to vector<8x32xf32>
    %163 = vector.extract_strided_slice %161 {offsets = [0, 32], sizes = [4, 32], strides = [1, 1]} : vector<4x128xf32> to vector<4x32xf32>
    %164 = vector.extract_strided_slice %161 {offsets = [0, 64], sizes = [4, 32], strides = [1, 1]} : vector<4x128xf32> to vector<4x32xf32>
    %165 = vector.extract_strided_slice %162 {offsets = [0, 0], sizes = [8, 8], strides = [1, 1]} : vector<8x32xf32> to vector<8x8xf32>
    %166 = vector.extract_strided_slice %163 {offsets = [0, 0], sizes = [4, 8], strides = [1, 1]} : vector<4x32xf32> to vector<4x8xf32>
    %167 = vector.extract_strided_slice %164 {offsets = [0, 0], sizes = [4, 8], strides = [1, 1]} : vector<4x32xf32> to vector<4x8xf32>
    %cst_78 = arith.constant dense<0.000000e+00> : vector<8x4xf32>
    %168 = tpu.matmul %165, %166, %cst_78 {dimension_numbers = #tpu.dot_dimension_numbers<[1], [1], [0], [0], [0, 0, 1, 0], [], []>} : vector<8x8xf32>, vector<4x8xf32>, vector<8x4xf32> -> vector<8x4xf32>
    %cst_79 = arith.constant 0.353553385 : f32
    %169 = vector.broadcast %cst_79 : f32 to vector<8x4xf32>
    %170 = arith.mulf %168, %169 : vector<8x4xf32>
    %cst_80 = arith.constant dense<0xFF800000> : vector<8xf32>
    %171 = vector.multi_reduction <maximumf>, %170, %cst_80 [1] : vector<8x4xf32> to vector<8xf32>
    %172 = vector.shape_cast %171 : vector<8xf32> to vector<8x1xf32>
    %173 = vector.broadcast %172 : vector<8x1xf32> to vector<8x4xf32>
    %174 = arith.subf %170, %173 : vector<8x4xf32>
    %175 = math.exp %174 : vector<8x4xf32>
    %cst_81 = arith.constant dense<0.000000e+00> : vector<8xf32>
    %176 = vector.multi_reduction <add>, %175, %cst_81 [1] : vector<8x4xf32> to vector<8xf32>
    %177 = vector.shape_cast %176 : vector<8xf32> to vector<8x1xf32>
    %178 = tpu.reciprocal %177 {approx = true} : vector<8x1xf32> -> vector<8x1xf32>
    %179 = vector.broadcast %178 : vector<8x1xf32> to vector<8x4xf32>
    %180 = arith.mulf %175, %179 : vector<8x4xf32>
    %cst_82 = arith.constant dense<0.000000e+00> : vector<8x8xf32>
    %181 = tpu.matmul %180, %167, %cst_82 {dimension_numbers = #tpu.dot_dimension_numbers<[1], [0], [0], [1], [0, 0, 1, 1], [], []>} : vector<8x4xf32>, vector<4x8xf32>, vector<8x8xf32> -> vector<8x8xf32>
    %182 = vector.extract_strided_slice %162 {offsets = [0, 8], sizes = [8, 8], strides = [1, 1]} : vector<8x32xf32> to vector<8x8xf32>
    %183 = vector.extract_strided_slice %163 {offsets = [0, 8], sizes = [4, 8], strides = [1, 1]} : vector<4x32xf32> to vector<4x8xf32>
    %184 = vector.extract_strided_slice %164 {offsets = [0, 8], sizes = [4, 8], strides = [1, 1]} : vector<4x32xf32> to vector<4x8xf32>
    %cst_83 = arith.constant dense<0.000000e+00> : vector<8x4xf32>
    %185 = tpu.matmul %182, %183, %cst_83 {dimension_numbers = #tpu.dot_dimension_numbers<[1], [1], [0], [0], [0, 0, 1, 0], [], []>} : vector<8x8xf32>, vector<4x8xf32>, vector<8x4xf32> -> vector<8x4xf32>
    %cst_84 = arith.constant 0.353553385 : f32
    %186 = vector.broadcast %cst_84 : f32 to vector<8x4xf32>
    %187 = arith.mulf %185, %186 : vector<8x4xf32>
    %cst_85 = arith.constant dense<0xFF800000> : vector<8xf32>
    %188 = vector.multi_reduction <maximumf>, %187, %cst_85 [1] : vector<8x4xf32> to vector<8xf32>
    %189 = vector.shape_cast %188 : vector<8xf32> to vector<8x1xf32>
    %190 = vector.broadcast %189 : vector<8x1xf32> to vector<8x4xf32>
    %191 = arith.subf %187, %190 : vector<8x4xf32>
    %192 = math.exp %191 : vector<8x4xf32>
    %cst_86 = arith.constant dense<0.000000e+00> : vector<8xf32>
    %193 = vector.multi_reduction <add>, %192, %cst_86 [1] : vector<8x4xf32> to vector<8xf32>
    %194 = vector.shape_cast %193 : vector<8xf32> to vector<8x1xf32>
    %195 = tpu.reciprocal %194 {approx = true} : vector<8x1xf32> -> vector<8x1xf32>
    %196 = vector.broadcast %195 : vector<8x1xf32> to vector<8x4xf32>
    %197 = arith.mulf %192, %196 : vector<8x4xf32>
    %cst_87 = arith.constant dense<0.000000e+00> : vector<8x8xf32>
    %198 = tpu.matmul %197, %184, %cst_87 {dimension_numbers = #tpu.dot_dimension_numbers<[1], [0], [0], [1], [0, 0, 1, 1], [], []>} : vector<8x4xf32>, vector<4x8xf32>, vector<8x8xf32> -> vector<8x8xf32>
    %199 = vector.extract_strided_slice %162 {offsets = [0, 16], sizes = [8, 8], strides = [1, 1]} : vector<8x32xf32> to vector<8x8xf32>
    %200 = vector.extract_strided_slice %163 {offsets = [0, 16], sizes = [4, 8], strides = [1, 1]} : vector<4x32xf32> to vector<4x8xf32>
    %201 = vector.extract_strided_slice %164 {offsets = [0, 16], sizes = [4, 8], strides = [1, 1]} : vector<4x32xf32> to vector<4x8xf32>
    %cst_88 = arith.constant dense<0.000000e+00> : vector<8x4xf32>
    %202 = tpu.matmul %199, %200, %cst_88 {dimension_numbers = #tpu.dot_dimension_numbers<[1], [1], [0], [0], [0, 0, 1, 0], [], []>} : vector<8x8xf32>, vector<4x8xf32>, vector<8x4xf32> -> vector<8x4xf32>
    %cst_89 = arith.constant 0.353553385 : f32
    %203 = vector.broadcast %cst_89 : f32 to vector<8x4xf32>
    %204 = arith.mulf %202, %203 : vector<8x4xf32>
    %cst_90 = arith.constant dense<0xFF800000> : vector<8xf32>
    %205 = vector.multi_reduction <maximumf>, %204, %cst_90 [1] : vector<8x4xf32> to vector<8xf32>
    %206 = vector.shape_cast %205 : vector<8xf32> to vector<8x1xf32>
    %207 = vector.broadcast %206 : vector<8x1xf32> to vector<8x4xf32>
    %208 = arith.subf %204, %207 : vector<8x4xf32>
    %209 = math.exp %208 : vector<8x4xf32>
    %cst_91 = arith.constant dense<0.000000e+00> : vector<8xf32>
    %210 = vector.multi_reduction <add>, %209, %cst_91 [1] : vector<8x4xf32> to vector<8xf32>
    %211 = vector.shape_cast %210 : vector<8xf32> to vector<8x1xf32>
    %212 = tpu.reciprocal %211 {approx = true} : vector<8x1xf32> -> vector<8x1xf32>
    %213 = vector.broadcast %212 : vector<8x1xf32> to vector<8x4xf32>
    %214 = arith.mulf %209, %213 : vector<8x4xf32>
    %cst_92 = arith.constant dense<0.000000e+00> : vector<8x8xf32>
    %215 = tpu.matmul %214, %201, %cst_92 {dimension_numbers = #tpu.dot_dimension_numbers<[1], [0], [0], [1], [0, 0, 1, 1], [], []>} : vector<8x4xf32>, vector<4x8xf32>, vector<8x8xf32> -> vector<8x8xf32>
    %216 = vector.extract_strided_slice %162 {offsets = [0, 24], sizes = [8, 8], strides = [1, 1]} : vector<8x32xf32> to vector<8x8xf32>
    %217 = vector.extract_strided_slice %163 {offsets = [0, 24], sizes = [4, 8], strides = [1, 1]} : vector<4x32xf32> to vector<4x8xf32>
    %218 = vector.extract_strided_slice %164 {offsets = [0, 24], sizes = [4, 8], strides = [1, 1]} : vector<4x32xf32> to vector<4x8xf32>
    %cst_93 = arith.constant dense<0.000000e+00> : vector<8x4xf32>
    %219 = tpu.matmul %216, %217, %cst_93 {dimension_numbers = #tpu.dot_dimension_numbers<[1], [1], [0], [0], [0, 0, 1, 0], [], []>} : vector<8x8xf32>, vector<4x8xf32>, vector<8x4xf32> -> vector<8x4xf32>
    %cst_94 = arith.constant 0.353553385 : f32
    %220 = vector.broadcast %cst_94 : f32 to vector<8x4xf32>
    %221 = arith.mulf %219, %220 : vector<8x4xf32>
    %cst_95 = arith.constant dense<0xFF800000> : vector<8xf32>
    %222 = vector.multi_reduction <maximumf>, %221, %cst_95 [1] : vector<8x4xf32> to vector<8xf32>
    %223 = vector.shape_cast %222 : vector<8xf32> to vector<8x1xf32>
    %224 = vector.broadcast %223 : vector<8x1xf32> to vector<8x4xf32>
    %225 = arith.subf %221, %224 : vector<8x4xf32>
    %226 = math.exp %225 : vector<8x4xf32>
    %cst_96 = arith.constant dense<0.000000e+00> : vector<8xf32>
    %227 = vector.multi_reduction <add>, %226, %cst_96 [1] : vector<8x4xf32> to vector<8xf32>
    %228 = vector.shape_cast %227 : vector<8xf32> to vector<8x1xf32>
    %229 = tpu.reciprocal %228 {approx = true} : vector<8x1xf32> -> vector<8x1xf32>
    %230 = vector.broadcast %229 : vector<8x1xf32> to vector<8x4xf32>
    %231 = arith.mulf %226, %230 : vector<8x4xf32>
    %cst_97 = arith.constant dense<0.000000e+00> : vector<8x8xf32>
    %232 = tpu.matmul %231, %218, %cst_97 {dimension_numbers = #tpu.dot_dimension_numbers<[1], [0], [0], [1], [0, 0, 1, 1], [], []>} : vector<8x4xf32>, vector<4x8xf32>, vector<8x8xf32> -> vector<8x8xf32>
    %233 = tpu.concatenate %181, %198, %215, %232 in 1 : vector<8x8xf32>, vector<8x8xf32>, vector<8x8xf32>, vector<8x8xf32> -> vector<8x32xf32>
    %234 = vector.extract_strided_slice %127 {offsets = [0, 96], sizes = [32, 32], strides = [1, 1]} : vector<32x128xf32> to vector<32x32xf32>
    %cst_98 = arith.constant dense<0.000000e+00> : vector<8x32xf32>
    %235 = tpu.matmul %233, %234, %cst_98 {dimension_numbers = #tpu.dot_dimension_numbers<[1], [0], [0], [1], [0, 0, 1, 1], [], []>} : vector<8x32xf32>, vector<32x32xf32>, vector<8x32xf32> -> vector<8x32xf32>
    %236 = arith.addf %125, %235 : vector<8x32xf32>
    %237 = vector.extract_strided_slice %129 {offsets = [0, 96], sizes = [1, 32], strides = [1, 1]} : vector<1x128xf32> to vector<1x32xf32>
    %238 = vector.broadcast %237 : vector<1x32xf32> to vector<8x32xf32>
    %239 = arith.addf %236, %238 : vector<8x32xf32>
    %c2_99 = arith.constant 2 : index
    %c0_100 = arith.constant 0 : index
    %c0_101 = arith.constant 0 : index
    %c0_102 = arith.constant 0 : index
    %240 = vector.load %arg4[%c2_99, %c0_100, %c0_101, %c0_102] : memref<8x2x1x32xf32, #tpu.memory_space<vmem>>, vector<1x1x1x32xf32>
    %241 = vector.shape_cast %240 : vector<1x1x1x32xf32> to vector<1x32xf32>
    %c2_103 = arith.constant 2 : index
    %c1_104 = arith.constant 1 : index
    %c0_105 = arith.constant 0 : index
    %c0_106 = arith.constant 0 : index
    %242 = vector.load %arg4[%c2_103, %c1_104, %c0_105, %c0_106] : memref<8x2x1x32xf32, #tpu.memory_space<vmem>>, vector<1x1x1x32xf32>
    %243 = vector.shape_cast %242 : vector<1x1x1x32xf32> to vector<1x32xf32>
    %cst_107 = arith.constant dense<0.000000e+00> : vector<8xf32>
    %244 = vector.multi_reduction <add>, %239, %cst_107 [1] : vector<8x32xf32> to vector<8xf32>
    %245 = vector.shape_cast %244 : vector<8xf32> to vector<8x1xf32>
    %cst_108 = arith.constant 3.200000e+01 : f32
    %246 = vector.broadcast %cst_108 : f32 to vector<8x1xf32>
    %247 = arith.divf %245, %246 : vector<8x1xf32>
    %248 = arith.mulf %239, %239 : vector<8x32xf32>
    %cst_109 = arith.constant dense<0.000000e+00> : vector<8xf32>
    %249 = vector.multi_reduction <add>, %248, %cst_109 [1] : vector<8x32xf32> to vector<8xf32>
    %250 = vector.shape_cast %249 : vector<8xf32> to vector<8x1xf32>
    %cst_110 = arith.constant 3.200000e+01 : f32
    %251 = vector.broadcast %cst_110 : f32 to vector<8x1xf32>
    %252 = arith.divf %250, %251 : vector<8x1xf32>
    %253 = arith.mulf %247, %247 : vector<8x1xf32>
    %254 = arith.subf %252, %253 : vector<8x1xf32>
    %255 = vector.broadcast %247 : vector<8x1xf32> to vector<8x32xf32>
    %256 = arith.subf %239, %255 : vector<8x32xf32>
    %cst_111 = arith.constant 9.99999974E-6 : f32
    %257 = vector.broadcast %cst_111 : f32 to vector<8x1xf32>
    %258 = arith.addf %254, %257 : vector<8x1xf32>
    %259 = math.rsqrt %258 : vector<8x1xf32>
    %260 = vector.broadcast %259 : vector<8x1xf32> to vector<8x32xf32>
    %261 = arith.mulf %256, %260 : vector<8x32xf32>
    %262 = vector.broadcast %241 : vector<1x32xf32> to vector<8x32xf32>
    %263 = arith.mulf %261, %262 : vector<8x32xf32>
    %264 = vector.broadcast %243 : vector<1x32xf32> to vector<8x32xf32>
    %265 = arith.addf %263, %264 : vector<8x32xf32>
    %c0_112 = arith.constant 0 : index
    %c0_113 = arith.constant 0 : index
    %c0_114 = arith.constant 0 : index
    %266 = vector.load %arg7[%c0_112, %c0_113, %c0_114] : memref<3x32x128xf32, #tpu.memory_space<vmem>>, vector<1x32x128xf32>
    %267 = vector.shape_cast %266 : vector<1x32x128xf32> to vector<32x128xf32>
    %cst_115 = arith.constant dense<0.000000e+00> : vector<8x128xf32>
    %268 = tpu.matmul %265, %267, %cst_115 {dimension_numbers = #tpu.dot_dimension_numbers<[1], [0], [0], [1], [0, 0, 1, 1], [], []>} : vector<8x32xf32>, vector<32x128xf32>, vector<8x128xf32> -> vector<8x128xf32>
    %c0_116 = arith.constant 0 : index
    %c0_117 = arith.constant 0 : index
    %c0_118 = arith.constant 0 : index
    %269 = vector.load %arg8[%c0_116, %c0_117, %c0_118] : memref<3x1x128xf32, #tpu.memory_space<vmem>>, vector<1x1x128xf32>
    %270 = vector.shape_cast %269 : vector<1x1x128xf32> to vector<1x128xf32>
    %271 = vector.broadcast %270 : vector<1x128xf32> to vector<8x128xf32>
    %272 = arith.addf %268, %271 : vector<8x128xf32>
    %273 = arith.mulf %272, %272 : vector<8x128xf32>
    %274 = arith.mulf %272, %273 : vector<8x128xf32>
    %cst_119 = arith.constant 4.471500e-02 : f32
    %275 = vector.broadcast %cst_119 : f32 to vector<8x128xf32>
    %276 = arith.mulf %275, %274 : vector<8x128xf32>
    %277 = arith.addf %272, %276 : vector<8x128xf32>
    %cst_120 = arith.constant 0.797884583 : f32
    %278 = vector.broadcast %cst_120 : f32 to vector<8x128xf32>
    %279 = arith.mulf %278, %277 : vector<8x128xf32>
    %280 = math.tanh %279 : vector<8x128xf32>
    %cst_121 = arith.constant 1.000000e+00 : f32
    %281 = vector.broadcast %cst_121 : f32 to vector<8x128xf32>
    %282 = arith.addf %281, %280 : vector<8x128xf32>
    %cst_122 = arith.constant 5.000000e-01 : f32
    %283 = vector.broadcast %cst_122 : f32 to vector<8x128xf32>
    %284 = arith.mulf %283, %282 : vector<8x128xf32>
    %285 = arith.mulf %272, %284 : vector<8x128xf32>
    %c0_123 = arith.constant 0 : index
    %c0_124 = arith.constant 0 : index
    %c0_125 = arith.constant 0 : index
    %286 = vector.load %arg9[%c0_123, %c0_124, %c0_125] : memref<3x128x32xf32, #tpu.memory_space<vmem>>, vector<1x128x32xf32>
    %287 = vector.shape_cast %286 : vector<1x128x32xf32> to vector<128x32xf32>
    %cst_126 = arith.constant dense<0.000000e+00> : vector<8x32xf32>
    %288 = tpu.matmul %285, %287, %cst_126 {dimension_numbers = #tpu.dot_dimension_numbers<[1], [0], [0], [1], [0, 0, 1, 1], [], []>} : vector<8x128xf32>, vector<128x32xf32>, vector<8x32xf32> -> vector<8x32xf32>
    %c0_127 = arith.constant 0 : index
    %c0_128 = arith.constant 0 : index
    %c0_129 = arith.constant 0 : index
    %289 = vector.load %arg10[%c0_127, %c0_128, %c0_129] : memref<3x1x32xf32, #tpu.memory_space<vmem>>, vector<1x1x32xf32>
    %290 = vector.shape_cast %289 : vector<1x1x32xf32> to vector<1x32xf32>
    %291 = vector.broadcast %290 : vector<1x32xf32> to vector<8x32xf32>
    %292 = arith.addf %288, %291 : vector<8x32xf32>
    %293 = arith.addf %239, %292 : vector<8x32xf32>
    %c2_130 = arith.constant 2 : index
    %c0_131 = arith.constant 0 : index
    %c0_132 = arith.constant 0 : index
    %294 = vector.load %arg5[%c2_130, %c0_131, %c0_132] : memref<5x32x128xf32, #tpu.memory_space<vmem>>, vector<1x32x128xf32>
    %295 = vector.shape_cast %294 : vector<1x32x128xf32> to vector<32x128xf32>
    %c2_133 = arith.constant 2 : index
    %c0_134 = arith.constant 0 : index
    %c0_135 = arith.constant 0 : index
    %296 = vector.load %arg6[%c2_133, %c0_134, %c0_135] : memref<5x1x128xf32, #tpu.memory_space<vmem>>, vector<1x1x128xf32>
    %297 = vector.shape_cast %296 : vector<1x1x128xf32> to vector<1x128xf32>
    %c3_136 = arith.constant 3 : index
    %c0_137 = arith.constant 0 : index
    %c0_138 = arith.constant 0 : index
    %c0_139 = arith.constant 0 : index
    %298 = vector.load %arg4[%c3_136, %c0_137, %c0_138, %c0_139] : memref<8x2x1x32xf32, #tpu.memory_space<vmem>>, vector<1x1x1x32xf32>
    %299 = vector.shape_cast %298 : vector<1x1x1x32xf32> to vector<1x32xf32>
    %c3_140 = arith.constant 3 : index
    %c1_141 = arith.constant 1 : index
    %c0_142 = arith.constant 0 : index
    %c0_143 = arith.constant 0 : index
    %300 = vector.load %arg4[%c3_140, %c1_141, %c0_142, %c0_143] : memref<8x2x1x32xf32, #tpu.memory_space<vmem>>, vector<1x1x1x32xf32>
    %301 = vector.shape_cast %300 : vector<1x1x1x32xf32> to vector<1x32xf32>
    %cst_144 = arith.constant dense<0.000000e+00> : vector<8xf32>
    %302 = vector.multi_reduction <add>, %293, %cst_144 [1] : vector<8x32xf32> to vector<8xf32>
    %303 = vector.shape_cast %302 : vector<8xf32> to vector<8x1xf32>
    %cst_145 = arith.constant 3.200000e+01 : f32
    %304 = vector.broadcast %cst_145 : f32 to vector<8x1xf32>
    %305 = arith.divf %303, %304 : vector<8x1xf32>
    %306 = arith.mulf %293, %293 : vector<8x32xf32>
    %cst_146 = arith.constant dense<0.000000e+00> : vector<8xf32>
    %307 = vector.multi_reduction <add>, %306, %cst_146 [1] : vector<8x32xf32> to vector<8xf32>
    %308 = vector.shape_cast %307 : vector<8xf32> to vector<8x1xf32>
    %cst_147 = arith.constant 3.200000e+01 : f32
    %309 = vector.broadcast %cst_147 : f32 to vector<8x1xf32>
    %310 = arith.divf %308, %309 : vector<8x1xf32>
    %311 = arith.mulf %305, %305 : vector<8x1xf32>
    %312 = arith.subf %310, %311 : vector<8x1xf32>
    %313 = vector.broadcast %305 : vector<8x1xf32> to vector<8x32xf32>
    %314 = arith.subf %293, %313 : vector<8x32xf32>
    %cst_148 = arith.constant 9.99999974E-6 : f32
    %315 = vector.broadcast %cst_148 : f32 to vector<8x1xf32>
    %316 = arith.addf %312, %315 : vector<8x1xf32>
    %317 = math.rsqrt %316 : vector<8x1xf32>
    %318 = vector.broadcast %317 : vector<8x1xf32> to vector<8x32xf32>
    %319 = arith.mulf %314, %318 : vector<8x32xf32>
    %320 = vector.broadcast %299 : vector<1x32xf32> to vector<8x32xf32>
    %321 = arith.mulf %319, %320 : vector<8x32xf32>
    %322 = vector.broadcast %301 : vector<1x32xf32> to vector<8x32xf32>
    %323 = arith.addf %321, %322 : vector<8x32xf32>
    %cst_149 = arith.constant dense<0.000000e+00> : vector<8x128xf32>
    %324 = tpu.matmul %323, %295, %cst_149 {dimension_numbers = #tpu.dot_dimension_numbers<[1], [0], [0], [1], [0, 0, 1, 1], [], []>} : vector<8x32xf32>, vector<32x128xf32>, vector<8x128xf32> -> vector<8x128xf32>
    %325 = vector.broadcast %297 : vector<1x128xf32> to vector<8x128xf32>
    %326 = arith.addf %324, %325 : vector<8x128xf32>
    %327 = vector.extract_strided_slice %326 {offsets = [0, 0], sizes = [8, 32], strides = [1, 1]} : vector<8x128xf32> to vector<8x32xf32>
    %328 = vector.extract_strided_slice %326 {offsets = [0, 32], sizes = [8, 32], strides = [1, 1]} : vector<8x128xf32> to vector<8x32xf32>
    %329 = vector.extract_strided_slice %326 {offsets = [0, 64], sizes = [8, 32], strides = [1, 1]} : vector<8x128xf32> to vector<8x32xf32>
    %330 = vector.extract_strided_slice %327 {offsets = [0, 0], sizes = [8, 8], strides = [1, 1]} : vector<8x32xf32> to vector<8x8xf32>
    %331 = vector.extract_strided_slice %328 {offsets = [0, 0], sizes = [8, 8], strides = [1, 1]} : vector<8x32xf32> to vector<8x8xf32>
    %332 = vector.extract_strided_slice %329 {offsets = [0, 0], sizes = [8, 8], strides = [1, 1]} : vector<8x32xf32> to vector<8x8xf32>
    %cst_150 = arith.constant dense<0.000000e+00> : vector<8x8xf32>
    %333 = tpu.matmul %330, %331, %cst_150 {dimension_numbers = #tpu.dot_dimension_numbers<[1], [1], [0], [0], [0, 0, 1, 0], [], []>} : vector<8x8xf32>, vector<8x8xf32>, vector<8x8xf32> -> vector<8x8xf32>
    %cst_151 = arith.constant 0.353553385 : f32
    %334 = vector.broadcast %cst_151 : f32 to vector<8x8xf32>
    %335 = arith.mulf %333, %334 : vector<8x8xf32>
    %c1_152 = arith.constant 1 : index
    %c0_153 = arith.constant 0 : index
    %c0_154 = arith.constant 0 : index
    %c0_155 = arith.constant 0 : index
    %336 = vector.load %arg3[%c1_152, %c0_153, %c0_154, %c0_155] : memref<2x4x8x8xf32, #tpu.memory_space<vmem>>, vector<1x1x8x8xf32>
    %337 = vector.shape_cast %336 : vector<1x1x8x8xf32> to vector<8x8xf32>
    %338 = arith.addf %335, %337 : vector<8x8xf32>
    %cst_156 = arith.constant dense<0xFF800000> : vector<8xf32>
    %339 = vector.multi_reduction <maximumf>, %338, %cst_156 [1] : vector<8x8xf32> to vector<8xf32>
    %340 = vector.shape_cast %339 : vector<8xf32> to vector<8x1xf32>
    %341 = vector.broadcast %340 : vector<8x1xf32> to vector<8x8xf32>
    %342 = arith.subf %338, %341 : vector<8x8xf32>
    %343 = math.exp %342 : vector<8x8xf32>
    %cst_157 = arith.constant dense<0.000000e+00> : vector<8xf32>
    %344 = vector.multi_reduction <add>, %343, %cst_157 [1] : vector<8x8xf32> to vector<8xf32>
    %345 = vector.shape_cast %344 : vector<8xf32> to vector<8x1xf32>
    %346 = tpu.reciprocal %345 {approx = true} : vector<8x1xf32> -> vector<8x1xf32>
    %347 = vector.broadcast %346 : vector<8x1xf32> to vector<8x8xf32>
    %348 = arith.mulf %343, %347 : vector<8x8xf32>
    %cst_158 = arith.constant dense<0.000000e+00> : vector<8x8xf32>
    %349 = tpu.matmul %348, %332, %cst_158 {dimension_numbers = #tpu.dot_dimension_numbers<[1], [0], [0], [1], [0, 0, 1, 1], [], []>} : vector<8x8xf32>, vector<8x8xf32>, vector<8x8xf32> -> vector<8x8xf32>
    %350 = vector.extract_strided_slice %327 {offsets = [0, 8], sizes = [8, 8], strides = [1, 1]} : vector<8x32xf32> to vector<8x8xf32>
    %351 = vector.extract_strided_slice %328 {offsets = [0, 8], sizes = [8, 8], strides = [1, 1]} : vector<8x32xf32> to vector<8x8xf32>
    %352 = vector.extract_strided_slice %329 {offsets = [0, 8], sizes = [8, 8], strides = [1, 1]} : vector<8x32xf32> to vector<8x8xf32>
    %cst_159 = arith.constant dense<0.000000e+00> : vector<8x8xf32>
    %353 = tpu.matmul %350, %351, %cst_159 {dimension_numbers = #tpu.dot_dimension_numbers<[1], [1], [0], [0], [0, 0, 1, 0], [], []>} : vector<8x8xf32>, vector<8x8xf32>, vector<8x8xf32> -> vector<8x8xf32>
    %cst_160 = arith.constant 0.353553385 : f32
    %354 = vector.broadcast %cst_160 : f32 to vector<8x8xf32>
    %355 = arith.mulf %353, %354 : vector<8x8xf32>
    %c1_161 = arith.constant 1 : index
    %c1_162 = arith.constant 1 : index
    %c0_163 = arith.constant 0 : index
    %c0_164 = arith.constant 0 : index
    %356 = vector.load %arg3[%c1_161, %c1_162, %c0_163, %c0_164] : memref<2x4x8x8xf32, #tpu.memory_space<vmem>>, vector<1x1x8x8xf32>
    %357 = vector.shape_cast %356 : vector<1x1x8x8xf32> to vector<8x8xf32>
    %358 = arith.addf %355, %357 : vector<8x8xf32>
    %cst_165 = arith.constant dense<0xFF800000> : vector<8xf32>
    %359 = vector.multi_reduction <maximumf>, %358, %cst_165 [1] : vector<8x8xf32> to vector<8xf32>
    %360 = vector.shape_cast %359 : vector<8xf32> to vector<8x1xf32>
    %361 = vector.broadcast %360 : vector<8x1xf32> to vector<8x8xf32>
    %362 = arith.subf %358, %361 : vector<8x8xf32>
    %363 = math.exp %362 : vector<8x8xf32>
    %cst_166 = arith.constant dense<0.000000e+00> : vector<8xf32>
    %364 = vector.multi_reduction <add>, %363, %cst_166 [1] : vector<8x8xf32> to vector<8xf32>
    %365 = vector.shape_cast %364 : vector<8xf32> to vector<8x1xf32>
    %366 = tpu.reciprocal %365 {approx = true} : vector<8x1xf32> -> vector<8x1xf32>
    %367 = vector.broadcast %366 : vector<8x1xf32> to vector<8x8xf32>
    %368 = arith.mulf %363, %367 : vector<8x8xf32>
    %cst_167 = arith.constant dense<0.000000e+00> : vector<8x8xf32>
    %369 = tpu.matmul %368, %352, %cst_167 {dimension_numbers = #tpu.dot_dimension_numbers<[1], [0], [0], [1], [0, 0, 1, 1], [], []>} : vector<8x8xf32>, vector<8x8xf32>, vector<8x8xf32> -> vector<8x8xf32>
    %370 = vector.extract_strided_slice %327 {offsets = [0, 16], sizes = [8, 8], strides = [1, 1]} : vector<8x32xf32> to vector<8x8xf32>
    %371 = vector.extract_strided_slice %328 {offsets = [0, 16], sizes = [8, 8], strides = [1, 1]} : vector<8x32xf32> to vector<8x8xf32>
    %372 = vector.extract_strided_slice %329 {offsets = [0, 16], sizes = [8, 8], strides = [1, 1]} : vector<8x32xf32> to vector<8x8xf32>
    %cst_168 = arith.constant dense<0.000000e+00> : vector<8x8xf32>
    %373 = tpu.matmul %370, %371, %cst_168 {dimension_numbers = #tpu.dot_dimension_numbers<[1], [1], [0], [0], [0, 0, 1, 0], [], []>} : vector<8x8xf32>, vector<8x8xf32>, vector<8x8xf32> -> vector<8x8xf32>
    %cst_169 = arith.constant 0.353553385 : f32
    %374 = vector.broadcast %cst_169 : f32 to vector<8x8xf32>
    %375 = arith.mulf %373, %374 : vector<8x8xf32>
    %c1_170 = arith.constant 1 : index
    %c2_171 = arith.constant 2 : index
    %c0_172 = arith.constant 0 : index
    %c0_173 = arith.constant 0 : index
    %376 = vector.load %arg3[%c1_170, %c2_171, %c0_172, %c0_173] : memref<2x4x8x8xf32, #tpu.memory_space<vmem>>, vector<1x1x8x8xf32>
    %377 = vector.shape_cast %376 : vector<1x1x8x8xf32> to vector<8x8xf32>
    %378 = arith.addf %375, %377 : vector<8x8xf32>
    %cst_174 = arith.constant dense<0xFF800000> : vector<8xf32>
    %379 = vector.multi_reduction <maximumf>, %378, %cst_174 [1] : vector<8x8xf32> to vector<8xf32>
    %380 = vector.shape_cast %379 : vector<8xf32> to vector<8x1xf32>
    %381 = vector.broadcast %380 : vector<8x1xf32> to vector<8x8xf32>
    %382 = arith.subf %378, %381 : vector<8x8xf32>
    %383 = math.exp %382 : vector<8x8xf32>
    %cst_175 = arith.constant dense<0.000000e+00> : vector<8xf32>
    %384 = vector.multi_reduction <add>, %383, %cst_175 [1] : vector<8x8xf32> to vector<8xf32>
    %385 = vector.shape_cast %384 : vector<8xf32> to vector<8x1xf32>
    %386 = tpu.reciprocal %385 {approx = true} : vector<8x1xf32> -> vector<8x1xf32>
    %387 = vector.broadcast %386 : vector<8x1xf32> to vector<8x8xf32>
    %388 = arith.mulf %383, %387 : vector<8x8xf32>
    %cst_176 = arith.constant dense<0.000000e+00> : vector<8x8xf32>
    %389 = tpu.matmul %388, %372, %cst_176 {dimension_numbers = #tpu.dot_dimension_numbers<[1], [0], [0], [1], [0, 0, 1, 1], [], []>} : vector<8x8xf32>, vector<8x8xf32>, vector<8x8xf32> -> vector<8x8xf32>
    %390 = vector.extract_strided_slice %327 {offsets = [0, 24], sizes = [8, 8], strides = [1, 1]} : vector<8x32xf32> to vector<8x8xf32>
    %391 = vector.extract_strided_slice %328 {offsets = [0, 24], sizes = [8, 8], strides = [1, 1]} : vector<8x32xf32> to vector<8x8xf32>
    %392 = vector.extract_strided_slice %329 {offsets = [0, 24], sizes = [8, 8], strides = [1, 1]} : vector<8x32xf32> to vector<8x8xf32>
    %cst_177 = arith.constant dense<0.000000e+00> : vector<8x8xf32>
    %393 = tpu.matmul %390, %391, %cst_177 {dimension_numbers = #tpu.dot_dimension_numbers<[1], [1], [0], [0], [0, 0, 1, 0], [], []>} : vector<8x8xf32>, vector<8x8xf32>, vector<8x8xf32> -> vector<8x8xf32>
    %cst_178 = arith.constant 0.353553385 : f32
    %394 = vector.broadcast %cst_178 : f32 to vector<8x8xf32>
    %395 = arith.mulf %393, %394 : vector<8x8xf32>
    %c1_179 = arith.constant 1 : index
    %c3_180 = arith.constant 3 : index
    %c0_181 = arith.constant 0 : index
    %c0_182 = arith.constant 0 : index
    %396 = vector.load %arg3[%c1_179, %c3_180, %c0_181, %c0_182] : memref<2x4x8x8xf32, #tpu.memory_space<vmem>>, vector<1x1x8x8xf32>
    %397 = vector.shape_cast %396 : vector<1x1x8x8xf32> to vector<8x8xf32>
    %398 = arith.addf %395, %397 : vector<8x8xf32>
    %cst_183 = arith.constant dense<0xFF800000> : vector<8xf32>
    %399 = vector.multi_reduction <maximumf>, %398, %cst_183 [1] : vector<8x8xf32> to vector<8xf32>
    %400 = vector.shape_cast %399 : vector<8xf32> to vector<8x1xf32>
    %401 = vector.broadcast %400 : vector<8x1xf32> to vector<8x8xf32>
    %402 = arith.subf %398, %401 : vector<8x8xf32>
    %403 = math.exp %402 : vector<8x8xf32>
    %cst_184 = arith.constant dense<0.000000e+00> : vector<8xf32>
    %404 = vector.multi_reduction <add>, %403, %cst_184 [1] : vector<8x8xf32> to vector<8xf32>
    %405 = vector.shape_cast %404 : vector<8xf32> to vector<8x1xf32>
    %406 = tpu.reciprocal %405 {approx = true} : vector<8x1xf32> -> vector<8x1xf32>
    %407 = vector.broadcast %406 : vector<8x1xf32> to vector<8x8xf32>
    %408 = arith.mulf %403, %407 : vector<8x8xf32>
    %cst_185 = arith.constant dense<0.000000e+00> : vector<8x8xf32>
    %409 = tpu.matmul %408, %392, %cst_185 {dimension_numbers = #tpu.dot_dimension_numbers<[1], [0], [0], [1], [0, 0, 1, 1], [], []>} : vector<8x8xf32>, vector<8x8xf32>, vector<8x8xf32> -> vector<8x8xf32>
    %410 = tpu.concatenate %349, %369, %389, %409 in 1 : vector<8x8xf32>, vector<8x8xf32>, vector<8x8xf32>, vector<8x8xf32> -> vector<8x32xf32>
    %411 = vector.extract_strided_slice %295 {offsets = [0, 96], sizes = [32, 32], strides = [1, 1]} : vector<32x128xf32> to vector<32x32xf32>
    %cst_186 = arith.constant dense<0.000000e+00> : vector<8x32xf32>
    %412 = tpu.matmul %410, %411, %cst_186 {dimension_numbers = #tpu.dot_dimension_numbers<[1], [0], [0], [1], [0, 0, 1, 1], [], []>} : vector<8x32xf32>, vector<32x32xf32>, vector<8x32xf32> -> vector<8x32xf32>
    %413 = arith.addf %293, %412 : vector<8x32xf32>
    %414 = vector.extract_strided_slice %297 {offsets = [0, 96], sizes = [1, 32], strides = [1, 1]} : vector<1x128xf32> to vector<1x32xf32>
    %415 = vector.broadcast %414 : vector<1x32xf32> to vector<8x32xf32>
    %416 = arith.addf %413, %415 : vector<8x32xf32>
    %c3_187 = arith.constant 3 : index
    %c0_188 = arith.constant 0 : index
    %c0_189 = arith.constant 0 : index
    %417 = vector.load %arg5[%c3_187, %c0_188, %c0_189] : memref<5x32x128xf32, #tpu.memory_space<vmem>>, vector<1x32x128xf32>
    %418 = vector.shape_cast %417 : vector<1x32x128xf32> to vector<32x128xf32>
    %c3_190 = arith.constant 3 : index
    %c0_191 = arith.constant 0 : index
    %c0_192 = arith.constant 0 : index
    %419 = vector.load %arg6[%c3_190, %c0_191, %c0_192] : memref<5x1x128xf32, #tpu.memory_space<vmem>>, vector<1x1x128xf32>
    %420 = vector.shape_cast %419 : vector<1x1x128xf32> to vector<1x128xf32>
    %c4 = arith.constant 4 : index
    %c0_193 = arith.constant 0 : index
    %c0_194 = arith.constant 0 : index
    %c0_195 = arith.constant 0 : index
    %421 = vector.load %arg4[%c4, %c0_193, %c0_194, %c0_195] : memref<8x2x1x32xf32, #tpu.memory_space<vmem>>, vector<1x1x1x32xf32>
    %422 = vector.shape_cast %421 : vector<1x1x1x32xf32> to vector<1x32xf32>
    %c4_196 = arith.constant 4 : index
    %c1_197 = arith.constant 1 : index
    %c0_198 = arith.constant 0 : index
    %c0_199 = arith.constant 0 : index
    %423 = vector.load %arg4[%c4_196, %c1_197, %c0_198, %c0_199] : memref<8x2x1x32xf32, #tpu.memory_space<vmem>>, vector<1x1x1x32xf32>
    %424 = vector.shape_cast %423 : vector<1x1x1x32xf32> to vector<1x32xf32>
    %cst_200 = arith.constant dense<0.000000e+00> : vector<8xf32>
    %425 = vector.multi_reduction <add>, %416, %cst_200 [1] : vector<8x32xf32> to vector<8xf32>
    %426 = vector.shape_cast %425 : vector<8xf32> to vector<8x1xf32>
    %cst_201 = arith.constant 3.200000e+01 : f32
    %427 = vector.broadcast %cst_201 : f32 to vector<8x1xf32>
    %428 = arith.divf %426, %427 : vector<8x1xf32>
    %429 = arith.mulf %416, %416 : vector<8x32xf32>
    %cst_202 = arith.constant dense<0.000000e+00> : vector<8xf32>
    %430 = vector.multi_reduction <add>, %429, %cst_202 [1] : vector<8x32xf32> to vector<8xf32>
    %431 = vector.shape_cast %430 : vector<8xf32> to vector<8x1xf32>
    %cst_203 = arith.constant 3.200000e+01 : f32
    %432 = vector.broadcast %cst_203 : f32 to vector<8x1xf32>
    %433 = arith.divf %431, %432 : vector<8x1xf32>
    %434 = arith.mulf %428, %428 : vector<8x1xf32>
    %435 = arith.subf %433, %434 : vector<8x1xf32>
    %436 = vector.broadcast %428 : vector<8x1xf32> to vector<8x32xf32>
    %437 = arith.subf %416, %436 : vector<8x32xf32>
    %cst_204 = arith.constant 9.99999974E-6 : f32
    %438 = vector.broadcast %cst_204 : f32 to vector<8x1xf32>
    %439 = arith.addf %435, %438 : vector<8x1xf32>
    %440 = math.rsqrt %439 : vector<8x1xf32>
    %441 = vector.broadcast %440 : vector<8x1xf32> to vector<8x32xf32>
    %442 = arith.mulf %437, %441 : vector<8x32xf32>
    %443 = vector.broadcast %422 : vector<1x32xf32> to vector<8x32xf32>
    %444 = arith.mulf %442, %443 : vector<8x32xf32>
    %445 = vector.broadcast %424 : vector<1x32xf32> to vector<8x32xf32>
    %446 = arith.addf %444, %445 : vector<8x32xf32>
    %cst_205 = arith.constant dense<0.000000e+00> : vector<8x128xf32>
    %447 = tpu.matmul %446, %418, %cst_205 {dimension_numbers = #tpu.dot_dimension_numbers<[1], [0], [0], [1], [0, 0, 1, 1], [], []>} : vector<8x32xf32>, vector<32x128xf32>, vector<8x128xf32> -> vector<8x128xf32>
    %448 = vector.broadcast %420 : vector<1x128xf32> to vector<8x128xf32>
    %449 = arith.addf %447, %448 : vector<8x128xf32>
    %cst_206 = arith.constant dense<0.000000e+00> : vector<4x128xf32>
    %450 = tpu.matmul %2, %418, %cst_206 {dimension_numbers = #tpu.dot_dimension_numbers<[1], [0], [0], [1], [0, 0, 1, 1], [], []>} : vector<4x32xf32>, vector<32x128xf32>, vector<4x128xf32> -> vector<4x128xf32>
    %451 = vector.broadcast %420 : vector<1x128xf32> to vector<4x128xf32>
    %452 = arith.addf %450, %451 : vector<4x128xf32>
    %453 = vector.extract_strided_slice %449 {offsets = [0, 0], sizes = [8, 32], strides = [1, 1]} : vector<8x128xf32> to vector<8x32xf32>
    %454 = vector.extract_strided_slice %452 {offsets = [0, 32], sizes = [4, 32], strides = [1, 1]} : vector<4x128xf32> to vector<4x32xf32>
    %455 = vector.extract_strided_slice %452 {offsets = [0, 64], sizes = [4, 32], strides = [1, 1]} : vector<4x128xf32> to vector<4x32xf32>
    %456 = vector.extract_strided_slice %453 {offsets = [0, 0], sizes = [8, 8], strides = [1, 1]} : vector<8x32xf32> to vector<8x8xf32>
    %457 = vector.extract_strided_slice %454 {offsets = [0, 0], sizes = [4, 8], strides = [1, 1]} : vector<4x32xf32> to vector<4x8xf32>
    %458 = vector.extract_strided_slice %455 {offsets = [0, 0], sizes = [4, 8], strides = [1, 1]} : vector<4x32xf32> to vector<4x8xf32>
    %cst_207 = arith.constant dense<0.000000e+00> : vector<8x4xf32>
    %459 = tpu.matmul %456, %457, %cst_207 {dimension_numbers = #tpu.dot_dimension_numbers<[1], [1], [0], [0], [0, 0, 1, 0], [], []>} : vector<8x8xf32>, vector<4x8xf32>, vector<8x4xf32> -> vector<8x4xf32>
    %cst_208 = arith.constant 0.353553385 : f32
    %460 = vector.broadcast %cst_208 : f32 to vector<8x4xf32>
    %461 = arith.mulf %459, %460 : vector<8x4xf32>
    %cst_209 = arith.constant dense<0xFF800000> : vector<8xf32>
    %462 = vector.multi_reduction <maximumf>, %461, %cst_209 [1] : vector<8x4xf32> to vector<8xf32>
    %463 = vector.shape_cast %462 : vector<8xf32> to vector<8x1xf32>
    %464 = vector.broadcast %463 : vector<8x1xf32> to vector<8x4xf32>
    %465 = arith.subf %461, %464 : vector<8x4xf32>
    %466 = math.exp %465 : vector<8x4xf32>
    %cst_210 = arith.constant dense<0.000000e+00> : vector<8xf32>
    %467 = vector.multi_reduction <add>, %466, %cst_210 [1] : vector<8x4xf32> to vector<8xf32>
    %468 = vector.shape_cast %467 : vector<8xf32> to vector<8x1xf32>
    %469 = tpu.reciprocal %468 {approx = true} : vector<8x1xf32> -> vector<8x1xf32>
    %470 = vector.broadcast %469 : vector<8x1xf32> to vector<8x4xf32>
    %471 = arith.mulf %466, %470 : vector<8x4xf32>
    %cst_211 = arith.constant dense<0.000000e+00> : vector<8x8xf32>
    %472 = tpu.matmul %471, %458, %cst_211 {dimension_numbers = #tpu.dot_dimension_numbers<[1], [0], [0], [1], [0, 0, 1, 1], [], []>} : vector<8x4xf32>, vector<4x8xf32>, vector<8x8xf32> -> vector<8x8xf32>
    %473 = vector.extract_strided_slice %453 {offsets = [0, 8], sizes = [8, 8], strides = [1, 1]} : vector<8x32xf32> to vector<8x8xf32>
    %474 = vector.extract_strided_slice %454 {offsets = [0, 8], sizes = [4, 8], strides = [1, 1]} : vector<4x32xf32> to vector<4x8xf32>
    %475 = vector.extract_strided_slice %455 {offsets = [0, 8], sizes = [4, 8], strides = [1, 1]} : vector<4x32xf32> to vector<4x8xf32>
    %cst_212 = arith.constant dense<0.000000e+00> : vector<8x4xf32>
    %476 = tpu.matmul %473, %474, %cst_212 {dimension_numbers = #tpu.dot_dimension_numbers<[1], [1], [0], [0], [0, 0, 1, 0], [], []>} : vector<8x8xf32>, vector<4x8xf32>, vector<8x4xf32> -> vector<8x4xf32>
    %cst_213 = arith.constant 0.353553385 : f32
    %477 = vector.broadcast %cst_213 : f32 to vector<8x4xf32>
    %478 = arith.mulf %476, %477 : vector<8x4xf32>
    %cst_214 = arith.constant dense<0xFF800000> : vector<8xf32>
    %479 = vector.multi_reduction <maximumf>, %478, %cst_214 [1] : vector<8x4xf32> to vector<8xf32>
    %480 = vector.shape_cast %479 : vector<8xf32> to vector<8x1xf32>
    %481 = vector.broadcast %480 : vector<8x1xf32> to vector<8x4xf32>
    %482 = arith.subf %478, %481 : vector<8x4xf32>
    %483 = math.exp %482 : vector<8x4xf32>
    %cst_215 = arith.constant dense<0.000000e+00> : vector<8xf32>
    %484 = vector.multi_reduction <add>, %483, %cst_215 [1] : vector<8x4xf32> to vector<8xf32>
    %485 = vector.shape_cast %484 : vector<8xf32> to vector<8x1xf32>
    %486 = tpu.reciprocal %485 {approx = true} : vector<8x1xf32> -> vector<8x1xf32>
    %487 = vector.broadcast %486 : vector<8x1xf32> to vector<8x4xf32>
    %488 = arith.mulf %483, %487 : vector<8x4xf32>
    %cst_216 = arith.constant dense<0.000000e+00> : vector<8x8xf32>
    %489 = tpu.matmul %488, %475, %cst_216 {dimension_numbers = #tpu.dot_dimension_numbers<[1], [0], [0], [1], [0, 0, 1, 1], [], []>} : vector<8x4xf32>, vector<4x8xf32>, vector<8x8xf32> -> vector<8x8xf32>
    %490 = vector.extract_strided_slice %453 {offsets = [0, 16], sizes = [8, 8], strides = [1, 1]} : vector<8x32xf32> to vector<8x8xf32>
    %491 = vector.extract_strided_slice %454 {offsets = [0, 16], sizes = [4, 8], strides = [1, 1]} : vector<4x32xf32> to vector<4x8xf32>
    %492 = vector.extract_strided_slice %455 {offsets = [0, 16], sizes = [4, 8], strides = [1, 1]} : vector<4x32xf32> to vector<4x8xf32>
    %cst_217 = arith.constant dense<0.000000e+00> : vector<8x4xf32>
    %493 = tpu.matmul %490, %491, %cst_217 {dimension_numbers = #tpu.dot_dimension_numbers<[1], [1], [0], [0], [0, 0, 1, 0], [], []>} : vector<8x8xf32>, vector<4x8xf32>, vector<8x4xf32> -> vector<8x4xf32>
    %cst_218 = arith.constant 0.353553385 : f32
    %494 = vector.broadcast %cst_218 : f32 to vector<8x4xf32>
    %495 = arith.mulf %493, %494 : vector<8x4xf32>
    %cst_219 = arith.constant dense<0xFF800000> : vector<8xf32>
    %496 = vector.multi_reduction <maximumf>, %495, %cst_219 [1] : vector<8x4xf32> to vector<8xf32>
    %497 = vector.shape_cast %496 : vector<8xf32> to vector<8x1xf32>
    %498 = vector.broadcast %497 : vector<8x1xf32> to vector<8x4xf32>
    %499 = arith.subf %495, %498 : vector<8x4xf32>
    %500 = math.exp %499 : vector<8x4xf32>
    %cst_220 = arith.constant dense<0.000000e+00> : vector<8xf32>
    %501 = vector.multi_reduction <add>, %500, %cst_220 [1] : vector<8x4xf32> to vector<8xf32>
    %502 = vector.shape_cast %501 : vector<8xf32> to vector<8x1xf32>
    %503 = tpu.reciprocal %502 {approx = true} : vector<8x1xf32> -> vector<8x1xf32>
    %504 = vector.broadcast %503 : vector<8x1xf32> to vector<8x4xf32>
    %505 = arith.mulf %500, %504 : vector<8x4xf32>
    %cst_221 = arith.constant dense<0.000000e+00> : vector<8x8xf32>
    %506 = tpu.matmul %505, %492, %cst_221 {dimension_numbers = #tpu.dot_dimension_numbers<[1], [0], [0], [1], [0, 0, 1, 1], [], []>} : vector<8x4xf32>, vector<4x8xf32>, vector<8x8xf32> -> vector<8x8xf32>
    %507 = vector.extract_strided_slice %453 {offsets = [0, 24], sizes = [8, 8], strides = [1, 1]} : vector<8x32xf32> to vector<8x8xf32>
    %508 = vector.extract_strided_slice %454 {offsets = [0, 24], sizes = [4, 8], strides = [1, 1]} : vector<4x32xf32> to vector<4x8xf32>
    %509 = vector.extract_strided_slice %455 {offsets = [0, 24], sizes = [4, 8], strides = [1, 1]} : vector<4x32xf32> to vector<4x8xf32>
    %cst_222 = arith.constant dense<0.000000e+00> : vector<8x4xf32>
    %510 = tpu.matmul %507, %508, %cst_222 {dimension_numbers = #tpu.dot_dimension_numbers<[1], [1], [0], [0], [0, 0, 1, 0], [], []>} : vector<8x8xf32>, vector<4x8xf32>, vector<8x4xf32> -> vector<8x4xf32>
    %cst_223 = arith.constant 0.353553385 : f32
    %511 = vector.broadcast %cst_223 : f32 to vector<8x4xf32>
    %512 = arith.mulf %510, %511 : vector<8x4xf32>
    %cst_224 = arith.constant dense<0xFF800000> : vector<8xf32>
    %513 = vector.multi_reduction <maximumf>, %512, %cst_224 [1] : vector<8x4xf32> to vector<8xf32>
    %514 = vector.shape_cast %513 : vector<8xf32> to vector<8x1xf32>
    %515 = vector.broadcast %514 : vector<8x1xf32> to vector<8x4xf32>
    %516 = arith.subf %512, %515 : vector<8x4xf32>
    %517 = math.exp %516 : vector<8x4xf32>
    %cst_225 = arith.constant dense<0.000000e+00> : vector<8xf32>
    %518 = vector.multi_reduction <add>, %517, %cst_225 [1] : vector<8x4xf32> to vector<8xf32>
    %519 = vector.shape_cast %518 : vector<8xf32> to vector<8x1xf32>
    %520 = tpu.reciprocal %519 {approx = true} : vector<8x1xf32> -> vector<8x1xf32>
    %521 = vector.broadcast %520 : vector<8x1xf32> to vector<8x4xf32>
    %522 = arith.mulf %517, %521 : vector<8x4xf32>
    %cst_226 = arith.constant dense<0.000000e+00> : vector<8x8xf32>
    %523 = tpu.matmul %522, %509, %cst_226 {dimension_numbers = #tpu.dot_dimension_numbers<[1], [0], [0], [1], [0, 0, 1, 1], [], []>} : vector<8x4xf32>, vector<4x8xf32>, vector<8x8xf32> -> vector<8x8xf32>
    %524 = tpu.concatenate %472, %489, %506, %523 in 1 : vector<8x8xf32>, vector<8x8xf32>, vector<8x8xf32>, vector<8x8xf32> -> vector<8x32xf32>
    %525 = vector.extract_strided_slice %418 {offsets = [0, 96], sizes = [32, 32], strides = [1, 1]} : vector<32x128xf32> to vector<32x32xf32>
    %cst_227 = arith.constant dense<0.000000e+00> : vector<8x32xf32>
    %526 = tpu.matmul %524, %525, %cst_227 {dimension_numbers = #tpu.dot_dimension_numbers<[1], [0], [0], [1], [0, 0, 1, 1], [], []>} : vector<8x32xf32>, vector<32x32xf32>, vector<8x32xf32> -> vector<8x32xf32>
    %527 = arith.addf %416, %526 : vector<8x32xf32>
    %528 = vector.extract_strided_slice %420 {offsets = [0, 96], sizes = [1, 32], strides = [1, 1]} : vector<1x128xf32> to vector<1x32xf32>
    %529 = vector.broadcast %528 : vector<1x32xf32> to vector<8x32xf32>
    %530 = arith.addf %527, %529 : vector<8x32xf32>
    %c5 = arith.constant 5 : index
    %c0_228 = arith.constant 0 : index
    %c0_229 = arith.constant 0 : index
    %c0_230 = arith.constant 0 : index
    %531 = vector.load %arg4[%c5, %c0_228, %c0_229, %c0_230] : memref<8x2x1x32xf32, #tpu.memory_space<vmem>>, vector<1x1x1x32xf32>
    %532 = vector.shape_cast %531 : vector<1x1x1x32xf32> to vector<1x32xf32>
    %c5_231 = arith.constant 5 : index
    %c1_232 = arith.constant 1 : index
    %c0_233 = arith.constant 0 : index
    %c0_234 = arith.constant 0 : index
    %533 = vector.load %arg4[%c5_231, %c1_232, %c0_233, %c0_234] : memref<8x2x1x32xf32, #tpu.memory_space<vmem>>, vector<1x1x1x32xf32>
    %534 = vector.shape_cast %533 : vector<1x1x1x32xf32> to vector<1x32xf32>
    %cst_235 = arith.constant dense<0.000000e+00> : vector<8xf32>
    %535 = vector.multi_reduction <add>, %530, %cst_235 [1] : vector<8x32xf32> to vector<8xf32>
    %536 = vector.shape_cast %535 : vector<8xf32> to vector<8x1xf32>
    %cst_236 = arith.constant 3.200000e+01 : f32
    %537 = vector.broadcast %cst_236 : f32 to vector<8x1xf32>
    %538 = arith.divf %536, %537 : vector<8x1xf32>
    %539 = arith.mulf %530, %530 : vector<8x32xf32>
    %cst_237 = arith.constant dense<0.000000e+00> : vector<8xf32>
    %540 = vector.multi_reduction <add>, %539, %cst_237 [1] : vector<8x32xf32> to vector<8xf32>
    %541 = vector.shape_cast %540 : vector<8xf32> to vector<8x1xf32>
    %cst_238 = arith.constant 3.200000e+01 : f32
    %542 = vector.broadcast %cst_238 : f32 to vector<8x1xf32>
    %543 = arith.divf %541, %542 : vector<8x1xf32>
    %544 = arith.mulf %538, %538 : vector<8x1xf32>
    %545 = arith.subf %543, %544 : vector<8x1xf32>
    %546 = vector.broadcast %538 : vector<8x1xf32> to vector<8x32xf32>
    %547 = arith.subf %530, %546 : vector<8x32xf32>
    %cst_239 = arith.constant 9.99999974E-6 : f32
    %548 = vector.broadcast %cst_239 : f32 to vector<8x1xf32>
    %549 = arith.addf %545, %548 : vector<8x1xf32>
    %550 = math.rsqrt %549 : vector<8x1xf32>
    %551 = vector.broadcast %550 : vector<8x1xf32> to vector<8x32xf32>
    %552 = arith.mulf %547, %551 : vector<8x32xf32>
    %553 = vector.broadcast %532 : vector<1x32xf32> to vector<8x32xf32>
    %554 = arith.mulf %552, %553 : vector<8x32xf32>
    %555 = vector.broadcast %534 : vector<1x32xf32> to vector<8x32xf32>
    %556 = arith.addf %554, %555 : vector<8x32xf32>
    %c1_240 = arith.constant 1 : index
    %c0_241 = arith.constant 0 : index
    %c0_242 = arith.constant 0 : index
    %557 = vector.load %arg7[%c1_240, %c0_241, %c0_242] : memref<3x32x128xf32, #tpu.memory_space<vmem>>, vector<1x32x128xf32>
    %558 = vector.shape_cast %557 : vector<1x32x128xf32> to vector<32x128xf32>
    %cst_243 = arith.constant dense<0.000000e+00> : vector<8x128xf32>
    %559 = tpu.matmul %556, %558, %cst_243 {dimension_numbers = #tpu.dot_dimension_numbers<[1], [0], [0], [1], [0, 0, 1, 1], [], []>} : vector<8x32xf32>, vector<32x128xf32>, vector<8x128xf32> -> vector<8x128xf32>
    %c1_244 = arith.constant 1 : index
    %c0_245 = arith.constant 0 : index
    %c0_246 = arith.constant 0 : index
    %560 = vector.load %arg8[%c1_244, %c0_245, %c0_246] : memref<3x1x128xf32, #tpu.memory_space<vmem>>, vector<1x1x128xf32>
    %561 = vector.shape_cast %560 : vector<1x1x128xf32> to vector<1x128xf32>
    %562 = vector.broadcast %561 : vector<1x128xf32> to vector<8x128xf32>
    %563 = arith.addf %559, %562 : vector<8x128xf32>
    %564 = arith.mulf %563, %563 : vector<8x128xf32>
    %565 = arith.mulf %563, %564 : vector<8x128xf32>
    %cst_247 = arith.constant 4.471500e-02 : f32
    %566 = vector.broadcast %cst_247 : f32 to vector<8x128xf32>
    %567 = arith.mulf %566, %565 : vector<8x128xf32>
    %568 = arith.addf %563, %567 : vector<8x128xf32>
    %cst_248 = arith.constant 0.797884583 : f32
    %569 = vector.broadcast %cst_248 : f32 to vector<8x128xf32>
    %570 = arith.mulf %569, %568 : vector<8x128xf32>
    %571 = math.tanh %570 : vector<8x128xf32>
    %cst_249 = arith.constant 1.000000e+00 : f32
    %572 = vector.broadcast %cst_249 : f32 to vector<8x128xf32>
    %573 = arith.addf %572, %571 : vector<8x128xf32>
    %cst_250 = arith.constant 5.000000e-01 : f32
    %574 = vector.broadcast %cst_250 : f32 to vector<8x128xf32>
    %575 = arith.mulf %574, %573 : vector<8x128xf32>
    %576 = arith.mulf %563, %575 : vector<8x128xf32>
    %c1_251 = arith.constant 1 : index
    %c0_252 = arith.constant 0 : index
    %c0_253 = arith.constant 0 : index
    %577 = vector.load %arg9[%c1_251, %c0_252, %c0_253] : memref<3x128x32xf32, #tpu.memory_space<vmem>>, vector<1x128x32xf32>
    %578 = vector.shape_cast %577 : vector<1x128x32xf32> to vector<128x32xf32>
    %cst_254 = arith.constant dense<0.000000e+00> : vector<8x32xf32>
    %579 = tpu.matmul %576, %578, %cst_254 {dimension_numbers = #tpu.dot_dimension_numbers<[1], [0], [0], [1], [0, 0, 1, 1], [], []>} : vector<8x128xf32>, vector<128x32xf32>, vector<8x32xf32> -> vector<8x32xf32>
    %c1_255 = arith.constant 1 : index
    %c0_256 = arith.constant 0 : index
    %c0_257 = arith.constant 0 : index
    %580 = vector.load %arg10[%c1_255, %c0_256, %c0_257] : memref<3x1x32xf32, #tpu.memory_space<vmem>>, vector<1x1x32xf32>
    %581 = vector.shape_cast %580 : vector<1x1x32xf32> to vector<1x32xf32>
    %582 = vector.broadcast %581 : vector<1x32xf32> to vector<8x32xf32>
    %583 = arith.addf %579, %582 : vector<8x32xf32>
    %584 = arith.addf %530, %583 : vector<8x32xf32>
    %c6 = arith.constant 6 : index
    %c0_258 = arith.constant 0 : index
    %c0_259 = arith.constant 0 : index
    %c0_260 = arith.constant 0 : index
    %585 = vector.load %arg4[%c6, %c0_258, %c0_259, %c0_260] : memref<8x2x1x32xf32, #tpu.memory_space<vmem>>, vector<1x1x1x32xf32>
    %586 = vector.shape_cast %585 : vector<1x1x1x32xf32> to vector<1x32xf32>
    %c6_261 = arith.constant 6 : index
    %c1_262 = arith.constant 1 : index
    %c0_263 = arith.constant 0 : index
    %c0_264 = arith.constant 0 : index
    %587 = vector.load %arg4[%c6_261, %c1_262, %c0_263, %c0_264] : memref<8x2x1x32xf32, #tpu.memory_space<vmem>>, vector<1x1x1x32xf32>
    %588 = vector.shape_cast %587 : vector<1x1x1x32xf32> to vector<1x32xf32>
    %cst_265 = arith.constant dense<0.000000e+00> : vector<8xf32>
    %589 = vector.multi_reduction <add>, %584, %cst_265 [1] : vector<8x32xf32> to vector<8xf32>
    %590 = vector.shape_cast %589 : vector<8xf32> to vector<8x1xf32>
    %cst_266 = arith.constant 3.200000e+01 : f32
    %591 = vector.broadcast %cst_266 : f32 to vector<8x1xf32>
    %592 = arith.divf %590, %591 : vector<8x1xf32>
    %593 = arith.mulf %584, %584 : vector<8x32xf32>
    %cst_267 = arith.constant dense<0.000000e+00> : vector<8xf32>
    %594 = vector.multi_reduction <add>, %593, %cst_267 [1] : vector<8x32xf32> to vector<8xf32>
    %595 = vector.shape_cast %594 : vector<8xf32> to vector<8x1xf32>
    %cst_268 = arith.constant 3.200000e+01 : f32
    %596 = vector.broadcast %cst_268 : f32 to vector<8x1xf32>
    %597 = arith.divf %595, %596 : vector<8x1xf32>
    %598 = arith.mulf %592, %592 : vector<8x1xf32>
    %599 = arith.subf %597, %598 : vector<8x1xf32>
    %600 = vector.broadcast %592 : vector<8x1xf32> to vector<8x32xf32>
    %601 = arith.subf %584, %600 : vector<8x32xf32>
    %cst_269 = arith.constant 9.99999974E-6 : f32
    %602 = vector.broadcast %cst_269 : f32 to vector<8x1xf32>
    %603 = arith.addf %599, %602 : vector<8x1xf32>
    %604 = math.rsqrt %603 : vector<8x1xf32>
    %605 = vector.broadcast %604 : vector<8x1xf32> to vector<8x32xf32>
    %606 = arith.mulf %601, %605 : vector<8x32xf32>
    %607 = vector.broadcast %586 : vector<1x32xf32> to vector<8x32xf32>
    %608 = arith.mulf %606, %607 : vector<8x32xf32>
    %609 = vector.broadcast %588 : vector<1x32xf32> to vector<8x32xf32>
    %610 = arith.addf %608, %609 : vector<8x32xf32>
    %611 = vector.shape_cast %610 : vector<8x32xf32> to vector<1x8x32xf32>
    %c0_270 = arith.constant 0 : index
    %c0_271 = arith.constant 0 : index
    %c0_272 = arith.constant 0 : index
    %612 = vector.load %arg13[%c0_270, %c0_271, %c0_272] : memref<1x8x32xf32, #tpu.memory_space<vmem>>, vector<1x8x32xf32>
    tpu.vector_store %arg13[%c0_270, %c0_271, %c0_272], %611 {strides = array<i32>} : memref<1x8x32xf32, #tpu.memory_space<vmem>>, vector<1x8x32xf32>,
    %c4_273 = arith.constant 4 : index
    %c0_274 = arith.constant 0 : index
    %c0_275 = arith.constant 0 : index
    %613 = vector.load %arg5[%c4_273, %c0_274, %c0_275] : memref<5x32x128xf32, #tpu.memory_space<vmem>>, vector<1x32x128xf32>
    %614 = vector.shape_cast %613 : vector<1x32x128xf32> to vector<32x128xf32>
    %c4_276 = arith.constant 4 : index
    %c0_277 = arith.constant 0 : index
    %c0_278 = arith.constant 0 : index
    %615 = vector.load %arg6[%c4_276, %c0_277, %c0_278] : memref<5x1x128xf32, #tpu.memory_space<vmem>>, vector<1x1x128xf32>
    %616 = vector.shape_cast %615 : vector<1x1x128xf32> to vector<1x128xf32>
    %cst_279 = arith.constant dense<0.000000e+00> : vector<8x128xf32>
    %617 = tpu.matmul %610, %614, %cst_279 {dimension_numbers = #tpu.dot_dimension_numbers<[1], [0], [0], [1], [0, 0, 1, 1], [], []>} : vector<8x32xf32>, vector<32x128xf32>, vector<8x128xf32> -> vector<8x128xf32>
    %618 = vector.broadcast %616 : vector<1x128xf32> to vector<8x128xf32>
    %619 = arith.addf %617, %618 : vector<8x128xf32>
    %620 = tpu.iota {dimensions = array<i32: 0>} : vector<4x4xi32>
    %621 = tpu.iota {dimensions = array<i32: 1>} : vector<4x4xi32>
    %622 = arith.cmpi eq, %620, %621 : vector<4x4xi32>
    %cst_280 = arith.constant dense<0.000000e+00> : vector<4x128xf32>
    %623 = tpu.matmul %2, %614, %cst_280 {dimension_numbers = #tpu.dot_dimension_numbers<[1], [0], [0], [1], [0, 0, 1, 1], [], []>} : vector<4x32xf32>, vector<32x128xf32>, vector<4x128xf32> -> vector<4x128xf32>
    %624 = vector.broadcast %616 : vector<1x128xf32> to vector<4x128xf32>
    %625 = arith.addf %623, %624 : vector<4x128xf32>
    %626 = vector.extract_strided_slice %625 {offsets = [0, 0], sizes = [4, 32], strides = [1, 1]} : vector<4x128xf32> to vector<4x32xf32>
    %627 = vector.extract_strided_slice %625 {offsets = [0, 32], sizes = [4, 32], strides = [1, 1]} : vector<4x128xf32> to vector<4x32xf32>
    %628 = vector.extract_strided_slice %625 {offsets = [0, 64], sizes = [4, 32], strides = [1, 1]} : vector<4x128xf32> to vector<4x32xf32>
    %629 = vector.extract_strided_slice %626 {offsets = [0, 0], sizes = [4, 8], strides = [1, 1]} : vector<4x32xf32> to vector<4x8xf32>
    %630 = vector.extract_strided_slice %627 {offsets = [0, 0], sizes = [4, 8], strides = [1, 1]} : vector<4x32xf32> to vector<4x8xf32>
    %631 = vector.extract_strided_slice %628 {offsets = [0, 0], sizes = [4, 8], strides = [1, 1]} : vector<4x32xf32> to vector<4x8xf32>
    %632 = vector.extract_strided_slice %619 {offsets = [0, 32], sizes = [8, 8], strides = [1, 1]} : vector<8x128xf32> to vector<8x8xf32>
    %633 = vector.extract_strided_slice %619 {offsets = [0, 64], sizes = [8, 8], strides = [1, 1]} : vector<8x128xf32> to vector<8x8xf32>
    %cst_281 = arith.constant dense<0.000000e+00> : vector<4x4xf32>
    %634 = tpu.matmul %629, %630, %cst_281 {dimension_numbers = #tpu.dot_dimension_numbers<[1], [1], [0], [0], [0, 0, 1, 0], [], []>} : vector<4x8xf32>, vector<4x8xf32>, vector<4x4xf32> -> vector<4x4xf32>
    %cst_282 = arith.constant 0.353553385 : f32
    %635 = vector.broadcast %cst_282 : f32 to vector<4x4xf32>
    %636 = arith.mulf %634, %635 : vector<4x4xf32>
    %cst_283 = arith.constant -3.40282347E+38 : f32
    %637 = vector.broadcast %cst_283 : f32 to vector<4x4xf32>
    %638 = arith.select %622, %636, %637 : vector<4x4xi1>, vector<4x4xf32>
    %cst_284 = arith.constant dense<0.000000e+00> : vector<4x8xf32>
    %639 = tpu.matmul %629, %632, %cst_284 {dimension_numbers = #tpu.dot_dimension_numbers<[1], [1], [0], [0], [0, 0, 1, 0], [], []>} : vector<4x8xf32>, vector<8x8xf32>, vector<4x8xf32> -> vector<4x8xf32>
    %cst_285 = arith.constant 0.353553385 : f32
    %640 = vector.broadcast %cst_285 : f32 to vector<4x8xf32>
    %641 = arith.mulf %639, %640 : vector<4x8xf32>
    %cst_286 = arith.constant dense<0xFF800000> : vector<4xf32>
    %642 = vector.multi_reduction <maximumf>, %638, %cst_286 [1] : vector<4x4xf32> to vector<4xf32>
    %643 = vector.shape_cast %642 : vector<4xf32> to vector<4x1xf32>
    %cst_287 = arith.constant dense<0xFF800000> : vector<4xf32>
    %644 = vector.multi_reduction <maximumf>, %641, %cst_287 [1] : vector<4x8xf32> to vector<4xf32>
    %645 = vector.shape_cast %644 : vector<4xf32> to vector<4x1xf32>
    %646 = arith.maximumf %643, %645 : vector<4x1xf32>
    %647 = vector.broadcast %646 : vector<4x1xf32> to vector<4x4xf32>
    %648 = arith.subf %638, %647 : vector<4x4xf32>
    %649 = math.exp %648 : vector<4x4xf32>
    %650 = vector.broadcast %646 : vector<4x1xf32> to vector<4x8xf32>
    %651 = arith.subf %641, %650 : vector<4x8xf32>
    %652 = math.exp %651 : vector<4x8xf32>
    %cst_288 = arith.constant dense<0.000000e+00> : vector<4xf32>
    %653 = vector.multi_reduction <add>, %649, %cst_288 [1] : vector<4x4xf32> to vector<4xf32>
    %654 = vector.shape_cast %653 : vector<4xf32> to vector<4x1xf32>
    %cst_289 = arith.constant dense<0.000000e+00> : vector<4xf32>
    %655 = vector.multi_reduction <add>, %652, %cst_289 [1] : vector<4x8xf32> to vector<4xf32>
    %656 = vector.shape_cast %655 : vector<4xf32> to vector<4x1xf32>
    %657 = arith.addf %654, %656 : vector<4x1xf32>
    %cst_290 = arith.constant dense<0.000000e+00> : vector<4x8xf32>
    %658 = tpu.matmul %649, %631, %cst_290 {dimension_numbers = #tpu.dot_dimension_numbers<[1], [0], [0], [1], [0, 0, 1, 1], [], []>} : vector<4x4xf32>, vector<4x8xf32>, vector<4x8xf32> -> vector<4x8xf32>
    %cst_291 = arith.constant dense<0.000000e+00> : vector<4x8xf32>
    %659 = tpu.matmul %652, %633, %cst_291 {dimension_numbers = #tpu.dot_dimension_numbers<[1], [0], [0], [1], [0, 0, 1, 1], [], []>} : vector<4x8xf32>, vector<8x8xf32>, vector<4x8xf32> -> vector<4x8xf32>
    %660 = arith.addf %658, %659 : vector<4x8xf32>
    %661 = tpu.reciprocal %657 {approx = true} : vector<4x1xf32> -> vector<4x1xf32>
    %662 = vector.broadcast %661 : vector<4x1xf32> to vector<4x8xf32>
    %663 = arith.mulf %660, %662 : vector<4x8xf32>
    %664 = vector.extract_strided_slice %626 {offsets = [0, 8], sizes = [4, 8], strides = [1, 1]} : vector<4x32xf32> to vector<4x8xf32>
    %665 = vector.extract_strided_slice %627 {offsets = [0, 8], sizes = [4, 8], strides = [1, 1]} : vector<4x32xf32> to vector<4x8xf32>
    %666 = vector.extract_strided_slice %628 {offsets = [0, 8], sizes = [4, 8], strides = [1, 1]} : vector<4x32xf32> to vector<4x8xf32>
    %667 = vector.extract_strided_slice %619 {offsets = [0, 40], sizes = [8, 8], strides = [1, 1]} : vector<8x128xf32> to vector<8x8xf32>
    %668 = vector.extract_strided_slice %619 {offsets = [0, 72], sizes = [8, 8], strides = [1, 1]} : vector<8x128xf32> to vector<8x8xf32>
    %cst_292 = arith.constant dense<0.000000e+00> : vector<4x4xf32>
    %669 = tpu.matmul %664, %665, %cst_292 {dimension_numbers = #tpu.dot_dimension_numbers<[1], [1], [0], [0], [0, 0, 1, 0], [], []>} : vector<4x8xf32>, vector<4x8xf32>, vector<4x4xf32> -> vector<4x4xf32>
    %cst_293 = arith.constant 0.353553385 : f32
    %670 = vector.broadcast %cst_293 : f32 to vector<4x4xf32>
    %671 = arith.mulf %669, %670 : vector<4x4xf32>
    %cst_294 = arith.constant -3.40282347E+38 : f32
    %672 = vector.broadcast %cst_294 : f32 to vector<4x4xf32>
    %673 = arith.select %622, %671, %672 : vector<4x4xi1>, vector<4x4xf32>
    %cst_295 = arith.constant dense<0.000000e+00> : vector<4x8xf32>
    %674 = tpu.matmul %664, %667, %cst_295 {dimension_numbers = #tpu.dot_dimension_numbers<[1], [1], [0], [0], [0, 0, 1, 0], [], []>} : vector<4x8xf32>, vector<8x8xf32>, vector<4x8xf32> -> vector<4x8xf32>
    %cst_296 = arith.constant 0.353553385 : f32
    %675 = vector.broadcast %cst_296 : f32 to vector<4x8xf32>
    %676 = arith.mulf %674, %675 : vector<4x8xf32>
    %cst_297 = arith.constant dense<0xFF800000> : vector<4xf32>
    %677 = vector.multi_reduction <maximumf>, %673, %cst_297 [1] : vector<4x4xf32> to vector<4xf32>
    %678 = vector.shape_cast %677 : vector<4xf32> to vector<4x1xf32>
    %cst_298 = arith.constant dense<0xFF800000> : vector<4xf32>
    %679 = vector.multi_reduction <maximumf>, %676, %cst_298 [1] : vector<4x8xf32> to vector<4xf32>
    %680 = vector.shape_cast %679 : vector<4xf32> to vector<4x1xf32>
    %681 = arith.maximumf %678, %680 : vector<4x1xf32>
    %682 = vector.broadcast %681 : vector<4x1xf32> to vector<4x4xf32>
    %683 = arith.subf %673, %682 : vector<4x4xf32>
    %684 = math.exp %683 : vector<4x4xf32>
    %685 = vector.broadcast %681 : vector<4x1xf32> to vector<4x8xf32>
    %686 = arith.subf %676, %685 : vector<4x8xf32>
    %687 = math.exp %686 : vector<4x8xf32>
    %cst_299 = arith.constant dense<0.000000e+00> : vector<4xf32>
    %688 = vector.multi_reduction <add>, %684, %cst_299 [1] : vector<4x4xf32> to vector<4xf32>
    %689 = vector.shape_cast %688 : vector<4xf32> to vector<4x1xf32>
    %cst_300 = arith.constant dense<0.000000e+00> : vector<4xf32>
    %690 = vector.multi_reduction <add>, %687, %cst_300 [1] : vector<4x8xf32> to vector<4xf32>
    %691 = vector.shape_cast %690 : vector<4xf32> to vector<4x1xf32>
    %692 = arith.addf %689, %691 : vector<4x1xf32>
    %cst_301 = arith.constant dense<0.000000e+00> : vector<4x8xf32>
    %693 = tpu.matmul %684, %666, %cst_301 {dimension_numbers = #tpu.dot_dimension_numbers<[1], [0], [0], [1], [0, 0, 1, 1], [], []>} : vector<4x4xf32>, vector<4x8xf32>, vector<4x8xf32> -> vector<4x8xf32>
    %cst_302 = arith.constant dense<0.000000e+00> : vector<4x8xf32>
    %694 = tpu.matmul %687, %668, %cst_302 {dimension_numbers = #tpu.dot_dimension_numbers<[1], [0], [0], [1], [0, 0, 1, 1], [], []>} : vector<4x8xf32>, vector<8x8xf32>, vector<4x8xf32> -> vector<4x8xf32>
    %695 = arith.addf %693, %694 : vector<4x8xf32>
    %696 = tpu.reciprocal %692 {approx = true} : vector<4x1xf32> -> vector<4x1xf32>
    %697 = vector.broadcast %696 : vector<4x1xf32> to vector<4x8xf32>
    %698 = arith.mulf %695, %697 : vector<4x8xf32>
    %699 = vector.extract_strided_slice %626 {offsets = [0, 16], sizes = [4, 8], strides = [1, 1]} : vector<4x32xf32> to vector<4x8xf32>
    %700 = vector.extract_strided_slice %627 {offsets = [0, 16], sizes = [4, 8], strides = [1, 1]} : vector<4x32xf32> to vector<4x8xf32>
    %701 = vector.extract_strided_slice %628 {offsets = [0, 16], sizes = [4, 8], strides = [1, 1]} : vector<4x32xf32> to vector<4x8xf32>
    %702 = vector.extract_strided_slice %619 {offsets = [0, 48], sizes = [8, 8], strides = [1, 1]} : vector<8x128xf32> to vector<8x8xf32>
    %703 = vector.extract_strided_slice %619 {offsets = [0, 80], sizes = [8, 8], strides = [1, 1]} : vector<8x128xf32> to vector<8x8xf32>
    %cst_303 = arith.constant dense<0.000000e+00> : vector<4x4xf32>
    %704 = tpu.matmul %699, %700, %cst_303 {dimension_numbers = #tpu.dot_dimension_numbers<[1], [1], [0], [0], [0, 0, 1, 0], [], []>} : vector<4x8xf32>, vector<4x8xf32>, vector<4x4xf32> -> vector<4x4xf32>
    %cst_304 = arith.constant 0.353553385 : f32
    %705 = vector.broadcast %cst_304 : f32 to vector<4x4xf32>
    %706 = arith.mulf %704, %705 : vector<4x4xf32>
    %cst_305 = arith.constant -3.40282347E+38 : f32
    %707 = vector.broadcast %cst_305 : f32 to vector<4x4xf32>
    %708 = arith.select %622, %706, %707 : vector<4x4xi1>, vector<4x4xf32>
    %cst_306 = arith.constant dense<0.000000e+00> : vector<4x8xf32>
    %709 = tpu.matmul %699, %702, %cst_306 {dimension_numbers = #tpu.dot_dimension_numbers<[1], [1], [0], [0], [0, 0, 1, 0], [], []>} : vector<4x8xf32>, vector<8x8xf32>, vector<4x8xf32> -> vector<4x8xf32>
    %cst_307 = arith.constant 0.353553385 : f32
    %710 = vector.broadcast %cst_307 : f32 to vector<4x8xf32>
    %711 = arith.mulf %709, %710 : vector<4x8xf32>
    %cst_308 = arith.constant dense<0xFF800000> : vector<4xf32>
    %712 = vector.multi_reduction <maximumf>, %708, %cst_308 [1] : vector<4x4xf32> to vector<4xf32>
    %713 = vector.shape_cast %712 : vector<4xf32> to vector<4x1xf32>
    %cst_309 = arith.constant dense<0xFF800000> : vector<4xf32>
    %714 = vector.multi_reduction <maximumf>, %711, %cst_309 [1] : vector<4x8xf32> to vector<4xf32>
    %715 = vector.shape_cast %714 : vector<4xf32> to vector<4x1xf32>
    %716 = arith.maximumf %713, %715 : vector<4x1xf32>
    %717 = vector.broadcast %716 : vector<4x1xf32> to vector<4x4xf32>
    %718 = arith.subf %708, %717 : vector<4x4xf32>
    %719 = math.exp %718 : vector<4x4xf32>
    %720 = vector.broadcast %716 : vector<4x1xf32> to vector<4x8xf32>
    %721 = arith.subf %711, %720 : vector<4x8xf32>
    %722 = math.exp %721 : vector<4x8xf32>
    %cst_310 = arith.constant dense<0.000000e+00> : vector<4xf32>
    %723 = vector.multi_reduction <add>, %719, %cst_310 [1] : vector<4x4xf32> to vector<4xf32>
    %724 = vector.shape_cast %723 : vector<4xf32> to vector<4x1xf32>
    %cst_311 = arith.constant dense<0.000000e+00> : vector<4xf32>
    %725 = vector.multi_reduction <add>, %722, %cst_311 [1] : vector<4x8xf32> to vector<4xf32>
    %726 = vector.shape_cast %725 : vector<4xf32> to vector<4x1xf32>
    %727 = arith.addf %724, %726 : vector<4x1xf32>
    %cst_312 = arith.constant dense<0.000000e+00> : vector<4x8xf32>
    %728 = tpu.matmul %719, %701, %cst_312 {dimension_numbers = #tpu.dot_dimension_numbers<[1], [0], [0], [1], [0, 0, 1, 1], [], []>} : vector<4x4xf32>, vector<4x8xf32>, vector<4x8xf32> -> vector<4x8xf32>
    %cst_313 = arith.constant dense<0.000000e+00> : vector<4x8xf32>
    %729 = tpu.matmul %722, %703, %cst_313 {dimension_numbers = #tpu.dot_dimension_numbers<[1], [0], [0], [1], [0, 0, 1, 1], [], []>} : vector<4x8xf32>, vector<8x8xf32>, vector<4x8xf32> -> vector<4x8xf32>
    %730 = arith.addf %728, %729 : vector<4x8xf32>
    %731 = tpu.reciprocal %727 {approx = true} : vector<4x1xf32> -> vector<4x1xf32>
    %732 = vector.broadcast %731 : vector<4x1xf32> to vector<4x8xf32>
    %733 = arith.mulf %730, %732 : vector<4x8xf32>
    %734 = vector.extract_strided_slice %626 {offsets = [0, 24], sizes = [4, 8], strides = [1, 1]} : vector<4x32xf32> to vector<4x8xf32>
    %735 = vector.extract_strided_slice %627 {offsets = [0, 24], sizes = [4, 8], strides = [1, 1]} : vector<4x32xf32> to vector<4x8xf32>
    %736 = vector.extract_strided_slice %628 {offsets = [0, 24], sizes = [4, 8], strides = [1, 1]} : vector<4x32xf32> to vector<4x8xf32>
    %737 = vector.extract_strided_slice %619 {offsets = [0, 56], sizes = [8, 8], strides = [1, 1]} : vector<8x128xf32> to vector<8x8xf32>
    %738 = vector.extract_strided_slice %619 {offsets = [0, 88], sizes = [8, 8], strides = [1, 1]} : vector<8x128xf32> to vector<8x8xf32>
    %cst_314 = arith.constant dense<0.000000e+00> : vector<4x4xf32>
    %739 = tpu.matmul %734, %735, %cst_314 {dimension_numbers = #tpu.dot_dimension_numbers<[1], [1], [0], [0], [0, 0, 1, 0], [], []>} : vector<4x8xf32>, vector<4x8xf32>, vector<4x4xf32> -> vector<4x4xf32>
    %cst_315 = arith.constant 0.353553385 : f32
    %740 = vector.broadcast %cst_315 : f32 to vector<4x4xf32>
    %741 = arith.mulf %739, %740 : vector<4x4xf32>
    %cst_316 = arith.constant -3.40282347E+38 : f32
    %742 = vector.broadcast %cst_316 : f32 to vector<4x4xf32>
    %743 = arith.select %622, %741, %742 : vector<4x4xi1>, vector<4x4xf32>
    %cst_317 = arith.constant dense<0.000000e+00> : vector<4x8xf32>
    %744 = tpu.matmul %734, %737, %cst_317 {dimension_numbers = #tpu.dot_dimension_numbers<[1], [1], [0], [0], [0, 0, 1, 0], [], []>} : vector<4x8xf32>, vector<8x8xf32>, vector<4x8xf32> -> vector<4x8xf32>
    %cst_318 = arith.constant 0.353553385 : f32
    %745 = vector.broadcast %cst_318 : f32 to vector<4x8xf32>
    %746 = arith.mulf %744, %745 : vector<4x8xf32>
    %cst_319 = arith.constant dense<0xFF800000> : vector<4xf32>
    %747 = vector.multi_reduction <maximumf>, %743, %cst_319 [1] : vector<4x4xf32> to vector<4xf32>
    %748 = vector.shape_cast %747 : vector<4xf32> to vector<4x1xf32>
    %cst_320 = arith.constant dense<0xFF800000> : vector<4xf32>
    %749 = vector.multi_reduction <maximumf>, %746, %cst_320 [1] : vector<4x8xf32> to vector<4xf32>
    %750 = vector.shape_cast %749 : vector<4xf32> to vector<4x1xf32>
    %751 = arith.maximumf %748, %750 : vector<4x1xf32>
    %752 = vector.broadcast %751 : vector<4x1xf32> to vector<4x4xf32>
    %753 = arith.subf %743, %752 : vector<4x4xf32>
    %754 = math.exp %753 : vector<4x4xf32>
    %755 = vector.broadcast %751 : vector<4x1xf32> to vector<4x8xf32>
    %756 = arith.subf %746, %755 : vector<4x8xf32>
    %757 = math.exp %756 : vector<4x8xf32>
    %cst_321 = arith.constant dense<0.000000e+00> : vector<4xf32>
    %758 = vector.multi_reduction <add>, %754, %cst_321 [1] : vector<4x4xf32> to vector<4xf32>
    %759 = vector.shape_cast %758 : vector<4xf32> to vector<4x1xf32>
    %cst_322 = arith.constant dense<0.000000e+00> : vector<4xf32>
    %760 = vector.multi_reduction <add>, %757, %cst_322 [1] : vector<4x8xf32> to vector<4xf32>
    %761 = vector.shape_cast %760 : vector<4xf32> to vector<4x1xf32>
    %762 = arith.addf %759, %761 : vector<4x1xf32>
    %cst_323 = arith.constant dense<0.000000e+00> : vector<4x8xf32>
    %763 = tpu.matmul %754, %736, %cst_323 {dimension_numbers = #tpu.dot_dimension_numbers<[1], [0], [0], [1], [0, 0, 1, 1], [], []>} : vector<4x4xf32>, vector<4x8xf32>, vector<4x8xf32> -> vector<4x8xf32>
    %cst_324 = arith.constant dense<0.000000e+00> : vector<4x8xf32>
    %764 = tpu.matmul %757, %738, %cst_324 {dimension_numbers = #tpu.dot_dimension_numbers<[1], [0], [0], [1], [0, 0, 1, 1], [], []>} : vector<4x8xf32>, vector<8x8xf32>, vector<4x8xf32> -> vector<4x8xf32>
    %765 = arith.addf %763, %764 : vector<4x8xf32>
    %766 = tpu.reciprocal %762 {approx = true} : vector<4x1xf32> -> vector<4x1xf32>
    %767 = vector.broadcast %766 : vector<4x1xf32> to vector<4x8xf32>
    %768 = arith.mulf %765, %767 : vector<4x8xf32>
    %769 = tpu.concatenate %663, %698, %733, %768 in 1 : vector<4x8xf32>, vector<4x8xf32>, vector<4x8xf32>, vector<4x8xf32> -> vector<4x32xf32>
    %770 = vector.extract_strided_slice %614 {offsets = [0, 96], sizes = [32, 32], strides = [1, 1]} : vector<32x128xf32> to vector<32x32xf32>
    %cst_325 = arith.constant dense<0.000000e+00> : vector<4x32xf32>
    %771 = tpu.matmul %769, %770, %cst_325 {dimension_numbers = #tpu.dot_dimension_numbers<[1], [0], [0], [1], [0, 0, 1, 1], [], []>} : vector<4x32xf32>, vector<32x32xf32>, vector<4x32xf32> -> vector<4x32xf32>
    %772 = vector.extract_strided_slice %616 {offsets = [0, 96], sizes = [1, 32], strides = [1, 1]} : vector<1x128xf32> to vector<1x32xf32>
    %773 = vector.broadcast %772 : vector<1x32xf32> to vector<4x32xf32>
    %774 = arith.addf %771, %773 : vector<4x32xf32>
    %c0_326 = arith.constant 0 : index
    %c0_327 = arith.constant 0 : index
    %c0_328 = arith.constant 0 : index
    %775 = vector.load %arg11[%c0_326, %c0_327, %c0_328] : memref<2x32x96xf32, #tpu.memory_space<vmem>>, vector<1x32x96xf32>
    %776 = vector.shape_cast %775 : vector<1x32x96xf32> to vector<32x96xf32>
    %cst_329 = arith.constant dense<0.000000e+00> : vector<4x96xf32>
    %777 = tpu.matmul %774, %776, %cst_329 {dimension_numbers = #tpu.dot_dimension_numbers<[1], [0], [0], [1], [0, 0, 1, 1], [], []>} : vector<4x32xf32>, vector<32x96xf32>, vector<4x96xf32> -> vector<4x96xf32>
    %c0_330 = arith.constant 0 : index
    %c0_331 = arith.constant 0 : index
    %c0_332 = arith.constant 0 : index
    %778 = vector.load %arg12[%c0_330, %c0_331, %c0_332] : memref<2x1x96xf32, #tpu.memory_space<vmem>>, vector<1x1x96xf32>
    %779 = vector.shape_cast %778 : vector<1x1x96xf32> to vector<1x96xf32>
    %780 = vector.broadcast %779 : vector<1x96xf32> to vector<4x96xf32>
    %781 = arith.addf %777, %780 : vector<4x96xf32>
    %c1_333 = arith.constant 1 : index
    %c0_334 = arith.constant 0 : index
    %c0_335 = arith.constant 0 : index
    %782 = vector.load %arg11[%c1_333, %c0_334, %c0_335] : memref<2x32x96xf32, #tpu.memory_space<vmem>>, vector<1x32x96xf32>
    %783 = vector.shape_cast %782 : vector<1x32x96xf32> to vector<32x96xf32>
    %cst_336 = arith.constant dense<0.000000e+00> : vector<4x96xf32>
    %784 = tpu.matmul %2, %783, %cst_336 {dimension_numbers = #tpu.dot_dimension_numbers<[1], [0], [0], [1], [0, 0, 1, 1], [], []>} : vector<4x32xf32>, vector<32x96xf32>, vector<4x96xf32> -> vector<4x96xf32>
    %c1_337 = arith.constant 1 : index
    %c0_338 = arith.constant 0 : index
    %c0_339 = arith.constant 0 : index
    %785 = vector.load %arg12[%c1_337, %c0_338, %c0_339] : memref<2x1x96xf32, #tpu.memory_space<vmem>>, vector<1x1x96xf32>
    %786 = vector.shape_cast %785 : vector<1x1x96xf32> to vector<1x96xf32>
    %787 = vector.broadcast %786 : vector<1x96xf32> to vector<4x96xf32>
    %788 = arith.addf %784, %787 : vector<4x96xf32>
    %789 = vector.extract_strided_slice %781 {offsets = [0, 0], sizes = [4, 32], strides = [1, 1]} : vector<4x96xf32> to vector<4x32xf32>
    %790 = vector.extract_strided_slice %788 {offsets = [0, 0], sizes = [4, 32], strides = [1, 1]} : vector<4x96xf32> to vector<4x32xf32>
    %791 = arith.addf %789, %790 : vector<4x32xf32>
    %792 = arith.negf %791 : vector<4x32xf32>
    %793 = math.exp %792 : vector<4x32xf32>
    %cst_340 = arith.constant 1.000000e+00 : f32
    %794 = vector.broadcast %cst_340 : f32 to vector<4x32xf32>
    %795 = arith.addf %794, %793 : vector<4x32xf32>
    %796 = arith.divf %794, %795 : vector<4x32xf32>
    %797 = vector.extract_strided_slice %781 {offsets = [0, 32], sizes = [4, 32], strides = [1, 1]} : vector<4x96xf32> to vector<4x32xf32>
    %798 = vector.extract_strided_slice %788 {offsets = [0, 32], sizes = [4, 32], strides = [1, 1]} : vector<4x96xf32> to vector<4x32xf32>
    %799 = arith.addf %797, %798 : vector<4x32xf32>
    %800 = arith.negf %799 : vector<4x32xf32>
    %801 = math.exp %800 : vector<4x32xf32>
    %cst_341 = arith.constant 1.000000e+00 : f32
    %802 = vector.broadcast %cst_341 : f32 to vector<4x32xf32>
    %803 = arith.addf %802, %801 : vector<4x32xf32>
    %804 = arith.divf %802, %803 : vector<4x32xf32>
    %805 = vector.extract_strided_slice %781 {offsets = [0, 64], sizes = [4, 32], strides = [1, 1]} : vector<4x96xf32> to vector<4x32xf32>
    %806 = vector.extract_strided_slice %788 {offsets = [0, 64], sizes = [4, 32], strides = [1, 1]} : vector<4x96xf32> to vector<4x32xf32>
    %807 = arith.mulf %796, %806 : vector<4x32xf32>
    %808 = arith.addf %805, %807 : vector<4x32xf32>
    %809 = math.tanh %808 : vector<4x32xf32>
    %cst_342 = arith.constant 1.000000e+00 : f32
    %810 = vector.broadcast %cst_342 : f32 to vector<4x32xf32>
    %811 = arith.subf %810, %804 : vector<4x32xf32>
    %812 = arith.mulf %811, %809 : vector<4x32xf32>
    %813 = arith.mulf %804, %2 : vector<4x32xf32>
    %814 = arith.addf %812, %813 : vector<4x32xf32>
    %c7 = arith.constant 7 : index
    %c0_343 = arith.constant 0 : index
    %c0_344 = arith.constant 0 : index
    %c0_345 = arith.constant 0 : index
    %815 = vector.load %arg4[%c7, %c0_343, %c0_344, %c0_345] : memref<8x2x1x32xf32, #tpu.memory_space<vmem>>, vector<1x1x1x32xf32>
    %816 = vector.shape_cast %815 : vector<1x1x1x32xf32> to vector<1x32xf32>
    %c7_346 = arith.constant 7 : index
    %c1_347 = arith.constant 1 : index
    %c0_348 = arith.constant 0 : index
    %c0_349 = arith.constant 0 : index
    %817 = vector.load %arg4[%c7_346, %c1_347, %c0_348, %c0_349] : memref<8x2x1x32xf32, #tpu.memory_space<vmem>>, vector<1x1x1x32xf32>
    %818 = vector.shape_cast %817 : vector<1x1x1x32xf32> to vector<1x32xf32>
    %cst_350 = arith.constant dense<0.000000e+00> : vector<4xf32>
    %819 = vector.multi_reduction <add>, %814, %cst_350 [1] : vector<4x32xf32> to vector<4xf32>
    %820 = vector.shape_cast %819 : vector<4xf32> to vector<4x1xf32>
    %cst_351 = arith.constant 3.200000e+01 : f32
    %821 = vector.broadcast %cst_351 : f32 to vector<4x1xf32>
    %822 = arith.divf %820, %821 : vector<4x1xf32>
    %823 = arith.mulf %814, %814 : vector<4x32xf32>
    %cst_352 = arith.constant dense<0.000000e+00> : vector<4xf32>
    %824 = vector.multi_reduction <add>, %823, %cst_352 [1] : vector<4x32xf32> to vector<4xf32>
    %825 = vector.shape_cast %824 : vector<4xf32> to vector<4x1xf32>
    %cst_353 = arith.constant 3.200000e+01 : f32
    %826 = vector.broadcast %cst_353 : f32 to vector<4x1xf32>
    %827 = arith.divf %825, %826 : vector<4x1xf32>
    %828 = arith.mulf %822, %822 : vector<4x1xf32>
    %829 = arith.subf %827, %828 : vector<4x1xf32>
    %830 = vector.broadcast %822 : vector<4x1xf32> to vector<4x32xf32>
    %831 = arith.subf %814, %830 : vector<4x32xf32>
    %cst_354 = arith.constant 9.99999974E-6 : f32
    %832 = vector.broadcast %cst_354 : f32 to vector<4x1xf32>
    %833 = arith.addf %829, %832 : vector<4x1xf32>
    %834 = math.rsqrt %833 : vector<4x1xf32>
    %835 = vector.broadcast %834 : vector<4x1xf32> to vector<4x32xf32>
    %836 = arith.mulf %831, %835 : vector<4x32xf32>
    %837 = vector.broadcast %816 : vector<1x32xf32> to vector<4x32xf32>
    %838 = arith.mulf %836, %837 : vector<4x32xf32>
    %839 = vector.broadcast %818 : vector<1x32xf32> to vector<4x32xf32>
    %840 = arith.addf %838, %839 : vector<4x32xf32>
    %c2_355 = arith.constant 2 : index
    %c0_356 = arith.constant 0 : index
    %c0_357 = arith.constant 0 : index
    %841 = vector.load %arg7[%c2_355, %c0_356, %c0_357] : memref<3x32x128xf32, #tpu.memory_space<vmem>>, vector<1x32x128xf32>
    %842 = vector.shape_cast %841 : vector<1x32x128xf32> to vector<32x128xf32>
    %cst_358 = arith.constant dense<0.000000e+00> : vector<4x128xf32>
    %843 = tpu.matmul %840, %842, %cst_358 {dimension_numbers = #tpu.dot_dimension_numbers<[1], [0], [0], [1], [0, 0, 1, 1], [], []>} : vector<4x32xf32>, vector<32x128xf32>, vector<4x128xf32> -> vector<4x128xf32>
    %c2_359 = arith.constant 2 : index
    %c0_360 = arith.constant 0 : index
    %c0_361 = arith.constant 0 : index
    %844 = vector.load %arg8[%c2_359, %c0_360, %c0_361] : memref<3x1x128xf32, #tpu.memory_space<vmem>>, vector<1x1x128xf32>
    %845 = vector.shape_cast %844 : vector<1x1x128xf32> to vector<1x128xf32>
    %846 = vector.broadcast %845 : vector<1x128xf32> to vector<4x128xf32>
    %847 = arith.addf %843, %846 : vector<4x128xf32>
    %848 = arith.mulf %847, %847 : vector<4x128xf32>
    %849 = arith.mulf %847, %848 : vector<4x128xf32>
    %cst_362 = arith.constant 4.471500e-02 : f32
    %850 = vector.broadcast %cst_362 : f32 to vector<4x128xf32>
    %851 = arith.mulf %850, %849 : vector<4x128xf32>
    %852 = arith.addf %847, %851 : vector<4x128xf32>
    %cst_363 = arith.constant 0.797884583 : f32
    %853 = vector.broadcast %cst_363 : f32 to vector<4x128xf32>
    %854 = arith.mulf %853, %852 : vector<4x128xf32>
    %855 = math.tanh %854 : vector<4x128xf32>
    %cst_364 = arith.constant 1.000000e+00 : f32
    %856 = vector.broadcast %cst_364 : f32 to vector<4x128xf32>
    %857 = arith.addf %856, %855 : vector<4x128xf32>
    %cst_365 = arith.constant 5.000000e-01 : f32
    %858 = vector.broadcast %cst_365 : f32 to vector<4x128xf32>
    %859 = arith.mulf %858, %857 : vector<4x128xf32>
    %860 = arith.mulf %847, %859 : vector<4x128xf32>
    %c2_366 = arith.constant 2 : index
    %c0_367 = arith.constant 0 : index
    %c0_368 = arith.constant 0 : index
    %861 = vector.load %arg9[%c2_366, %c0_367, %c0_368] : memref<3x128x32xf32, #tpu.memory_space<vmem>>, vector<1x128x32xf32>
    %862 = vector.shape_cast %861 : vector<1x128x32xf32> to vector<128x32xf32>
    %cst_369 = arith.constant dense<0.000000e+00> : vector<4x32xf32>
    %863 = tpu.matmul %860, %862, %cst_369 {dimension_numbers = #tpu.dot_dimension_numbers<[1], [0], [0], [1], [0, 0, 1, 1], [], []>} : vector<4x128xf32>, vector<128x32xf32>, vector<4x32xf32> -> vector<4x32xf32>
    %c2_370 = arith.constant 2 : index
    %c0_371 = arith.constant 0 : index
    %c0_372 = arith.constant 0 : index
    %864 = vector.load %arg10[%c2_370, %c0_371, %c0_372] : memref<3x1x32xf32, #tpu.memory_space<vmem>>, vector<1x1x32xf32>
    %865 = vector.shape_cast %864 : vector<1x1x32xf32> to vector<1x32xf32>
    %866 = vector.broadcast %865 : vector<1x32xf32> to vector<4x32xf32>
    %867 = arith.addf %863, %866 : vector<4x32xf32>
    %868 = arith.addf %814, %867 : vector<4x32xf32>
    %869 = vector.shape_cast %868 : vector<4x32xf32> to vector<1x4x32xf32>
    %c0_373 = arith.constant 0 : index
    %c0_374 = arith.constant 0 : index
    %c0_375 = arith.constant 0 : index
    %870 = vector.load %arg14[%c0_373, %c0_374, %c0_375] : memref<1x4x32xf32, #tpu.memory_space<vmem>>, vector<1x4x32xf32>
    tpu.vector_store %arg14[%c0_373, %c0_374, %c0_375], %869 {strides = array<i32>} : memref<1x4x32xf32, #tpu.memory_space<vmem>>, vector<1x4x32xf32>,
    return
  }
  func.func @transform_0(%arg0: i32) -> (i32, i32, i32) {
    %c0_i32 = arith.constant 0 : i32
    %c0_i32_0 = arith.constant 0 : i32
    %c0_i32_1 = arith.constant 0 : i32
    return %arg0, %c0_i32, %c0_i32_0 : i32, i32, i32
  }
  func.func @transform_1(%arg0: i32) -> (i32, i32) {
    %c0_i32 = arith.constant 0 : i32
    %c0_i32_0 = arith.constant 0 : i32
    %c0_i32_1 = arith.constant 0 : i32
    return %c0_i32, %c0_i32_0 : i32, i32
  }
  func.func @transform_2(%arg0: i32) -> (i32, i32, i32, i32) {
    %c0_i32 = arith.constant 0 : i32
    %c0_i32_0 = arith.constant 0 : i32
    %c0_i32_1 = arith.constant 0 : i32
    %c0_i32_2 = arith.constant 0 : i32
    %c0_i32_3 = arith.constant 0 : i32
    return %c0_i32, %c0_i32_0, %c0_i32_1, %c0_i32_2 : i32, i32, i32, i32
  }
  func.func @transform_3(%arg0: i32) -> (i32, i32, i32, i32) {
    %c0_i32 = arith.constant 0 : i32
    %c0_i32_0 = arith.constant 0 : i32
    %c0_i32_1 = arith.constant 0 : i32
    %c0_i32_2 = arith.constant 0 : i32
    %c0_i32_3 = arith.constant 0 : i32
    return %c0_i32, %c0_i32_0, %c0_i32_1, %c0_i32_2 : i32, i32, i32, i32
  }
  func.func @transform_4(%arg0: i32) -> (i32, i32, i32) {
    %c0_i32 = arith.constant 0 : i32
    %c0_i32_0 = arith.constant 0 : i32
    %c0_i32_1 = arith.constant 0 : i32
    %c0_i32_2 = arith.constant 0 : i32
    return %c0_i32, %c0_i32_0, %c0_i32_1 : i32, i32, i32
  }
  func.func @transform_5(%arg0: i32) -> (i32, i32, i32) {
    %c0_i32 = arith.constant 0 : i32
    %c0_i32_0 = arith.constant 0 : i32
    %c0_i32_1 = arith.constant 0 : i32
    %c0_i32_2 = arith.constant 0 : i32
    return %c0_i32, %c0_i32_0, %c0_i32_1 : i32, i32, i32
  }
  func.func @transform_6(%arg0: i32) -> (i32, i32, i32) {
    %c0_i32 = arith.constant 0 : i32
    %c0_i32_0 = arith.constant 0 : i32
    %c0_i32_1 = arith.constant 0 : i32
    %c0_i32_2 = arith.constant 0 : i32
    return %c0_i32, %c0_i32_0, %c0_i32_1 : i32, i32, i32
  }
  func.func @transform_7(%arg0: i32) -> (i32, i32, i32) {
    %c0_i32 = arith.constant 0 : i32
    %c0_i32_0 = arith.constant 0 : i32
    %c0_i32_1 = arith.constant 0 : i32
    %c0_i32_2 = arith.constant 0 : i32
    return %c0_i32, %c0_i32_0, %c0_i32_1 : i32, i32, i32
  }
  func.func @transform_8(%arg0: i32) -> (i32, i32, i32) {
    %c0_i32 = arith.constant 0 : i32
    %c0_i32_0 = arith.constant 0 : i32
    %c0_i32_1 = arith.constant 0 : i32
    %c0_i32_2 = arith.constant 0 : i32
    return %c0_i32, %c0_i32_0, %c0_i32_1 : i32, i32, i32
  }
  func.func @transform_9(%arg0: i32) -> (i32, i32, i32) {
    %c0_i32 = arith.constant 0 : i32
    %c0_i32_0 = arith.constant 0 : i32
    %c0_i32_1 = arith.constant 0 : i32
    %c0_i32_2 = arith.constant 0 : i32
    return %c0_i32, %c0_i32_0, %c0_i32_1 : i32, i32, i32
  }
  func.func @transform_10(%arg0: i32) -> (i32, i32, i32) {
    %c0_i32 = arith.constant 0 : i32
    %c0_i32_0 = arith.constant 0 : i32
    %c0_i32_1 = arith.constant 0 : i32
    %c0_i32_2 = arith.constant 0 : i32
    return %c0_i32, %c0_i32_0, %c0_i32_1 : i32, i32, i32
  }
  func.func @transform_11(%arg0: i32) -> (i32, i32, i32) {
    %c0_i32 = arith.constant 0 : i32
    %c0_i32_0 = arith.constant 0 : i32
    %c0_i32_1 = arith.constant 0 : i32
    %c0_i32_2 = arith.constant 0 : i32
    return %c0_i32, %c0_i32_0, %c0_i32_1 : i32, i32, i32
  }
  func.func @transform_12(%arg0: i32) -> (i32, i32, i32) {
    %c0_i32 = arith.constant 0 : i32
    %c0_i32_0 = arith.constant 0 : i32
    %c0_i32_1 = arith.constant 0 : i32
    return %arg0, %c0_i32, %c0_i32_0 : i32, i32, i32
  }
  func.func @transform_13(%arg0: i32) -> (i32, i32, i32) {
    %c0_i32 = arith.constant 0 : i32
    %c0_i32_0 = arith.constant 0 : i32
    %c0_i32_1 = arith.constant 0 : i32
    return %arg0, %c0_i32, %c0_i32_0 : i32, i32, i32
  }
}

</mosaic_0001>

<bundles_post_ra>
// kernel: memformer_forward.1
= control target key start
LH: loop header
LB: loop body
LE: loop exit
PB: predicated region body
PF: predicated region fallthrough
CT: control target
= control target key end

     0   :  { %s9763_s0 = inlined_call_operand.vmem [shape: f32[2,8,32], index: 0, kind: input, shape index: {}]   ;;  %s9764_s1 = inlined_call_operand.vmem [shape: f32[4,32], index: 1, kind: input, shape index: {}]   ;;  %s9765_s2 = inlined_call_operand.vmem [shape: f32[2,4,8,8], index: 2, kind: input, shape index: {}]   ;;  %s9766_s3 = inlined_call_operand.vmem [shape: f32[8,2,1,32], index: 3, kind: input, shape index: {}]   ;;  %s9767_s4 = inlined_call_operand.vmem [shape: f32[5,32,128], index: 4, kind: input, shape index: {}]   ;;  %s9768_s5 = inlined_call_operand.vmem [shape: f32[5,1,128], index: 5, kind: input, shape index: {}]   ;;  %s9769_s6 = inlined_call_operand.vmem [shape: f32[3,32,128], index: 6, kind: input, shape index: {}]   ;;  %s9770_s7 = inlined_call_operand.vmem [shape: f32[3,1,128], index: 7, kind: input, shape index: {}]   ;;  %s9771_s8 = inlined_call_operand.vmem [shape: f32[3,128,32], index: 8, kind: input, shape index: {}]   ;;  %s9772_s9 = inlined_call_operand.vmem [shape: f32[3,1,32], index: 9, kind: input, shape index: {}]   ;;  %s9773_s10 = inlined_call_operand.vmem [shape: f32[2,32,96], index: 10, kind: input, shape index: {}]   ;;  %s9774_s11 = inlined_call_operand.vmem [shape: f32[2,1,96], index: 11, kind: input, shape index: {}]   ;;  %s9775_s12 = inlined_call_operand.hbm [shape: f32[2,8,32], index: 12, kind: output, shape index: {0}]   ;;  %s9776_s13 = inlined_call_operand.hbm [shape: f32[2,4,32], index: 13, kind: output, shape index: {1}]  }
   0x1   :  { %9824 = sst [smem:[#allocation17_spill]] %s9763_s0 }
   0x2   :  { %9825 = sst [smem:[#allocation18_spill]] %s9764_s1 }
   0x3   :  { %9826 = sst [smem:[#allocation19_spill]] %s9765_s2 }
   0x4   :  { %9827 = sst [smem:[#allocation20_spill]] %s9769_s6 }
   0x5   :  { %9828 = sst [smem:[#allocation21_spill]] %s9773_s10 }
   0x6   :  { %9829 = sst [smem:[#allocation22_spill]] %s9774_s11 }
   0x7   :  { %9830 = sst [smem:[#allocation23_spill]] %s9775_s12 }
   0x8   :  { %9831 = sst [smem:[#allocation24_spill]] %s9776_s13 }
   0x9   :  { %19 = vsyncpa [#allocation3], 0 }
   0xa   :  { %21 = vsyncpa [#allocation3 + $0x1], 0 }
   0xb   :  { %22 = vsyncpa [#allocation5], 0 }
   0xc   :  { %24 = vsyncpa [#allocation5 + $0x1], 0  ;;  %s8447_s25 = smov 0   ;;  %s8449_s26 = smov 0  }
   0xd   :  { %s8451_s27 = smov 0   ;;  %s8453_s28 = smov 0  }
   0xe LB: > { %9832 = sst [smem:[#allocation8_spill]] %s8343_s25  ;;  %s8468_s29 = sadd.s32 4294967295, %s8355_s28   ;;  %s8355_s28 = sphi %s8453_s28, %s9875_s28   ;;  %s8351_s27 = sphi %s8451_s27, %s9878_s27   ;;  %s8347_s26 = sphi %s8449_s26, %s9877_s26   ;;  %s8343_s25 = sphi %s8447_s25, %s9876_s25  }
   0xf   : > { %9833 = sst [smem:[#allocation9_spill]] %s8347_s26  ;;  %s6828_s30 = sadd.s32 4294967294, %s8355_s28  }
  0x10   : > { %9834 = sst [smem:[#allocation10_spill]] %s8351_s27  ;;  %s8472_s14 = sadd.s32 1, %s8355_s28  }
  0x11   : > { %9835 = sst [smem:[#allocation11_spill]] %s8355_s28  ;;  %s294_s15 = sadd.s32 1, %s8351_s27 }
  0x12   : > { %9836 = sst [smem:[#allocation12_spill]] %s8468_s29  ;;  %s291_s16 = ssub.s32 %s8355_s28, %s8472_s14 }
  0x13   : > { %9837 = sst [smem:[#allocation13_spill]] %s8472_s14  ;;  %p304_p0 = scmp.ne.s32.totalorder %s8351_s27, %s8347_s26 }
  0x14   : > { %p292_p1 = scmp.eq.s32.totalorder %s291_s16, 0  ;;  %p305_p2 = scmp.eq.s32.totalorder %s8468_s29, 1 }
  0x15   : > { %p310_p3 = scmp.ne.s32.totalorder %s8347_s26, %s8343_s25  ;;  %p311_p4 = scmp.eq.s32.totalorder %s6828_s30, 1 }
  0x16   : > { %s8483_s17 = scalar_select %p292_p1, %s8351_s27, %s294_s15  }
  0x17   : > { %p8485_p5 = por %p305_p2, %p304_p0  ;;  %p8489_p6 = por %p311_p4, %p310_p3 }
  0x18   : > { %9838 = sst [smem:[#allocation14_spill]] %s8483_s17  ;;  %p6831_p7 = scmp.ge.s32.totalorder %s8355_s28, 1 }
  0x19   : > { %s9839_s18 = scalar_select %p8485_p5, 1, 0 }
  0x1a   : > { %s9841_s19 = scalar_select %p8489_p6, 1, 0 }
  0x1b   : > { %9840 = sst [smem:[#allocation15_spill]] %s9839_s18  ;;  %p395_p8 = scmp.lt.s32.totalorder %s8355_s28, 3 }
  0x1c   : > { %9842 = sst [smem:[#allocation16_spill]] %s9841_s19 }
  0x1d   : > { %p396_p9 = pnand %p6831_p7, %p395_p8 }
  0x1e   : > { %p443_p10 = scmp.lt.s32.totalorder (!%p396_p9), %s8468_s29, 1  ;;  %vm457_vm0 = vcmask (!%p396_p9), 261120   ;;  %s9843_s0 = sld [smem:[#allocation17_spill]] (!%p396_p9)  ;;  %v8510_v4 = vld [vmem:[%s9767_s4] sm:$0xff] (!%p396_p9)  ;;  %v8515_v5 = vld [vmem:[%s9767_s4 + $0x8] sm:$0xff] (!%p396_p9)  ;;  %v8520_v6 = vld [vmem:[%s9767_s4 + $0x10] sm:$0xff] (!%p396_p9) }
  0x1f   : > { %399 = sbr.rel (%p396_p9) target bundleno = 12223 (0x2fbf), region = 68  ;;  %v8357_v7 = vmov (!%p396_p9), 0.0|0.0   ;;  %v8094_v8 = vpack.i.bf16 (!%p396_p9), %v8515_v5, %v8510_v4  ;;  %v7845_v9 = vpack.c.bf16 (!%p396_p9), %v8515_v5, %v8510_v4  ;;  %v8530_v10 = vld [vmem:[%s9767_s4 + $0x18] sm:$0xff] (!%p396_p9)  ;;  %vm8358_vm1 = vmmov (!%p396_p9), 0   ;;  %v6836_v22 = vld [vmem:[%s9766_s3] ss:$0 sm:$0xff] (!%p396_p9) }
  0x20   : > { %7844 = vmatprep.subr.bf16.mxu0 (!%p396_p9), %v8357_v7  ;;  %v8359_v11 = vmov (!%p396_p9), 0.0   ;;  %v7848_v12 = vpack.c.bf16 (!%p396_p9), %v8530_v10, %v8520_v6  ;;  %v6837_v24 = vld [vmem:[%s9766_s3 + $0x1] ss:$0 sm:$0xff] (!%p396_p9)  ;;  %v8554_v27 = vld [vmem:[%s9768_s5] ss:$0 sm:$0xff] (!%p396_p9)  ;;  %s9783_s23 = smov (!%p396_p9), 120  }
  0x21   : > { %7309 = vmatprep.mubr.msk.f32.mxu0 (!%p396_p9), %vm8358_vm1, %v8359_v11  ;;  %7317 = vmatprep.subr.mxu1 (!%p396_p9), %v8359_v11  ;;  %s9805_s30 = smov (!%p396_p9), 88   ;;  %s9801_s15 = smov (!%p396_p9), 80   ;;  %vm570_vm2 = vcmask (!%p396_p9), 64512   ;;  %vm1255_vm3 = vcmask (!%p396_p9), 130048   ;;  %vm1257_vm4 = vcmask (!%p396_p9), 195584   ;;  %vm1624_vm5 = vcmask (!%p396_p9), 31744  }
  0x22   : > { %7319 = vmatprep.mubr.msk.f32.mxu1 (!%p396_p9), %vm8358_vm1, %v8359_v11  ;;  %7846 = vmatpush3.bf16.msra.mxu0 (!%p396_p9), %v7845_v9  ;;  %s9779_s16 = smov (!%p396_p9), 112   ;;  %s9844_s2 = sld [smem:[#allocation19_spill]] (!%p396_p9)  ;;  %vm1641_vm6 = vcmask (!%p396_p9), 1043456   ;;  %vm4987_vm8 = vcmask (!%p396_p9), 27648   ;;  %vm4991_vm9 = vcmask (!%p396_p9), 60416   ;;  %vm6465_vm10 = vcmask (!%p396_p9), 257024  }
  0x23   : > { %7847 = vmatprep.subr.bf16.mxu0 (!%p396_p9), %v8357_v7  ;;  %s9787_s22 = smov (!%p396_p9), 48   ;;  %s9845_s1 = sld [smem:[#allocation18_spill]] (!%p396_p9) }
  0x24   : > { %s9855_s17 = smov (!%p396_p9), 40   ;;  %s9856_s27 = smov (!%p396_p9), 32  }
  0x25   : > { %s9857_s14 = smov (!%p396_p9), 8   ;;  %s9858_s19 = smov (!%p396_p9), 16  }
  0x26   : > { %s444_s20 = scalar_select %p443_p10, %s8468_s29, 1  ;;  %7849 = vmatpush3.bf16.msra.mxu0 %v7848_v12 }
  0x27   : > { %7312 = vmatprep.subr.mxu0 %v8359_v11  ;;  %s9859_s25 = smov 24   ;;  %s9860_s6 = sld [smem:[#allocation20_spill]] }
  0x28   : > { %s6834_s21 = sshll.u32 %s444_s20, 3  ;;  %s9781_s20 = smov 72   ;;  %v646_v39 = vld [vmem:[%s9844_s2] sm:$0xff]  ;;  %v6845_v44 = vld [vmem:[%s9844_s2 + $0x8] sm:$0xff]  ;;  %v6849_v51 = vld [vmem:[%s9844_s2 + $0x10] sm:$0xff] }
  0x29   : > { %s446_s24 = scalar_lea.vmem %s9843_s0, %s6834_s21  ;;  %s9777_s21 = smov 104   ;;  %v6853_v57 = vld [vmem:[%s9844_s2 + $0x18] sm:$0xff] }
  0x2a   : > { %v8500_v0 = vld [vmem:[%s446_s24] sm:$0xff]  ;;  %s9803_s24 = smov 96   ;;  %s9854_s0 = smov 48  }
  0x2b   : > { %v458_v1 = vsel %vm457_vm0, %v8500_v0, 0.0  ;;  %v463_v2 = vmul.f32 %v8500_v0, %v8500_v0  ;;  %s9861_s11 = smov 88   ;;  %s9862_s10 = sld [smem:[#allocation20_spill]] }
  0x2c   : > { %459 = vadd.xlane.f32.xlu0 %v458_v1  ;;  %s9863_s28 = sld [smem:[#allocation9_spill]]  ;;  %s9866_s13 = sld [smem:[#allocation22_spill]] }
  0x2d   : > { %v464_v3 = vsel %vm457_vm0, %v463_v2, 0.0  ;;  %s9870_s29 = sld [smem:[#allocation23_spill]] }
  0x30   : > { %465 = vadd.xlane.f32.xlu0 %v464_v3 }
  0x32   : > { %s9328_s26 = sand.u32 1, %s9863_s28  }
  0xb9   : > { %v460_v13 = vpop.xlane.xlu0 %459 }
  0xba   : > { %v462_v14 = vmul.f32 0.03125, %v460_v13 }
  0xbc   : > { %v468_v16 = vmul.f32 %v462_v14, %v462_v14  ;;  %v470_v20 = vsub.f32 %v8500_v0, %v462_v14 }
  0xbd   : > { %v466_v15 = vpop.xlane.xlu0 %465 }
  0xbe   : > { %v467_v17 = vmul.f32 0.03125, %v466_v15 }
  0xc0   : > { %v469_v18 = vsub.f32 %v467_v17, %v468_v16 }
  0xc2   : > { %v471_v19 = vadd.f32 1e-05, %v469_v18 }
  0xc4   : > { %8144 = vrsqrt.f32 %v471_v19 }
  0xce   : > { %v8145_v21 = vpop.eup %8144 }
  0xcf   : > { %v473_v23 = vmul.f32 %v8145_v21, %v470_v20 }
  0xd1   : > { %v480_v25 = vmul.f32 %v6836_v22, %v473_v23 }
  0xd3   : > { %v487_v26 = vadd.f32 %v6837_v24, %v480_v25 }
  0xd5   : > { %7310 = vmatmul.mubr.msk.f32.vlgmr.msra.gmra.mrb[0].mxu0 %vm457_vm0, %v487_v26 }
  0xd6   : > { %7314 = vmatprep.mubr.msk.f32.mxu0 %vm8358_vm1, %v8359_v11 }
 0x1a8   : > { %v563_v28 = vpop.f32.mrb[0].mxu0 }
 0x1a9   : > { %v8557_v29 = vadd.f32 %v8554_v27, %v563_v28  ;;  %v7311_v30 = vpop.f32.mrb[1].mxu0 }
 0x1ab   : > { %735 = vrot.lane.b32.xlu0 %v8557_v29, %s9783_s23  ;;  %568 = vrot.lane.b32.xlu1 %v8557_v29, %s9803_s24  ;;  %s9789_s23 = smov 64   ;;  %s9852_s24 = smov 56  }
 0x1af   : > { %737 = vrot.lane.b32.xlu1 %v8557_v29, %s9805_s30 }
 0x1b3   : > { %906 = vrot.lane.b32.xlu1 %v8557_v29, %s9801_s15  ;;  %s9846_s15 = smov 96  }
 0x1b7   : > { %904 = vrot.lane.b32.xlu1 %v8557_v29, %s9779_s16  ;;  %s9799_s16 = smov 56  }
 0x1bb   : > { %1075 = vrot.lane.b32.xlu1 %v8557_v29, %s9781_s20  ;;  %s9797_s20 = smov 32  }
 0x1bf   : > { %1073 = vrot.lane.b32.xlu1 %v8557_v29, %s9777_s21  ;;  %s9785_s21 = smov 40  }
 0x21d   : > { %v569_v31 = vpop.permute.xlu1 %568  ;;  %v736_v33 = vpop.permute.xlu0 %735 }
 0x21e   : > { %7313 = vmatpush3.xpose.msk.msra.mxu0 %vm570_vm2, %v569_v31 }
 0x21f   : > { %7322 = vmatprep.subr.mxu0 %v8359_v11 }
 0x221   : > { %7315 = vmatmul.mubr.msk.f32.vlgmr.msra.gmra.mrb[2].mxu0 %vm570_vm2, %v8557_v29  ;;  %v738_v32 = vpop.permute.xlu1 %737 }
 0x222   : > { %7323 = vmatpush3.xpose.msk.msra.mxu0 %vm570_vm2, %v738_v32  ;;  %7324 = vmatprep.mubr.msk.f32.mxu0 %vm8358_vm1, %v8359_v11 }
 0x223   : > { %7332 = vmatprep.subr.mxu0 %v8359_v11 }
 0x225   : > { %7325 = vmatmul.mubr.msk.f32.vlgmr.msra.gmra.mrb[4].mxu0 %vm570_vm2, %v736_v33  ;;  %v907_v34 = vpop.permute.xlu1 %906 }
 0x226   : > { %7333 = vmatpush3.xpose.msk.msra.mxu0 %vm570_vm2, %v907_v34  ;;  %7334 = vmatprep.mubr.msk.f32.mxu0 %vm8358_vm1, %v8359_v11 }
 0x227   : > { %7342 = vmatprep.subr.mxu0 %v8359_v11 }
 0x229   : > { %v905_v35 = vpop.permute.xlu1 %904 }
 0x22a   : > { %7335 = vmatmul.mubr.msk.f32.vlgmr.msra.gmra.mrb[6].mxu0 %vm570_vm2, %v905_v35 }
 0x22b   : > { %7344 = vmatprep.mubr.msk.f32.mxu0 %vm8358_vm1, %v8359_v11 }
 0x22d   : > { %v1076_v36 = vpop.permute.xlu1 %1075 }
 0x22e   : > { %7343 = vmatpush3.xpose.msk.msra.mxu0 %vm570_vm2, %v1076_v36 }
 0x22f   : > { %7850 = vmatprep.subr.bf16.mxu0 %v8357_v7 }
 0x231   : > { %v1074_v37 = vpop.permute.xlu1 %1073 }
 0x232   : > { %7345 = vmatmul.mubr.msk.f32.vlgmr.msra.gmra.mrb[8].mxu0 %vm570_vm2, %v1074_v37 }
 0x233   : > { %7360 = vmatprep.mubr.msk.f32.mxu0 %vm8358_vm1, %v8359_v11 }
 0x2f4   : > { %v641_v38 = vpop.f32.mrb[2].mxu0 }
 0x2f5   : > { %v645_v40 = vmul.f32 0.35355338, %v641_v38  ;;  %v7316_v41 = vpop.f32.mrb[3].mxu0 }
 0x2f7   : > { %v647_v42 = vadd.f32 %v646_v39, %v645_v40 }
 0x2f8   : > { %v809_v43 = vpop.f32.mrb[4].mxu0 }
 0x2f9   : > { %v813_v45 = vmul.f32 0.35355338, %v809_v43  ;;  %v7326_v46 = vpop.f32.mrb[5].mxu0  ;;  %v648_v47 = vsel %vm570_vm2, %v647_v42, -inf  ;;  %v8099_v43 = vpack.i.bf16 %v8530_v10, %v8520_v6 }
 0x2fa   : > { %649 = vmax.xlane.f32.xlu1 %v648_v47 }
 0x2fb   : > { %v816_v48 = vadd.f32 %v6845_v44, %v813_v45 }
 0x2fd   : > { %v978_v49 = vpop.f32.mrb[6].mxu0  ;;  %v817_v50 = vsel %vm570_vm2, %v816_v48, -inf }
 0x2fe   : > { %v982_v52 = vmul.f32 0.35355338, %v978_v49  ;;  %818 = vmax.xlane.f32.xlu0 %v817_v50  ;;  %v7336_v53 = vpop.f32.mrb[7].mxu0 }
 0x300   : > { %v985_v54 = vadd.f32 %v6849_v51, %v982_v52 }
 0x302   : > { %v986_v55 = vsel %vm570_vm2, %v985_v54, -inf }
 0x303   : > { %987 = vmax.xlane.f32.xlu1 %v986_v55 }
 0x305   : > { %v1147_v56 = vpop.f32.mrb[8].mxu0 }
 0x306   : > { %v1151_v58 = vmul.f32 0.35355338, %v1147_v56  ;;  %v7346_v59 = vpop.f32.mrb[9].mxu0 }
 0x308   : > { %v1154_v60 = vadd.f32 %v6853_v57, %v1151_v58 }
 0x30a   : > { %v1155_v61 = vsel %vm570_vm2, %v1154_v60, -inf }
 0x30b   : > { %1156 = vmax.xlane.f32.xlu0 %v1155_v61 }
 0x314   : > { %659 = vrot.lane.b32.xlu1 %v8557_v29, %s9789_s23  ;;  %s9791_s23 = smov 24  }
 0x387   : > { %v650_v62 = vpop.xlane.xlu1 %649 }
 0x388   : > { %v651_v63 = vsub.f32 %v647_v42, %v650_v62 }
 0x38a   : > { %v652_v1 = vmul.f32 1.442695, %v651_v63 }
 0x38b   : > { %v819_v2 = vpop.xlane.xlu0 %818 }
 0x38c   : > { %8146 = vpow2.f32 %v652_v1  ;;  %v820_v3 = vsub.f32 %v816_v48, %v819_v2 }
 0x38e   : > { %v821_v9 = vmul.f32 1.442695, %v820_v3 }
 0x390   : > { %8148 = vpow2.f32 %v821_v9  ;;  %v988_v12 = vpop.xlane.xlu1 %987 }
 0x391   : > { %v989_v13 = vsub.f32 %v985_v54, %v988_v12  ;;  %v8669_v12 = vld [vmem:[%s9767_s4 + $0x20] sm:$0xff] }
 0x393   : > { %v990_v14 = vmul.f32 1.442695, %v989_v13 }
 0x394   : > { %v660_v15 = vpop.permute.xlu1 %659 }
 0x395   : > { %8150 = vpow2.f32 %v990_v14  ;;  %7318 = vmatpush3.msra.mxu1 %v660_v15  ;;  %v8682_v14 = vld [vmem:[%s9767_s4 + $0x30] sm:$0xff]  ;;  %v8687_v15 = vld [vmem:[%s9767_s4 + $0x38] sm:$0xff] }
 0x396   : > { %v8147_v16 = vpop.eup %8146  ;;  %7327 = vmatprep.subr.mxu1 %v8359_v11 }
 0x397   : > { %v654_v17 = vsel %vm570_vm2, %v8147_v16, 0.0 }
 0x398   : > { %655 = vadd.xlane.f32.xlu1 %v654_v17  ;;  %v1157_v18 = vpop.xlane.xlu0 %1156 }
 0x399   : > { %v1158_v19 = vsub.f32 %v1154_v60, %v1157_v18 }
 0x39a   : > { %v8149_v20 = vpop.eup %8148 }
 0x39b   : > { %v1159_v21 = vmul.f32 1.442695, %v1158_v19  ;;  %v823_v22 = vsel %vm570_vm2, %v8149_v20, 0.0 }
 0x39c   : > { %824 = vadd.xlane.f32.xlu0 %v823_v22 }
 0x39d   : > { %8152 = vpow2.f32 %v1159_v21 }
 0x39f   : > { %v8151_v23 = vpop.eup %8150 }
 0x3a0   : > { %v992_v24 = vsel %vm570_vm2, %v8151_v23, 0.0 }
 0x3a1   : > { %993 = vadd.xlane.f32.xlu1 %v992_v24 }
 0x3a7   : > { %v8153_v25 = vpop.eup %8152 }
 0x3a8   : > { %v1161_v26 = vsel %vm570_vm2, %v8153_v25, 0.0 }
 0x3a9   : > { %1162 = vadd.xlane.f32.xlu0 %v1161_v26  ;;  %v6863_v26 = vld [vmem:[%s9766_s3 + $0x2] ss:$0 sm:$0xff] }
 0x3b2   : > { %997 = vrot.lane.b32.xlu1 %v8557_v29, %s9787_s22  ;;  %s9793_s22 = smov 16  }
 0x3b6   : > { %1166 = vrot.lane.b32.xlu1 %v8557_v29, %s9785_s21  ;;  %s9795_s21 = smov 8  }
 0x3ba   : > { %8100 = vrot.lane.b32.xlu1 %v8099_v43, %s9797_s20 }
 0x3bf   : > { %828 = vrot.lane.b32.xlu0 %v8557_v29, %s9799_s16  ;;  %s9849_s16 = smov 72  }
 0x3c3   : > { %8095 = vrot.lane.b32.xlu0 %v8094_v8, %s9797_s20 }
 0x425   : > { %v656_v28 = vpop.xlane.xlu1 %655 }
 0x426   : > { %8154 = vrcp.f32 %v656_v28 }
 0x429   : > { %v825_v30 = vpop.xlane.xlu0 %824 }
 0x42a   : > { %8156 = vrcp.f32 %v825_v30  ;;  %v6864_v30 = vld [vmem:[%s9766_s3 + $0x3] ss:$0 sm:$0xff] }
 0x42e   : > { %v994_v31 = vpop.xlane.xlu1 %993 }
 0x42f   : > { %8158 = vrcp.f32 %v994_v31 }
 0x430   : > { %v8155_v32 = vpop.eup %8154 }
 0x431   : > { %v658_v33 = vmul.f32 %v8155_v32, %v8147_v16  ;;  %v7860_v16 = vpack.c.bf16 %v8687_v15, %v8682_v14 }
 0x432   : > { %v998_v36 = vpop.permute.xlu1 %997 }
 0x433   : > { %7320 = vmatmul.mubr.msk.f32.vlgmr.msra.gmra.mrb[0].mxu1 %vm570_vm2, %v658_v33  ;;  %v8706_v33 = vld [vmem:[%s9845_s1] sm:$0xf] }
 0x434   : > { %7329 = vmatprep.mubr.msk.f32.mxu1 %vm8358_vm1, %v8359_v11  ;;  %v8157_v35 = vpop.eup %8156 }
 0x435   : > { %v827_v38 = vmul.f32 %v8157_v35, %v8149_v20 }
 0x436   : > { %v1163_v34 = vpop.xlane.xlu0 %1162  ;;  %v1167_v40 = vpop.permute.xlu1 %1166 }
 0x437   : > { %8160 = vrcp.f32 %v1163_v34 }
 0x439   : > { %v8159_v29 = vpop.eup %8158 }
 0x43a   : > { %v829_v37 = vpop.permute.xlu0 %828  ;;  %v996_v39 = vmul.f32 %v8159_v29, %v8151_v23  ;;  %v8101_v48 = vpop.permute.xlu1 %8100 }
 0x43b   : > { %7328 = vmatpush3.msra.mxu1 %v829_v37  ;;  %v8103_v49 = vunpack.i.h.bf16 %v8101_v48  ;;  %v8102_v50 = vunpack.i.l.bf16 %v8101_v48 }
 0x43c   : > { %7330 = vmatmul.mubr.msk.f32.vlgmr.msra.gmra.mrb[2].mxu1 %vm570_vm2, %v827_v38  ;;  %7337 = vmatprep.subr.mxu1 %v8359_v11 }
 0x43d   : > { %7338 = vmatpush3.msra.mxu1 %v998_v36  ;;  %7339 = vmatprep.mubr.msk.f32.mxu1 %vm8358_vm1, %v8359_v11  ;;  %v7854_v52 = vpack.c.bf16 %v8103_v49, %v8102_v50  ;;  %v8716_v36 = vld [vmem:[%s9768_s5 + $0x1] ss:$0 sm:$0xff] }
 0x43e   : > { %7347 = vmatprep.subr.mxu1 %v8359_v11  ;;  %v8096_v44 = vpop.permute.xlu0 %8095 }
 0x43f   : > { %v8098_v45 = vunpack.i.h.bf16 %v8096_v44  ;;  %v8097_v46 = vunpack.i.l.bf16 %v8096_v44 }
 0x440   : > { %7340 = vmatmul.mubr.msk.f32.vlgmr.msra.gmra.mrb[4].mxu1 %vm570_vm2, %v996_v39 }
 0x441   : > { %v8161_v41 = vpop.eup %8160  ;;  %7348 = vmatpush3.msra.mxu1 %v1167_v40  ;;  %7349 = vmatprep.mubr.msk.f32.mxu1 %vm8358_vm1, %v8359_v11  ;;  %v7851_v47 = vpack.c.bf16 %v8098_v45, %v8097_v46 }
 0x442   : > { %v1165_v42 = vmul.f32 %v8161_v41, %v8153_v25  ;;  %7385 = vmatprep.subr.mxu1 %v8359_v11 }
 0x443   : > { %7852 = vmatpush3.bf16.msra.mxu0 %v7851_v47 }
 0x444   : > { %7350 = vmatmul.mubr.msk.f32.vlgmr.msra.gmra.mrb[6].mxu1 %vm570_vm2, %v1165_v42  ;;  %7853 = vmatprep.subr.bf16.mxu0 %v8357_v7 }
 0x445   : > { %7387 = vmatprep.mubr.msk.f32.mxu1 %vm8358_vm1, %v8359_v11 }
 0x447   : > { %7855 = vmatpush3.bf16.msra.mxu0 %v7854_v52 }
 0x448   : > { %7856 = vmatprep.subr.bf16.mxu0 %v8357_v7 }
 0x506   : > { %v731_v51 = vpop.f32.mrb[0].mxu1 }
 0x507   : > { %v7321_v53 = vpop.f32.mrb[1].mxu1 }
 0x50f   : > { %v900_v4 = vpop.f32.mrb[2].mxu1 }
 0x510   : > { %1243 = vrot.lane.b32.xlu0 %v900_v4, %s9795_s21  ;;  %v7331_v5 = vpop.f32.mrb[3].mxu1  ;;  %s9848_s21 = smov 120  }
 0x513   : > { %v1069_v6 = vpop.f32.mrb[4].mxu1 }
 0x514   : > { %1247 = vrot.lane.b32.xlu1 %v1069_v6, %s9793_s22  ;;  %v7341_v8 = vpop.f32.mrb[5].mxu1  ;;  %s9847_s22 = smov 80  }
 0x517   : > { %v1238_v10 = vpop.f32.mrb[6].mxu1 }
 0x518   : > { %1251 = vrot.lane.b32.xlu0 %v1238_v10, %s9791_s23  ;;  %v7351_v54 = vpop.f32.mrb[7].mxu1  ;;  %1349 = vrot.lane.b32.xlu1 %v8554_v27, %s9797_s20  ;;  %s9850_s20 = smov 112   ;;  %s9851_s23 = smov 104  }
 0x582   : > { %v1244_v55 = vpop.permute.xlu0 %1243 }
 0x583   : > { %v1254_v57 = vsel %vm570_vm2, %v731_v51, %v1244_v55 }
 0x586   : > { %v1248_v56 = vpop.permute.xlu1 %1247 }
 0x587   : > { %v1256_v58 = vsel %vm1255_vm3, %v1254_v57, %v1248_v56 }
 0x58a   : > { %v1252_v59 = vpop.permute.xlu0 %1251  ;;  %v1350_v62 = vpop.permute.xlu1 %1349 }
 0x58b   : > { %v1258_v60 = vsel %vm1257_vm4, %v1256_v58, %v1252_v59 }
 0x58c   : > { %7361 = vmatmul.mubr.msk.f32.vlgmr.msra.gmra.mrb[10].mxu0 %vm457_vm0, %v1258_v60 }
 0x58d   : > { %7371 = vmatprep.mubr.msk.f32.mxu0 %vm8358_vm1, %v8359_v11 }
 0x65f   : > { %v1344_v61 = vpop.f32.mrb[10].mxu0 }
 0x660   : > { %v1348_v27 = vadd.f32 %v1344_v61, %v8500_v0  ;;  %v7362_v63 = vpop.f32.mrb[11].mxu0  ;;  %v8674_v0 = vld [vmem:[%s9767_s4 + $0x28] sm:$0xff] }
 0x661   : > { %v7857_v13 = vpack.c.bf16 %v8674_v0, %v8669_v12 }
 0x662   : > { %v8659_v1 = vadd.f32 %v1350_v62, %v1348_v27 }
 0x663   : > { %7858 = vmatpush3.bf16.msra.mxu0 %v7857_v13 }
 0x664   : > { %v1364_v2 = vsel %vm457_vm0, %v8659_v1, 0.0  ;;  %v1368_v3 = vmul.f32 %v8659_v1, %v8659_v1  ;;  %7859 = vmatprep.subr.bf16.mxu0 %v8357_v7 }
 0x665   : > { %1365 = vadd.xlane.f32.xlu0 %v1364_v2 }
 0x666   : > { %v1369_v9 = vsel %vm457_vm0, %v1368_v3, 0.0 }
 0x667   : > { %1370 = vadd.xlane.f32.xlu1 %v1369_v9  ;;  %7861 = vmatpush3.bf16.msra.mxu0 %v7860_v16 }
 0x668   : > { %7862 = vmatprep.subr.bf16.mxu0 %v8357_v7 }
 0x6f2   : > { %v1366_v17 = vpop.xlane.xlu0 %1365 }
 0x6f3   : > { %v1367_v18 = vmul.f32 0.03125, %v1366_v17 }
 0x6f4   : > { %v1371_v19 = vpop.xlane.xlu1 %1370 }
 0x6f5   : > { %v1373_v20 = vmul.f32 %v1367_v18, %v1367_v18  ;;  %v1372_v21 = vmul.f32 0.03125, %v1371_v19  ;;  %v1375_v24 = vsub.f32 %v8659_v1, %v1367_v18 }
 0x6f7   : > { %v1374_v22 = vsub.f32 %v1372_v21, %v1373_v20 }
 0x6f9   : > { %v1376_v23 = vadd.f32 1e-05, %v1374_v22 }
 0x6fb   : > { %8162 = vrsqrt.f32 %v1376_v23 }
 0x705   : > { %v8163_v25 = vpop.eup %8162 }
 0x706   : > { %v1378_v28 = vmul.f32 %v8163_v25, %v1375_v24 }
 0x708   : > { %v1385_v31 = vmul.f32 %v6863_v26, %v1378_v28 }
 0x70a   : > { %v1392_v32 = vadd.f32 %v6864_v30, %v1385_v31 }
 0x70c   : > { %7372 = vmatmul.mubr.msk.f32.vlgmr.msra.gmra.mrb[12].mxu0 %vm457_vm0, %v1392_v32 }
 0x70d   : > { %7864 = vmatpush3.bf16.msra.mxu0 %v7857_v13  ;;  %7382 = vmatprep.mubr.msk.f32.mxu0 %vm8358_vm1, %v8359_v11 }
 0x70e   : > { %7865 = vmatprep.subr.bf16.mxu0 %v8357_v7 }
 0x711   : > { %7867 = vmatpush3.bf16.msra.mxu0 %v7860_v16 }
 0x712   : > { %7395 = vmatprep.subr.mxu0 %v8359_v11 }
 0x714   : > { %7383 = vmatmul.mubr.msk.f32.vlgmr.msra.gmra.mrb[14].mxu0 %vm457_vm0, %v8706_v33 }
 0x715   : > { %7397 = vmatprep.mubr.msk.f32.mxu0 %vm8358_vm1, %v8359_v11 }
 0x7df   : > { %v1468_v34 = vpop.f32.mrb[12].mxu0 }
 0x7e0   : > { %v7373_v35 = vpop.f32.mrb[13].mxu0  ;;  %v1469_v39 = vadd.f32 %v8716_v36, %v1468_v34 }
 0x7e7   : > { %v1541_v37 = vpop.f32.mrb[14].mxu0 }
 0x7e8   : > { %v8719_v38 = vadd.f32 %v8716_v36, %v1541_v37  ;;  %v7384_v29 = vpop.f32.mrb[15].mxu0 }
 0x7ea   : > { %1716 = vrot.lane.b32.xlu1 %v8719_v38, %s9805_s30  ;;  %1546 = vrot.lane.b32.xlu0 %v8719_v38, %s9846_s15  ;;  %s9853_s30 = smov 64  }
 0x7ee   : > { %1883 = vrot.lane.b32.xlu1 %v8719_v38, %s9847_s22  ;;  %1714 = vrot.lane.b32.xlu0 %v1469_v39, %s9848_s21 }
 0x7f2   : > { %2050 = vrot.lane.b32.xlu1 %v8719_v38, %s9849_s16  ;;  %1881 = vrot.lane.b32.xlu0 %v1469_v39, %s9850_s20 }
 0x7f6   : > { %2048 = vrot.lane.b32.xlu0 %v1469_v39, %s9851_s23 }
 0x85c   : > { %v1717_v40 = vpop.permute.xlu1 %1716  ;;  %v1547_v41 = vpop.permute.xlu0 %1546 }
 0x85d   : > { %7386 = vmatpush3.xpose.msk.msra.mxu1 %vm570_vm2, %v1547_v41  ;;  %7396 = vmatpush3.xpose.msk.msra.mxu0 %vm570_vm2, %v1717_v40 }
 0x85e   : > { %7405 = vmatprep.subr.mxu0 %v8359_v11  ;;  %7390 = vmatprep.subr.mxu1 %v8359_v11 }
 0x860   : > { %v1884_v42 = vpop.permute.xlu1 %1883  ;;  %7388 = vmatmul.mubr.msk.f32.vlgmr.msra.gmra.mrb[8].mxu1 %vm570_vm2, %v1469_v39  ;;  %v1715_v43 = vpop.permute.xlu0 %1714 }
 0x861   : > { %7398 = vmatmul.mubr.msk.f32.vlgmr.msra.gmra.mrb[16].mxu0 %vm570_vm2, %v1715_v43  ;;  %7392 = vmatprep.mubr.msk.f32.mxu1 %vm8358_vm1, %v8359_v11 }
 0x862   : > { %7406 = vmatpush3.xpose.msk.msra.mxu0 %vm570_vm2, %v1884_v42  ;;  %7407 = vmatprep.mubr.msk.f32.mxu0 %vm8358_vm1, %v8359_v11 }
 0x863   : > { %7415 = vmatprep.subr.mxu0 %v8359_v11 }
 0x864   : > { %v2051_v44 = vpop.permute.xlu1 %2050  ;;  %v1882_v45 = vpop.permute.xlu0 %1881 }
 0x865   : > { %7408 = vmatmul.mubr.msk.f32.vlgmr.msra.gmra.mrb[18].mxu0 %vm570_vm2, %v1882_v45  ;;  %v8109_v45 = vpack.i.bf16 %v8687_v15, %v8682_v14 }
 0x866   : > { %7416 = vmatpush3.xpose.msk.msra.mxu0 %vm570_vm2, %v2051_v44  ;;  %7417 = vmatprep.mubr.msk.f32.mxu0 %vm8358_vm1, %v8359_v11  ;;  %v8104_v44 = vpack.i.bf16 %v8674_v0, %v8669_v12 }
 0x867   : > { %7868 = vmatprep.subr.bf16.mxu0 %v8357_v7 }
 0x868   : > { %v2049_v46 = vpop.permute.xlu0 %2048 }
 0x869   : > { %7418 = vmatmul.mubr.msk.f32.vlgmr.msra.gmra.mrb[20].mxu0 %vm570_vm2, %v2049_v46 }
 0x86a   : > { %7433 = vmatprep.mubr.msk.f32.mxu0 %vm8358_vm1, %v8359_v11 }
 0x933   : > { %v1619_v47 = vpop.f32.mrb[8].mxu1 }
 0x934   : > { %v1623_v48 = vmul.f32 0.35355338, %v1619_v47  ;;  %v7389_v49 = vpop.f32.mrb[9].mxu1  ;;  %v1788_v50 = vpop.f32.mrb[16].mxu0 }
 0x935   : > { %v1792_v51 = vmul.f32 0.35355338, %v1788_v50  ;;  %v7399_v52 = vpop.f32.mrb[17].mxu0 }
 0x936   : > { %v1625_v53 = vsel %vm1624_vm5, %v1623_v48, -inf }
 0x937   : > { %1626 = vmax.xlane.f32.xlu1 %v1625_v53  ;;  %v1793_v4 = vsel %vm1624_vm5, %v1792_v51, -inf }
 0x938   : > { %1794 = vmax.xlane.f32.xlu0 %v1793_v4  ;;  %v1955_v5 = vpop.f32.mrb[18].mxu0 }
 0x939   : > { %v1959_v6 = vmul.f32 0.35355338, %v1955_v5  ;;  %v7409_v8 = vpop.f32.mrb[19].mxu0 }
 0x93b   : > { %v1960_v10 = vsel %vm1624_vm5, %v1959_v6, -inf }
 0x93c   : > { %1961 = vmax.xlane.f32.xlu0 %v1960_v10  ;;  %v2122_v54 = vpop.f32.mrb[20].mxu0 }
 0x93d   : > { %v2126_v55 = vmul.f32 0.35355338, %v2122_v54  ;;  %v7419_v56 = vpop.f32.mrb[21].mxu0 }
 0x93f   : > { %v2127_v57 = vsel %vm1624_vm5, %v2126_v55, -inf }
 0x940   : > { %2128 = vmax.xlane.f32.xlu1 %v2127_v57 }
 0x951   : > { %1804 = vrot.lane.b32.xlu1 %v8719_v38, %s9852_s24 }
 0x9c4   : > { %v1627_v58 = vpop.xlane.xlu1 %1626 }
 0x9c5   : > { %v1628_v59 = vsub.f32 %v1623_v48, %v1627_v58  ;;  %v1795_v60 = vpop.xlane.xlu0 %1794 }
 0x9c6   : > { %v1796_v61 = vsub.f32 %v1792_v51, %v1795_v60 }
 0x9c7   : > { %v1629_v62 = vmul.f32 1.442695, %v1628_v59 }
 0x9c8   : > { %v1797_v27 = vmul.f32 1.442695, %v1796_v61 }
 0x9c9   : > { %8164 = vpow2.f32 %v1629_v62  ;;  %v1962_v20 = vpop.xlane.xlu0 %1961 }
 0x9ca   : > { %8166 = vpow2.f32 %v1797_v27  ;;  %v1963_v21 = vsub.f32 %v1959_v6, %v1962_v20 }
 0x9cc   : > { %v1964_v22 = vmul.f32 1.442695, %v1963_v21 }
 0x9cd   : > { %v2129_v63 = vpop.xlane.xlu1 %2128 }
 0x9ce   : > { %v2130_v2 = vsub.f32 %v2126_v55, %v2129_v63 }
 0x9d0   : > { %v2131_v3 = vmul.f32 1.442695, %v2130_v2 }
 0x9d1   : > { %v1805_v25 = vpop.permute.xlu1 %1804 }
 0x9d2   : > { %8168 = vpow2.f32 %v2131_v3  ;;  %v2357_v3 = vld [vmem:[%s9860_s6] sm:$0xff] }
 0x9d3   : > { %v8165_v9 = vpop.eup %8164  ;;  %8170 = vpow2.f32 %v1964_v22 }
 0x9d4   : > { %v8167_v13 = vpop.eup %8166  ;;  %v1631_v16 = vsel %vm1624_vm5, %v8165_v9, 0.0 }
 0x9d5   : > { %1632 = vadd.xlane.f32.xlu0 %v1631_v16  ;;  %v1799_v17 = vsel %vm1624_vm5, %v8167_v13, 0.0  ;;  %v2360_v16 = vld [vmem:[%s9860_s6 + $0x18] sm:$0xff] }
 0x9d6   : > { %1800 = vadd.xlane.f32.xlu1 %v1799_v17 }
 0x9dc   : > { %v8169_v18 = vpop.eup %8168 }
 0x9dd   : > { %v2133_v19 = vsel %vm1624_vm5, %v8169_v18, 0.0  ;;  %v8171_v23 = vpop.eup %8170 }
 0x9de   : > { %2134 = vadd.xlane.f32.xlu1 %v2133_v19  ;;  %v1966_v24 = vsel %vm1624_vm5, %v8171_v23, 0.0  ;;  %v2451_v19 = vld [vmem:[%s9771_s8 + $0x8] sm:$0xff] }
 0x9eb   : > { %1636 = vrot.lane.b32.xlu0 %v8719_v38, %s9853_s30 }
 0x9ef   : > { %1971 = vrot.lane.b32.xlu1 %v8719_v38, %s9854_s0 }
 0x9f3   : > { %8105 = vrot.lane.b32.xlu1 %v8104_v44, %s9856_s27  ;;  %v2456_v44 = vld [vmem:[%s9771_s8 + $0x30] sm:$0xff] }
 0xa0a   : > { %1967 = vadd.xlane.f32.xlu0 %v1966_v24 }
 0xa20   : > { %2138 = vrot.lane.b32.xlu0 %v8719_v38, %s9855_s17 }
 0xa24   : > { %8110 = vrot.lane.b32.xlu0 %v8109_v45, %s9856_s27  ;;  %v2457_v45 = vld [vmem:[%s9771_s8 + $0x38] sm:$0xff] }
 0xa62   : > { %v1633_v26 = vpop.xlane.xlu0 %1632 }
 0xa63   : > { %8172 = vrcp.f32 %v1633_v26  ;;  %v1801_v28 = vpop.xlane.xlu1 %1800 }
 0xa64   : > { %8174 = vrcp.f32 %v1801_v28 }
 0xa66   : > { %v1637_v30 = vpop.permute.xlu0 %1636 }
 0xa67   : > { %7391 = vmatpush3.msk.msra.mxu1 %vm1641_vm6, %v1637_v30 }
 0xa68   : > { %7400 = vmatprep.subr.mxu1 %v8359_v11 }
 0xa6b   : > { %v2135_v32 = vpop.xlane.xlu1 %2134 }
 0xa6d   : > { %v8173_v31 = vpop.eup %8172 }
 0xa6e   : > { %v1635_v34 = vmul.f32 %v8173_v31, %v8165_v9  ;;  %v8175_v35 = vpop.eup %8174 }
 0xa6f   : > { %v1803_v37 = vmul.f32 %v8175_v35, %v8167_v13  ;;  %v1972_v38 = vpop.permute.xlu1 %1971  ;;  %v2359_v13 = vld [vmem:[%s9860_s6 + $0x10] sm:$0xff]  ;;  %v6888_v35 = vld [vmem:[%s9766_s3 + $0x5] ss:$0 sm:$0xff] }
 0xa70   : > { %7393 = vmatmul.mubr.msk.f32.vlgmr.msra.gmra.mrb[10].mxu1 %vm1624_vm5, %v1635_v34  ;;  %v7878_v17 = vpack.c.bf16 %v2360_v16, %v2359_v13 }
 0xa71   : > { %7401 = vmatpush3.msk.msra.mxu1 %vm1641_vm6, %v1805_v25  ;;  %7402 = vmatprep.mubr.msk.f32.mxu1 %vm8358_vm1, %v8359_v11 }
 0xa72   : > { %7410 = vmatprep.subr.mxu1 %v8359_v11 }
 0xa73   : > { %v8106_v46 = vpop.permute.xlu1 %8105 }
 0xa74   : > { %7403 = vmatmul.mubr.msk.f32.vlgmr.msra.gmra.mrb[12].mxu1 %vm1624_vm5, %v1803_v37  ;;  %v8108_v47 = vunpack.i.h.bf16 %v8106_v46  ;;  %v8107_v48 = vunpack.i.l.bf16 %v8106_v46  ;;  %v7890_v46 = vpack.c.bf16 %v2457_v45, %v2456_v44  ;;  %v6905_v45 = vld [vmem:[%s9844_s2 + $0x20] sm:$0xff] }
 0xa75   : > { %7411 = vmatpush3.msk.msra.mxu1 %vm1641_vm6, %v1972_v38  ;;  %7412 = vmatprep.mubr.msk.f32.mxu1 %vm8358_vm1, %v8359_v11 }
 0xa76   : > { %7420 = vmatprep.subr.mxu1 %v8359_v11  ;;  %v7869_v49 = vpack.c.bf16 %v8108_v47, %v8107_v48  ;;  %v2458_v47 = vld [vmem:[%s9771_s8 + $0x40] sm:$0xff]  ;;  %v2459_v48 = vld [vmem:[%s9771_s8 + $0x48] sm:$0xff] }
 0xa78   : > { %7870 = vmatpush3.bf16.msra.mxu0 %v7869_v49  ;;  %v2460_v49 = vld [vmem:[%s9771_s8 + $0x50] sm:$0xff] }
 0xa79   : > { %7871 = vmatprep.subr.bf16.mxu0 %v8357_v7 }
 0xa97   : > { %v1968_v29 = vpop.xlane.xlu0 %1967 }
 0xa98   : > { %8176 = vrcp.f32 %v1968_v29  ;;  %v2452_v29 = vld [vmem:[%s9771_s8 + $0x10] sm:$0xff] }
 0xa99   : > { %8178 = vrcp.f32 %v2135_v32  ;;  %v6887_v32 = vld [vmem:[%s9766_s3 + $0x4] ss:$0 sm:$0xff] }
 0xa9b   : > { %v2139_v42 = vpop.permute.xlu0 %2138 }
 0xa9f   : > { %v8111_v50 = vpop.permute.xlu0 %8110 }
 0xaa0   : > { %v8113_v51 = vunpack.i.h.bf16 %v8111_v50  ;;  %v8112_v52 = vunpack.i.l.bf16 %v8111_v50  ;;  %v7893_v50 = vpack.c.bf16 %v2459_v48, %v2458_v47 }
 0xaa2   : > { %v8177_v39 = vpop.eup %8176  ;;  %v7872_v53 = vpack.c.bf16 %v8113_v51, %v8112_v52  ;;  %v2461_v51 = vld [vmem:[%s9771_s8 + $0x58] sm:$0xff] }
 0xaa3   : > { %v1970_v40 = vmul.f32 %v8177_v39, %v8171_v23  ;;  %v8179_v41 = vpop.eup %8178  ;;  %v2453_v39 = vld [vmem:[%s9771_s8 + $0x18] sm:$0xff]  ;;  %v7896_v52 = vpack.c.bf16 %v2461_v51, %v2460_v49 }
 0xaa4   : > { %v2137_v43 = vmul.f32 %v8179_v41, %v8169_v18  ;;  %7873 = vmatpush3.bf16.msra.mxu0 %v7872_v53  ;;  %v2450_v18 = vld [vmem:[%s9771_s8] sm:$0xff] }
 0xaa5   : > { %7413 = vmatmul.mubr.msk.f32.vlgmr.msra.gmra.mrb[14].mxu1 %vm1624_vm5, %v1970_v40  ;;  %7880 = vmatprep.subr.bf16.mxu0 %v8357_v7  ;;  %v7881_v20 = vpack.c.bf16 %v2451_v19, %v2450_v18  ;;  %v7884_v40 = vpack.c.bf16 %v2453_v39, %v2452_v29  ;;  %v2454_v41 = vld [vmem:[%s9771_s8 + $0x20] sm:$0xff]  ;;  %v8927_v19 = vld [vmem:[%s9767_s4 + $0x50] sm:$0xff] }
 0xaa6   : > { %7421 = vmatpush3.msk.msra.mxu1 %vm1641_vm6, %v2139_v42  ;;  %7422 = vmatprep.mubr.msk.f32.mxu1 %vm8358_vm1, %v8359_v11  ;;  %v2455_v42 = vld [vmem:[%s9771_s8 + $0x28] sm:$0xff]  ;;  %v2462_v53 = vld [vmem:[%s9771_s8 + $0x60] sm:$0xff] }
 0xaa7   : > { %7874 = vmatprep.subr.bf16.mxu1 %v8357_v7  ;;  %v8951_v39 = vld [vmem:[%s9768_s5 + $0x2] ss:$0 sm:$0xff] }
 0xaa9   : > { %7423 = vmatmul.mubr.msk.f32.vlgmr.msra.gmra.mrb[16].mxu1 %vm1624_vm5, %v2137_v43  ;;  %v7887_v43 = vpack.c.bf16 %v2455_v42, %v2454_v41 }
 0xaaa   : > { %7444 = vmatprep.mubr.msk.f32.mxu1 %vm8358_vm1, %v8359_v11 }
 0xb43   : > { %v1710_v12 = vpop.f32.mrb[10].mxu1 }
 0xb44   : > { %v7394_v0 = vpop.f32.mrb[11].mxu1 }
 0xb47   : > { %v1877_v4 = vpop.f32.mrb[12].mxu1 }
 0xb48   : > { %2216 = vrot.lane.b32.xlu1 %v1877_v4, %s9857_s14  ;;  %v7404_v14 = vpop.f32.mrb[13].mxu1  ;;  %v2464_v4 = vld [vmem:[%s9771_s8 + $0x70] sm:$0xff] }
 0xb49   : > { %v2465_v14 = vld [vmem:[%s9771_s8 + $0x78] sm:$0xff] }
 0xb78   : > { %v2044_v15 = vpop.f32.mrb[14].mxu1 }
 0xb79   : > { %2220 = vrot.lane.b32.xlu0 %v2044_v15, %s9858_s19  ;;  %v7414_v5 = vpop.f32.mrb[15].mxu1  ;;  %v7902_v15 = vpack.c.bf16 %v2465_v14, %v2464_v4 }
 0xb7a   : > { %v6889_v5 = vld [vmem:[%s9770_s7] ss:$0 sm:$0xff] }
 0xb7c   : > { %v2211_v6 = vpop.f32.mrb[16].mxu1 }
 0xb7d   : > { %2224 = vrot.lane.b32.xlu1 %v2211_v6, %s9859_s25  ;;  %v7424_v8 = vpop.f32.mrb[17].mxu1  ;;  %2320 = vrot.lane.b32.xlu0 %v8716_v36, %s9856_s27 }
 0xbba   : > { %v2217_v10 = vpop.permute.xlu1 %2216 }
 0xbbb   : > { %v2227_v55 = vsel %vm570_vm2, %v1710_v12, %v2217_v10  ;;  %v2463_v12 = vld [vmem:[%s9771_s8 + $0x68] sm:$0xff] }
 0xbbc   : > { %v7899_v0 = vpack.c.bf16 %v2463_v12, %v2462_v53 }
 0xbeb   : > { %v2221_v54 = vpop.permute.xlu0 %2220 }
 0xbec   : > { %v2228_v56 = vsel %vm1255_vm3, %v2227_v55, %v2221_v54 }
 0xbef   : > { %v2225_v57 = vpop.permute.xlu1 %2224  ;;  %v2321_v60 = vpop.permute.xlu0 %2320 }
 0xbf0   : > { %v2229_v58 = vsel %vm1257_vm4, %v2228_v56, %v2225_v57 }
 0xbf1   : > { %7434 = vmatmul.mubr.msk.f32.vlgmr.msra.gmra.mrb[22].mxu0 %vm457_vm0, %v2229_v58 }
 0xbf2   : > { %7479 = vmatprep.mubr.msk.f32.mxu0 %vm8358_vm1, %v8359_v11  ;;  %7882 = vmatpush3.bf16.msra.mxu0 %v7881_v20  ;;  %v8932_v20 = vld [vmem:[%s9767_s4 + $0x58] sm:$0xff] }
 0xbf3   : > { %7883 = vmatprep.subr.bf16.mxu0 %v8357_v7 }
 0xbf6   : > { %7885 = vmatpush3.bf16.msra.mxu0 %v7884_v40 }
 0xbf7   : > { %7886 = vmatprep.subr.bf16.mxu0 %v8357_v7 }
 0xbfa   : > { %7888 = vmatpush3.bf16.msra.mxu0 %v7887_v43 }
 0xbfb   : > { %7889 = vmatprep.subr.bf16.mxu0 %v8357_v7 }
 0xbfe   : > { %7891 = vmatpush3.bf16.msra.mxu0 %v7890_v46 }
 0xbff   : > { %7892 = vmatprep.subr.bf16.mxu0 %v8357_v7 }
 0xc02   : > { %7894 = vmatpush3.bf16.msra.mxu0 %v7893_v50 }
 0xc03   : > { %7895 = vmatprep.subr.bf16.mxu0 %v8357_v7 }
 0xc06   : > { %7897 = vmatpush3.bf16.msra.mxu0 %v7896_v52 }
 0xc07   : > { %7898 = vmatprep.subr.bf16.mxu0 %v8357_v7 }
 0xc0a   : > { %7900 = vmatpush3.bf16.msra.mxu0 %v7899_v0 }
 0xc0b   : > { %7901 = vmatprep.subr.bf16.mxu0 %v8357_v7 }
 0xc0e   : > { %7903 = vmatpush3.bf16.msra.mxu0 %v7902_v15 }
 0xc0f   : > { %7523 = vmatprep.subr.mxu0 %v8359_v11 }
 0xcc4   : > { %v2315_v59 = vpop.f32.mrb[22].mxu0 }
 0xcc5   : > { %v2319_v61 = vadd.f32 %v2315_v59, %v8659_v1  ;;  %v7435_v62 = vpop.f32.mrb[23].mxu0  ;;  %v2358_v1 = vld [vmem:[%s9860_s6 + $0x8] sm:$0xff]  ;;  %s9864_s6 = sld [smem:[#allocation18_spill]] }
 0xcc6   : > { %v7875_v9 = vpack.c.bf16 %v2358_v1, %v2357_v3 }
 0xcc7   : > { %v8809_v36 = vadd.f32 %v2321_v60, %v2319_v61 }
 0xcc8   : > { %7876 = vmatpush3.bf16.msra.mxu1 %v7875_v9 }
 0xcc9   : > { %v2328_v27 = vsel %vm457_vm0, %v8809_v36, 0.0  ;;  %v2332_v63 = vmul.f32 %v8809_v36, %v8809_v36  ;;  %7877 = vmatprep.subr.bf16.mxu1 %v8357_v7 }
 0xcca   : > { %2329 = vadd.xlane.f32.xlu1 %v2328_v27  ;;  %v6891_v27 = vld [vmem:[%s9772_s9] ss:$0 sm:$0xff] }
 0xccb   : > { %v2333_v2 = vsel %vm457_vm0, %v2332_v63, 0.0 }
 0xccc   : > { %2334 = vadd.xlane.f32.xlu0 %v2333_v2  ;;  %7879 = vmatpush3.bf16.msra.mxu1 %v7878_v17  ;;  %v8915_v17 = vld [vmem:[%s9767_s4 + $0x40] sm:$0xff] }
 0xccd   : > { %7904 = vmatprep.subr.bf16.mxu1 %v8357_v7 }
 0xd57   : > { %v2330_v21 = vpop.xlane.xlu1 %2329 }
 0xd58   : > { %v2331_v22 = vmul.f32 0.03125, %v2330_v21  ;;  %v7908_v21 = vpack.c.bf16 %v8932_v20, %v8927_v19 }
 0xd59   : > { %v2335_v23 = vpop.xlane.xlu0 %2334 }
 0xd5a   : > { %v2337_v24 = vmul.f32 %v2331_v22, %v2331_v22  ;;  %v2336_v25 = vmul.f32 0.03125, %v2335_v23  ;;  %v2339_v30 = vsub.f32 %v8809_v36, %v2331_v22 }
 0xd5c   : > { %v2338_v26 = vsub.f32 %v2336_v25, %v2337_v24 }
 0xd5e   : > { %v2340_v28 = vadd.f32 1e-05, %v2338_v26 }
 0xd60   : > { %8180 = vrsqrt.f32 %v2340_v28 }
 0xd6a   : > { %v8181_v31 = vpop.eup %8180 }
 0xd6b   : > { %v2342_v34 = vmul.f32 %v8181_v31, %v2339_v30 }
 0xd6d   : > { %v2349_v37 = vmul.f32 %v6887_v32, %v2342_v34  ;;  %v6899_v34 = vld [vmem:[%s9766_s3 + $0x6] ss:$0 sm:$0xff] }
 0xd6f   : > { %v2356_v38 = vadd.f32 %v6888_v35, %v2349_v37  ;;  %v6900_v37 = vld [vmem:[%s9766_s3 + $0x7] ss:$0 sm:$0xff] }
 0xd71   : > { %7445 = vmatmul.mubr.msk.f32.vlgmr.msra.gmra.mrb[18].mxu1 %vm457_vm0, %v2356_v38 }
 0xd72   : > { %7490 = vmatprep.mubr.msk.f32.mxu1 %vm8358_vm1, %v8359_v11 }
 0xe44   : > { %v2437_v6 = vpop.f32.mrb[18].mxu1 }
 0xe45   : > { %v2438_v8 = vadd.f32 %v6889_v5, %v2437_v6  ;;  %v7446_v10 = vpop.f32.mrb[19].mxu1 }
 0xe47   : > { %v2441_v54 = vmul.f32 %v2438_v8, %v2438_v8 }
 0xe49   : > { %v2442_v55 = vmul.f32 %v2441_v54, %v2438_v8 }
 0xe4b   : > { %v2443_v56 = vmul.f32 0.044715, %v2442_v55  ;;  %v6909_v55 = vld [vmem:[%s9844_s2 + $0x28] sm:$0xff] }
 0xe4d   : > { %v2444_v57 = vadd.f32 %v2443_v56, %v2438_v8 }
 0xe4f   : > { %v2445_v58 = vmul.f32 0.7978846, %v2444_v57 }
 0xe51   : > { %8182 = vtanh.f32 %v2445_v58 }
 0xe5b   : > { %v8183_v59 = vpop.eup %8182 }
 0xe5c   : > { %v2447_v60 = vadd.f32 1.0, %v8183_v59 }
 0xe5e   : > { %v2448_v61 = vmul.f32 0.5, %v2447_v60 }
 0xe60   : > { %v2449_v62 = vmul.f32 %v2448_v61, %v2438_v8 }
 0xe62   : > { %7480 = vmatmul.mubr.f32.vlgmr.msra.gmra.mrb[24].mxu0 %v2449_v62 }
 0xe63   : > { %7525 = vmatprep.mubr.msk.f32.mxu0 %vm8358_vm1, %v8359_v11 }
 0xf35   : > { %v2539_v63 = vpop.f32.mrb[24].mxu0 }
 0xf36   : > { %v2540_v2 = vadd.f32 %v6891_v27, %v2539_v63  ;;  %v7481_v3 = vpop.f32.mrb[25].mxu0 }
 0xf38   : > { %v8905_v1 = vadd.f32 %v2540_v2, %v8809_v36  ;;  %v8920_v36 = vld [vmem:[%s9767_s4 + $0x48] sm:$0xff] }
 0xf39   : > { %v7905_v18 = vpack.c.bf16 %v8920_v36, %v8915_v17 }
 0xf3a   : > { %v2555_v9 = vsel %vm457_vm0, %v8905_v1, 0.0  ;;  %v2559_v13 = vmul.f32 %v8905_v1, %v8905_v1 }
 0xf3b   : > { %2556 = vadd.xlane.f32.xlu0 %v2555_v9  ;;  %7906 = vmatpush3.bf16.msra.mxu1 %v7905_v18 }
 0xf3c   : > { %v2560_v16 = vsel %vm457_vm0, %v2559_v13, 0.0  ;;  %7907 = vmatprep.subr.bf16.mxu1 %v8357_v7 }
 0xf3d   : > { %2561 = vadd.xlane.f32.xlu1 %v2560_v16 }
 0xf3f   : > { %7909 = vmatpush3.bf16.msra.mxu1 %v7908_v21 }
 0xf40   : > { %7493 = vmatprep.subr.mxu1 %v8359_v11 }
 0xfc8   : > { %v2557_v22 = vpop.xlane.xlu0 %2556 }
 0xfc9   : > { %v2558_v23 = vmul.f32 0.03125, %v2557_v22 }
 0xfca   : > { %v2562_v24 = vpop.xlane.xlu1 %2561 }
 0xfcb   : > { %v2564_v25 = vmul.f32 %v2558_v23, %v2558_v23  ;;  %v2563_v26 = vmul.f32 0.03125, %v2562_v24  ;;  %v2566_v31 = vsub.f32 %v8905_v1, %v2558_v23  ;;  %v6917_v24 = vld [vmem:[%s9844_s2 + $0x38] sm:$0xff] }
 0xfcd   : > { %v2565_v28 = vsub.f32 %v2563_v26, %v2564_v25 }
 0xfcf   : > { %v2567_v30 = vadd.f32 1e-05, %v2565_v28 }
 0xfd1   : > { %8184 = vrsqrt.f32 %v2567_v30 }
 0xfdb   : > { %v8185_v32 = vpop.eup %8184 }
 0xfdc   : > { %v2569_v35 = vmul.f32 %v8185_v32, %v2566_v31 }
 0xfde   : > { %v2576_v38 = vmul.f32 %v6899_v34, %v2569_v35  ;;  %v6913_v35 = vld [vmem:[%s9844_s2 + $0x30] sm:$0xff]  ;;  %s6832_s2 = sshll.u32 %s9328_s26, 3 }
 0xfdf   : > { %s9338_s18 = scalar_lea.vmem [#allocation2], %s6832_s2  ;;  %s9868_s2 = sld [smem:[#allocation12_spill]] }
 0xfe0   : > { %v2583_v29 = vadd.f32 %v6900_v37, %v2576_v38 }
 0xfe2   : > { %7491 = vmatmul.mubr.msk.f32.vlgmr.msra.gmra.mrb[20].mxu1 %vm457_vm0, %v2583_v29 }
 0xfe3   : > { %7495 = vmatprep.mubr.msk.f32.mxu1 %vm8358_vm1, %v8359_v11 }
 0xfe5   : > { %s7060_s28 = sshll.u32 %s9868_s2, 7 }
0x10b5   : > { %v2659_v40 = vpop.f32.mrb[20].mxu1 }
0x10b6   : > { %v8954_v41 = vadd.f32 %v8951_v39, %v2659_v40  ;;  %v7492_v42 = vpop.f32.mrb[21].mxu1 }
0x10b8   : > { %2664 = vrot.lane.b32.xlu0 %v8954_v41, %s9846_s15 }
0x10bc   : > { %2833 = vrot.lane.b32.xlu0 %v8954_v41, %s9861_s11 }
0x10c0   : > { %2831 = vrot.lane.b32.xlu0 %v8954_v41, %s9848_s21 }
0x112a   : > { %v2665_v43 = vpop.permute.xlu0 %2664 }
0x112b   : > { %7494 = vmatpush3.xpose.msk.msra.mxu1 %vm570_vm2, %v2665_v43 }
0x112c   : > { %7498 = vmatprep.subr.mxu1 %v8359_v11 }
0x112e   : > { %7496 = vmatmul.mubr.msk.f32.vlgmr.msra.gmra.mrb[22].mxu1 %vm570_vm2, %v8954_v41  ;;  %v2834_v15 = vpop.permute.xlu0 %2833 }
0x112f   : > { %7500 = vmatprep.mubr.msk.f32.mxu1 %vm8358_vm1, %v8359_v11 }
0x1132   : > { %v2832_v6 = vpop.permute.xlu0 %2831 }
0x1201   : > { %v2736_v44 = vpop.f32.mrb[22].mxu1 }
0x1202   : > { %v2740_v46 = vmul.f32 0.35355338, %v2736_v44  ;;  %v7497_v47 = vpop.f32.mrb[23].mxu1 }
0x1204   : > { %v2743_v48 = vadd.f32 %v6905_v45, %v2740_v46 }
0x1206   : > { %v2744_v49 = vsel %vm570_vm2, %v2743_v48, -inf }
0x1207   : > { %2745 = vmax.xlane.f32.xlu1 %v2744_v49 }
0x1294   : > { %v2746_v50 = vpop.xlane.xlu1 %2745 }
0x1295   : > { %v2747_v51 = vsub.f32 %v2743_v48, %v2746_v50 }
0x1297   : > { %v2748_v52 = vmul.f32 1.442695, %v2747_v51 }
0x1299   : > { %8186 = vpow2.f32 %v2748_v52 }
0x12a3   : > { %v8187_v53 = vpop.eup %8186 }
0x12a4   : > { %v2750_v12 = vsel %vm570_vm2, %v8187_v53, 0.0 }
0x12a5   : > { %2751 = vadd.xlane.f32.xlu1 %v2750_v12  ;;  %v8119_v12 = vpack.i.bf16 %v8932_v20, %v8927_v19 }
0x12b6   : > { %2755 = vrot.lane.b32.xlu1 %v8954_v41, %s9853_s30 }
0x1332   : > { %v2752_v0 = vpop.xlane.xlu1 %2751 }
0x1333   : > { %8188 = vrcp.f32 %v2752_v0 }
0x1336   : > { %v2756_v4 = vpop.permute.xlu1 %2755 }
0x1337   : > { %7499 = vmatpush3.msra.mxu1 %v2756_v4 }
0x1338   : > { %7503 = vmatprep.subr.mxu1 %v8359_v11 }
0x133d   : > { %v8189_v14 = vpop.eup %8188 }
0x133e   : > { %v2754_v5 = vmul.f32 %v8189_v14, %v8187_v53  ;;  %v8114_v53 = vpack.i.bf16 %v8920_v36, %v8915_v17 }
0x1340   : > { %7501 = vmatmul.mubr.msk.f32.vlgmr.msra.gmra.mrb[24].mxu1 %vm570_vm2, %v2754_v5 }
0x1341   : > { %7504 = vmatpush3.xpose.msk.msra.mxu1 %vm570_vm2, %v2834_v15  ;;  %7505 = vmatprep.mubr.msk.f32.mxu1 %vm8358_vm1, %v8359_v11 }
0x1342   : > { %7508 = vmatprep.subr.mxu1 %v8359_v11 }
0x1344   : > { %7506 = vmatmul.mubr.msk.f32.vlgmr.msra.gmra.mrb[26].mxu1 %vm570_vm2, %v2832_v6 }
0x1345   : > { %7510 = vmatprep.mubr.msk.f32.mxu1 %vm8358_vm1, %v8359_v11 }
0x1413   : > { %v8984_v8 = vpop.f32.mrb[24].mxu1 }
0x1414   : > { %v7502_v10 = vpop.f32.mrb[25].mxu1 }
0x1417   : > { %v2905_v54 = vpop.f32.mrb[26].mxu1 }
0x1418   : > { %v2909_v56 = vmul.f32 0.35355338, %v2905_v54  ;;  %v7507_v57 = vpop.f32.mrb[27].mxu1 }
0x141a   : > { %v2912_v58 = vadd.f32 %v6909_v55, %v2909_v56 }
0x141c   : > { %v2913_v59 = vsel %vm570_vm2, %v2912_v58, -inf }
0x141d   : > { %2914 = vmax.xlane.f32.xlu1 %v2913_v59 }
0x142e   : > { %3002 = vrot.lane.b32.xlu1 %v8954_v41, %s9847_s22 }
0x1432   : > { %3000 = vrot.lane.b32.xlu1 %v8954_v41, %s9850_s20 }
0x1436   : > { %3169 = vrot.lane.b32.xlu1 %v8954_v41, %s9851_s23 }
0x14aa   : > { %v2915_v60 = vpop.xlane.xlu1 %2914 }
0x14ab   : > { %v2916_v61 = vsub.f32 %v2912_v58, %v2915_v60 }
0x14ad   : > { %v2917_v62 = vmul.f32 1.442695, %v2916_v61 }
0x14ae   : > { %v3003_v2 = vpop.permute.xlu1 %3002 }
0x14af   : > { %8190 = vpow2.f32 %v2917_v62 }
0x14b2   : > { %v3001_v13 = vpop.permute.xlu1 %3000 }
0x14b6   : > { %v3170_v21 = vpop.permute.xlu1 %3169 }
0x14b9   : > { %v8191_v27 = vpop.eup %8190 }
0x14ba   : > { %v2919_v63 = vsel %vm570_vm2, %v8191_v27, 0.0 }
0x14bb   : > { %2920 = vadd.xlane.f32.xlu0 %v2919_v63 }
0x14d1   : > { %2924 = vrot.lane.b32.xlu0 %v8954_v41, %s9852_s24 }
0x14d5   : > { %3171 = vrot.lane.b32.xlu0 %v8954_v41, %s9849_s16 }
0x1548   : > { %v2921_v3 = vpop.xlane.xlu0 %2920 }
0x1549   : > { %8192 = vrcp.f32 %v2921_v3 }
0x154c   : > { %v2925_v9 = vpop.permute.xlu0 %2924 }
0x154d   : > { %7509 = vmatpush3.msra.mxu1 %v2925_v9  ;;  %v9060_v9 = vld [vmem:[%s9767_s4 + $0x60] sm:$0xff] }
0x154e   : > { %7513 = vmatprep.subr.mxu1 %v8359_v11 }
0x1550   : > { %v3172_v16 = vpop.permute.xlu0 %3171 }
0x1551   : > { %7524 = vmatpush3.xpose.msk.msra.mxu0 %vm570_vm2, %v3172_v16  ;;  %v9077_v16 = vld [vmem:[%s9767_s4 + $0x78] sm:$0xff] }
0x1552   : > { %7910 = vmatprep.subr.bf16.mxu0 %v8357_v7 }
0x1553   : > { %v8193_v18 = vpop.eup %8192 }
0x1554   : > { %7526 = vmatmul.mubr.msk.f32.vlgmr.msra.gmra.mrb[26].mxu0 %vm570_vm2, %v3170_v21  ;;  %v2923_v22 = vmul.f32 %v8193_v18, %v8191_v27 }
0x1555   : > { %7541 = vmatprep.mubr.msk.f32.mxu0 %vm8358_vm1, %v8359_v11 }
0x1556   : > { %7511 = vmatmul.mubr.msk.f32.vlgmr.msra.gmra.mrb[28].mxu1 %vm570_vm2, %v2923_v22 }
0x1557   : > { %7514 = vmatpush3.xpose.msk.msra.mxu1 %vm570_vm2, %v3003_v2  ;;  %7515 = vmatprep.mubr.msk.f32.mxu1 %vm8358_vm1, %v8359_v11 }
0x1558   : > { %7518 = vmatprep.subr.mxu1 %v8359_v11 }
0x155a   : > { %7516 = vmatmul.mubr.msk.f32.vlgmr.msra.gmra.mrb[30].mxu1 %vm570_vm2, %v3001_v13 }
0x155b   : > { %7520 = vmatprep.mubr.msk.f32.mxu1 %vm8358_vm1, %v8359_v11 }
0x1627   : > { %v3243_v23 = vpop.f32.mrb[26].mxu0 }
0x1628   : > { %v3247_v25 = vmul.f32 0.35355338, %v3243_v23  ;;  %v7527_v26 = vpop.f32.mrb[27].mxu0 }
0x1629   : > { %v2996_v28 = vpop.f32.mrb[28].mxu1 }
0x162a   : > { %v7512_v30 = vpop.f32.mrb[29].mxu1  ;;  %v3250_v31 = vadd.f32 %v6917_v24, %v3247_v25 }
0x162c   : > { %v3251_v32 = vsel %vm570_vm2, %v3250_v31, -inf }
0x162d   : > { %v3074_v34 = vpop.f32.mrb[30].mxu1  ;;  %3252 = vmax.xlane.f32.xlu1 %v3251_v32 }
0x162e   : > { %v3078_v37 = vmul.f32 0.35355338, %v3074_v34  ;;  %v7517_v38 = vpop.f32.mrb[31].mxu1 }
0x1630   : > { %v3081_v29 = vadd.f32 %v6913_v35, %v3078_v37 }
0x1632   : > { %v3082_v40 = vsel %vm570_vm2, %v3081_v29, -inf }
0x1633   : > { %3083 = vmax.xlane.f32.xlu0 %v3082_v40 }
0x163e   : > { %3093 = vrot.lane.b32.xlu1 %v8954_v41, %s9854_s0 }
0x1642   : > { %8115 = vrot.lane.b32.xlu1 %v8114_v53, %s9856_s27 }
0x1646   : > { %8120 = vrot.lane.b32.xlu1 %v8119_v12, %s9856_s27 }
0x16ba   : > { %v3253_v42 = vpop.xlane.xlu1 %3252 }
0x16bb   : > { %v3254_v43 = vsub.f32 %v3250_v31, %v3253_v42 }
0x16bd   : > { %v3255_v44 = vmul.f32 1.442695, %v3254_v43 }
0x16be   : > { %v3094_v45 = vpop.permute.xlu1 %3093 }
0x16bf   : > { %8194 = vpow2.f32 %v3255_v44  ;;  %7519 = vmatpush3.msra.mxu1 %v3094_v45  ;;  %v6927_v45 = vld [vmem:[%s9766_s3 + $0x8] ss:$0 sm:$0xff] }
0x16c0   : > { %v3084_v46 = vpop.xlane.xlu0 %3083  ;;  %7528 = vmatprep.subr.mxu1 %v8359_v11 }
0x16c1   : > { %v3085_v47 = vsub.f32 %v3081_v29, %v3084_v46 }
0x16c2   : > { %v8116_v36 = vpop.permute.xlu1 %8115 }
0x16c3   : > { %v3086_v48 = vmul.f32 1.442695, %v3085_v47  ;;  %v8118_v19 = vunpack.i.h.bf16 %v8116_v36  ;;  %v8117_v20 = vunpack.i.l.bf16 %v8116_v36  ;;  %v6928_v47 = vld [vmem:[%s9766_s3 + $0x9] ss:$0 sm:$0xff] }
0x16c5   : > { %8196 = vpow2.f32 %v3086_v48  ;;  %v7911_v6 = vpack.c.bf16 %v8118_v19, %v8117_v20 }
0x16c6   : > { %v8121_v10 = vpop.permute.xlu1 %8120 }
0x16c7   : > { %v8123_v54 = vunpack.i.h.bf16 %v8121_v10  ;;  %v8122_v55 = vunpack.i.l.bf16 %v8121_v10  ;;  %7912 = vmatpush3.bf16.msra.mxu0 %v7911_v6 }
0x16c8   : > { %7913 = vmatprep.subr.bf16.mxu0 %v8357_v7 }
0x16c9   : > { %v8195_v49 = vpop.eup %8194  ;;  %v7914_v56 = vpack.c.bf16 %v8123_v54, %v8122_v55 }
0x16ca   : > { %v3257_v50 = vsel %vm570_vm2, %v8195_v49, 0.0 }
0x16cb   : > { %3258 = vadd.xlane.f32.xlu0 %v3257_v50  ;;  %7915 = vmatpush3.bf16.msra.mxu0 %v7914_v56 }
0x16cc   : > { %7922 = vmatprep.subr.bf16.mxu0 %v8357_v7 }
0x16cf   : > { %v8197_v51 = vpop.eup %8196 }
0x16d0   : > { %v3088_v52 = vsel %vm570_vm2, %v8197_v51, 0.0 }
0x16d1   : > { %3089 = vadd.xlane.f32.xlu0 %v3088_v52 }
0x16e7   : > { %3262 = vrot.lane.b32.xlu0 %v8954_v41, %s9855_s17 }
0x16eb   : > { %3339 = vrot.lane.b32.xlu0 %v2996_v28, %s9857_s14 }
0x1758   : > { %v3259_v0 = vpop.xlane.xlu0 %3258 }
0x175e   : > { %v3090_v4 = vpop.xlane.xlu0 %3089 }
0x175f   : > { %8198 = vrcp.f32 %v3090_v4 }
0x1760   : > { %8200 = vrcp.f32 %v3259_v0 }
0x1762   : > { %v3263_v41 = vpop.permute.xlu0 %3262 }
0x1766   : > { %v3340_v61 = vpop.permute.xlu0 %3339 }
0x1767   : > { %v3350_v27 = vsel %vm570_vm2, %v8984_v8, %v3340_v61  ;;  %v9070_v8 = vld [vmem:[%s9767_s4 + $0x70] sm:$0xff] }
0x1768   : > { %v7920_v18 = vpack.c.bf16 %v9077_v16, %v9070_v8 }
0x1769   : > { %v8199_v14 = vpop.eup %8198 }
0x176a   : > { %v3092_v15 = vmul.f32 %v8199_v14, %v8197_v51  ;;  %v8201_v5 = vpop.eup %8200 }
0x176b   : > { %v3261_v17 = vmul.f32 %v8201_v5, %v8195_v49 }
0x176c   : > { %7521 = vmatmul.mubr.msk.f32.vlgmr.msra.gmra.mrb[32].mxu1 %vm570_vm2, %v3092_v15 }
0x176d   : > { %7529 = vmatpush3.msra.mxu1 %v3263_v41  ;;  %7530 = vmatprep.mubr.msk.f32.mxu1 %vm8358_vm1, %v8359_v11 }
0x176e   : > { %7916 = vmatprep.subr.bf16.mxu1 %v8357_v7 }
0x1770   : > { %7531 = vmatmul.mubr.msk.f32.vlgmr.msra.gmra.mrb[34].mxu1 %vm570_vm2, %v3261_v17 }
0x1771   : > { %7552 = vmatprep.mubr.msk.f32.mxu1 %vm8358_vm1, %v8359_v11 }
0x183f   : > { %v3165_v57 = vpop.f32.mrb[32].mxu1 }
0x1840   : > { %3343 = vrot.lane.b32.xlu1 %v3165_v57, %s9858_s19  ;;  %v7522_v58 = vpop.f32.mrb[33].mxu1 }
0x1843   : > { %v3334_v59 = vpop.f32.mrb[34].mxu1 }
0x1844   : > { %3347 = vrot.lane.b32.xlu0 %v3334_v59, %s9859_s25  ;;  %v7532_v60 = vpop.f32.mrb[35].mxu1  ;;  %3443 = vrot.lane.b32.xlu1 %v8951_v39, %s9856_s27  ;;  %v9065_v39 = vld [vmem:[%s9767_s4 + $0x68] sm:$0xff] }
0x1845   : > { %v7917_v13 = vpack.c.bf16 %v9065_v39, %v9060_v9 }
0x1847   : > { %7918 = vmatpush3.bf16.msra.mxu1 %v7917_v13 }
0x1848   : > { %7919 = vmatprep.subr.bf16.mxu1 %v8357_v7 }
0x184b   : > { %7921 = vmatpush3.bf16.msra.mxu1 %v7920_v18 }
0x184c   : > { %7566 = vmatprep.subr.mxu1 %v8359_v11 }
0x18b2   : > { %v3344_v62 = vpop.permute.xlu1 %3343 }
0x18b3   : > { %v3351_v63 = vsel %vm1255_vm3, %v3350_v27, %v3344_v62 }
0x18b6   : > { %v3348_v2 = vpop.permute.xlu0 %3347  ;;  %v3444_v22 = vpop.permute.xlu1 %3443 }
0x18b7   : > { %v3352_v3 = vsel %vm1257_vm4, %v3351_v63, %v3348_v2 }
0x18b8   : > { %7542 = vmatmul.mubr.msk.f32.vlgmr.msra.gmra.mrb[28].mxu0 %vm457_vm0, %v3352_v3 }
0x18b9   : > { %7563 = vmatprep.mubr.msk.f32.mxu0 %vm8358_vm1, %v8359_v11  ;;  %7924 = vmatpush3.bf16.msra.mxu0 %v7917_v13 }
0x18ba   : > { %7925 = vmatprep.subr.bf16.mxu0 %v8357_v7 }
0x18bd   : > { %7927 = vmatpush3.bf16.msra.mxu0 %v7920_v18 }
0x18be   : > { %7576 = vmatprep.subr.mxu0 %v8359_v11 }
0x18c0   : > { %7564 = vmatmul.mubr.msk.f32.vlgmr.msra.gmra.mrb[30].mxu0 %vm457_vm0, %v8706_v33  ;;  %v9100_v33 = vld [vmem:[%s9768_s5 + $0x3] ss:$0 sm:$0xff] }
0x18c1   : > { %7578 = vmatprep.mubr.msk.f32.mxu0 %vm8358_vm1, %v8359_v11 }
0x198b   : > { %v3438_v21 = vpop.f32.mrb[28].mxu0 }
0x198c   : > { %v3442_v23 = vadd.f32 %v3438_v21, %v8905_v1  ;;  %v7543_v24 = vpop.f32.mrb[29].mxu0 }
0x198e   : > { %v9090_v25 = vadd.f32 %v3444_v22, %v3442_v23 }
0x1990   : > { %v3458_v26 = vsel %vm457_vm0, %v9090_v25, 0.0  ;;  %v3462_v28 = vmul.f32 %v9090_v25, %v9090_v25 }
0x1991   : > { %3459 = vadd.xlane.f32.xlu0 %v3458_v26 }
0x1992   : > { %v3463_v30 = vsel %vm457_vm0, %v3462_v28, 0.0 }
0x1993   : > { %3464 = vadd.xlane.f32.xlu1 %v3463_v30  ;;  %v3632_v31 = vpop.f32.mrb[30].mxu0 }
0x1994   : > { %v9103_v1 = vadd.f32 %v9100_v33, %v3632_v31  ;;  %v7565_v32 = vpop.f32.mrb[31].mxu0 }
0x19a4   : > { %3805 = vrot.lane.b32.xlu1 %v9103_v1, %s9861_s11 }
0x19a7   : > { %3637 = vrot.lane.b32.xlu0 %v9103_v1, %s9846_s15 }
0x19a8   : > { %3972 = vrot.lane.b32.xlu1 %v9103_v1, %s9847_s22 }
0x19ac   : > { %4139 = vrot.lane.b32.xlu1 %v9103_v1, %s9849_s16 }
0x1a1e   : > { %v3460_v34 = vpop.xlane.xlu0 %3459 }
0x1a1f   : > { %v3461_v35 = vmul.f32 0.03125, %v3460_v34 }
0x1a20   : > { %v3465_v37 = vpop.xlane.xlu1 %3464 }
0x1a21   : > { %v3467_v38 = vmul.f32 %v3461_v35, %v3461_v35  ;;  %v3466_v29 = vmul.f32 0.03125, %v3465_v37  ;;  %v3469_v43 = vsub.f32 %v9090_v25, %v3461_v35 }
0x1a22   : > { %v3638_v50 = vpop.permute.xlu0 %3637 }
0x1a23   : > { %v3468_v40 = vsub.f32 %v3466_v29, %v3467_v38 }
0x1a24   : > { %v3806_v51 = vpop.permute.xlu1 %3805 }
0x1a25   : > { %v3470_v42 = vadd.f32 1e-05, %v3468_v40  ;;  %7577 = vmatpush3.xpose.msk.msra.mxu0 %vm570_vm2, %v3806_v51 }
0x1a26   : > { %7586 = vmatprep.subr.mxu0 %v8359_v11 }
0x1a27   : > { %8202 = vrsqrt.f32 %v3470_v42 }
0x1a28   : > { %v3973_v0 = vpop.permute.xlu1 %3972 }
0x1a2c   : > { %v4140_v15 = vpop.permute.xlu1 %4139 }
0x1a31   : > { %v8203_v44 = vpop.eup %8202 }
0x1a32   : > { %v3472_v46 = vmul.f32 %v8203_v44, %v3469_v43 }
0x1a34   : > { %v3479_v48 = vmul.f32 %v6927_v45, %v3472_v46 }
0x1a36   : > { %v3486_v49 = vadd.f32 %v6928_v47, %v3479_v48 }
0x1a38   : > { %7553 = vmatmul.mubr.msk.f32.vlgmr.msra.gmra.mrb[36].mxu1 %vm457_vm0, %v3486_v49 }
0x1a39   : > { %7568 = vmatprep.mubr.msk.f32.mxu1 %vm8358_vm1, %v8359_v11  ;;  %7567 = vmatpush3.xpose.msk.msra.mxu1 %vm570_vm2, %v3638_v50 }
0x1a3a   : > { %7571 = vmatprep.subr.mxu1 %v8359_v11 }
0x1b0b   : > { %v3562_v52 = vpop.f32.mrb[36].mxu1 }
0x1b0c   : > { %v3563_v53 = vadd.f32 %v9100_v33, %v3562_v52  ;;  %v7554_v12 = vpop.f32.mrb[37].mxu1 }
0x1b0e   : > { %3803 = vrot.lane.b32.xlu0 %v3563_v53, %s9848_s21  ;;  %7569 = vmatmul.mubr.msk.f32.vlgmr.msra.gmra.mrb[38].mxu1 %vm570_vm2, %v3563_v53 }
0x1b0f   : > { %7573 = vmatprep.mubr.msk.f32.mxu1 %vm8358_vm1, %v8359_v11 }
0x1b12   : > { %3970 = vrot.lane.b32.xlu0 %v3563_v53, %s9850_s20 }
0x1b16   : > { %4137 = vrot.lane.b32.xlu0 %v3563_v53, %s9851_s23 }
0x1b80   : > { %v3804_v4 = vpop.permute.xlu0 %3803 }
0x1b81   : > { %7579 = vmatmul.mubr.msk.f32.vlgmr.msra.gmra.mrb[32].mxu0 %vm570_vm2, %v3804_v4 }
0x1b82   : > { %7587 = vmatpush3.xpose.msk.msra.mxu0 %vm570_vm2, %v3973_v0  ;;  %7588 = vmatprep.mubr.msk.f32.mxu0 %vm8358_vm1, %v8359_v11  ;;  %v8129_v0 = vpack.i.bf16 %v9077_v16, %v9070_v8 }
0x1b83   : > { %7596 = vmatprep.subr.mxu0 %v8359_v11 }
0x1b84   : > { %v3971_v14 = vpop.permute.xlu0 %3970 }
0x1b85   : > { %7589 = vmatmul.mubr.msk.f32.vlgmr.msra.gmra.mrb[34].mxu0 %vm570_vm2, %v3971_v14 }
0x1b86   : > { %7597 = vmatpush3.xpose.msk.msra.mxu0 %vm570_vm2, %v4140_v15  ;;  %7598 = vmatprep.mubr.msk.f32.mxu0 %vm8358_vm1, %v8359_v11 }
0x1b87   : > { %7928 = vmatprep.subr.bf16.mxu0 %v8357_v7 }
0x1b88   : > { %v4138_v5 = vpop.permute.xlu0 %4137 }
0x1b89   : > { %7599 = vmatmul.mubr.msk.f32.vlgmr.msra.gmra.mrb[36].mxu0 %vm570_vm2, %v4138_v5 }
0x1b8a   : > { %7614 = vmatprep.mubr.msk.f32.mxu0 %vm8358_vm1, %v8359_v11 }
0x1be1   : > { %v3710_v41 = vpop.f32.mrb[38].mxu1 }
0x1be2   : > { %v3714_v17 = vmul.f32 0.35355338, %v3710_v41  ;;  %v7570_v36 = vpop.f32.mrb[39].mxu1 }
0x1be4   : > { %v3715_v19 = vsel %vm1624_vm5, %v3714_v17, -inf }
0x1be5   : > { %3716 = vmax.xlane.f32.xlu1 %v3715_v19 }
0x1c54   : > { %v3877_v20 = vpop.f32.mrb[32].mxu0 }
0x1c55   : > { %v3881_v6 = vmul.f32 0.35355338, %v3877_v20  ;;  %v7580_v10 = vpop.f32.mrb[33].mxu0 }
0x1c57   : > { %v3882_v54 = vsel %vm1624_vm5, %v3881_v6, -inf }
0x1c58   : > { %3883 = vmax.xlane.f32.xlu0 %v3882_v54  ;;  %v4044_v55 = vpop.f32.mrb[34].mxu0 }
0x1c59   : > { %v4048_v56 = vmul.f32 0.35355338, %v4044_v55  ;;  %v7590_v57 = vpop.f32.mrb[35].mxu0 }
0x1c5b   : > { %v4049_v58 = vsel %vm1624_vm5, %v4048_v56, -inf }
0x1c5c   : > { %4050 = vmax.xlane.f32.xlu0 %v4049_v58  ;;  %v4211_v59 = vpop.f32.mrb[36].mxu0 }
0x1c5d   : > { %v4215_v60 = vmul.f32 0.35355338, %v4211_v59  ;;  %v7600_v61 = vpop.f32.mrb[37].mxu0 }
0x1c5f   : > { %v4216_v62 = vsel %vm1624_vm5, %v4215_v60, -inf }
0x1c60   : > { %4217 = vmax.xlane.f32.xlu1 %v4216_v62 }
0x1c71   : > { %3893 = vrot.lane.b32.xlu1 %v9103_v1, %s9852_s24 }
0x1c72   : > { %v3717_v27 = vpop.xlane.xlu1 %3716 }
0x1c73   : > { %v3718_v63 = vsub.f32 %v3714_v17, %v3717_v27 }
0x1c75   : > { %v3719_v2 = vmul.f32 1.442695, %v3718_v63 }
0x1c77   : > { %8204 = vpow2.f32 %v3719_v2 }
0x1c81   : > { %v8205_v3 = vpop.eup %8204 }
0x1c82   : > { %v3721_v13 = vsel %vm1624_vm5, %v8205_v3, 0.0 }
0x1c83   : > { %3722 = vadd.xlane.f32.xlu0 %v3721_v13 }
0x1c99   : > { %3726 = vrot.lane.b32.xlu0 %v9103_v1, %s9853_s30 }
0x1ce5   : > { %v3884_v18 = vpop.xlane.xlu0 %3883 }
0x1ce6   : > { %v3885_v21 = vsub.f32 %v3881_v6, %v3884_v18 }
0x1ce8   : > { %v3886_v22 = vmul.f32 1.442695, %v3885_v21 }
0x1ce9   : > { %v4051_v23 = vpop.xlane.xlu0 %4050 }
0x1cea   : > { %8206 = vpow2.f32 %v3886_v22  ;;  %v4052_v24 = vsub.f32 %v4048_v56, %v4051_v23  ;;  %v6953_v22 = vld [vmem:[%s9862_s10 + $0x20] sm:$0xff] }
0x1cec   : > { %v4053_v26 = vmul.f32 1.442695, %v4052_v24  ;;  %v6955_v24 = vld [vmem:[%s9862_s10 + $0x30] sm:$0xff] }
0x1ced   : > { %v4218_v28 = vpop.xlane.xlu1 %4217 }
0x1cee   : > { %8208 = vpow2.f32 %v4053_v26  ;;  %v4219_v30 = vsub.f32 %v4215_v60, %v4218_v28  ;;  %v6956_v26 = vld [vmem:[%s9862_s10 + $0x38] sm:$0xff] }
0x1cef   : > { %v7938_v28 = vpack.c.bf16 %v6956_v26, %v6955_v24  ;;  %v9304_v26 = vld [vmem:[%s9767_s4 + $0x80] sm:$0xff] }
0x1cf0   : > { %v4220_v31 = vmul.f32 1.442695, %v4219_v30  ;;  %v6960_v30 = vld [vmem:[%s9771_s8 + $0x80] sm:$0xff] }
0x1cf1   : > { %v3894_v45 = vpop.permute.xlu1 %3893 }
0x1cf2   : > { %8210 = vpow2.f32 %v4220_v31  ;;  %v6961_v31 = vld [vmem:[%s9771_s8 + $0x88] sm:$0xff] }
0x1cf4   : > { %v8207_v32 = vpop.eup %8206 }
0x1cf5   : > { %v3888_v34 = vsel %vm1624_vm5, %v8207_v32, 0.0 }
0x1cf6   : > { %3889 = vadd.xlane.f32.xlu1 %v3888_v34 }
0x1cf8   : > { %v8209_v35 = vpop.eup %8208 }
0x1cf9   : > { %v4055_v37 = vsel %vm1624_vm5, %v8209_v35, 0.0 }
0x1cfa   : > { %4056 = vadd.xlane.f32.xlu0 %v4055_v37 }
0x1cfc   : > { %v8211_v38 = vpop.eup %8210 }
0x1cfd   : > { %v4222_v29 = vsel %vm1624_vm5, %v8211_v38, 0.0 }
0x1cfe   : > { %4223 = vadd.xlane.f32.xlu1 %v4222_v29 }
0x1d0f   : > { %4060 = vrot.lane.b32.xlu1 %v9103_v1, %s9854_s0 }
0x1d10   : > { %4227 = vrot.lane.b32.xlu0 %v9103_v1, %s9855_s17  ;;  %v3723_v40 = vpop.xlane.xlu0 %3722  ;;  %v8124_v1 = vpack.i.bf16 %v9065_v39, %v9060_v9 }
0x1d11   : > { %8212 = vrcp.f32 %v3723_v40 }
0x1d13   : > { %8125 = vrot.lane.b32.xlu1 %v8124_v1, %s9856_s27 }
0x1d14   : > { %v3727_v42 = vpop.permute.xlu0 %3726  ;;  %8130 = vrot.lane.b32.xlu0 %v8129_v0, %s9856_s27 }
0x1d15   : > { %7572 = vmatpush3.msk.msra.mxu1 %vm1641_vm6, %v3727_v42 }
0x1d16   : > { %7581 = vmatprep.subr.mxu1 %v8359_v11 }
0x1d1b   : > { %v8213_v43 = vpop.eup %8212 }
0x1d1c   : > { %v3725_v44 = vmul.f32 %v8213_v43, %v8205_v3 }
0x1d1e   : > { %7574 = vmatmul.mubr.msk.f32.vlgmr.msra.gmra.mrb[40].mxu1 %vm1624_vm5, %v3725_v44 }
0x1d1f   : > { %7582 = vmatpush3.msk.msra.mxu1 %vm1641_vm6, %v3894_v45  ;;  %7583 = vmatprep.mubr.msk.f32.mxu1 %vm8358_vm1, %v8359_v11  ;;  %v6951_v45 = vld [vmem:[%s9766_s3 + $0xa] ss:$0 sm:$0xff] }
0x1d20   : > { %7591 = vmatprep.subr.mxu1 %v8359_v11 }
0x1d83   : > { %v3890_v46 = vpop.xlane.xlu1 %3889 }
0x1d84   : > { %8214 = vrcp.f32 %v3890_v46  ;;  %v6952_v46 = vld [vmem:[%s9766_s3 + $0xb] ss:$0 sm:$0xff] }
0x1d87   : > { %v4057_v47 = vpop.xlane.xlu0 %4056 }
0x1d88   : > { %8216 = vrcp.f32 %v4057_v47 }
0x1d8b   : > { %v4224_v48 = vpop.xlane.xlu1 %4223  ;;  %v4228_v39 = vpop.permute.xlu0 %4227 }
0x1d8c   : > { %8218 = vrcp.f32 %v4224_v48 }
0x1d8e   : > { %v8215_v49 = vpop.eup %8214 }
0x1d8f   : > { %v3892_v50 = vmul.f32 %v8215_v49, %v8207_v32  ;;  %v4061_v51 = vpop.permute.xlu1 %4060  ;;  %v8131_v36 = vpop.permute.xlu0 %8130  ;;  %v7941_v32 = vpack.c.bf16 %v6961_v31, %v6960_v30  ;;  %v6962_v49 = vld [vmem:[%s9771_s8 + $0x90] sm:$0xff]  ;;  %v9322_v31 = vld [vmem:[%s9767_s4 + $0x98] sm:$0xff] }
0x1d90   : > { %v8133_v19 = vunpack.i.h.bf16 %v8131_v36  ;;  %v8132_v20 = vunpack.i.l.bf16 %v8131_v36  ;;  %v6972_v36 = vld [vmem:[%s9771_s8 + $0xe0] sm:$0xff]  ;;  %v9317_v30 = vld [vmem:[%s9767_s4 + $0x90] sm:$0xff] }
0x1d91   : > { %7584 = vmatmul.mubr.msk.f32.vlgmr.msra.gmra.mrb[42].mxu1 %vm1624_vm5, %v3892_v50  ;;  %v6963_v50 = vld [vmem:[%s9771_s8 + $0x98] sm:$0xff] }
0x1d92   : > { %v8217_v52 = vpop.eup %8216  ;;  %7592 = vmatpush3.msk.msra.mxu1 %vm1641_vm6, %v4061_v51  ;;  %7593 = vmatprep.mubr.msk.f32.mxu1 %vm8358_vm1, %v8359_v11  ;;  %v7932_v6 = vpack.c.bf16 %v8133_v19, %v8132_v20  ;;  %v7944_v51 = vpack.c.bf16 %v6963_v50, %v6962_v49  ;;  %v6973_v19 = vld [vmem:[%s9771_s8 + $0xe8] sm:$0xff]  ;;  %v9349_v49 = vld [vmem:[%s9864_s6] sm:$0xf]  ;;  %v9358_v50 = vld [vmem:[%s9768_s5 + $0x4] ss:$0 sm:$0xff] }
0x1d93   : > { %v4059_v9 = vmul.f32 %v8217_v52, %v8209_v35  ;;  %7601 = vmatprep.subr.mxu1 %v8359_v11  ;;  %v8126_v4 = vpop.permute.xlu1 %8125  ;;  %v6964_v52 = vld [vmem:[%s9771_s8 + $0xa0] sm:$0xff]  ;;  %v7959_v20 = vpack.c.bf16 %v6973_v19, %v6972_v36 }
0x1d94   : > { %v8128_v14 = vunpack.i.h.bf16 %v8126_v4  ;;  %v8127_v15 = vunpack.i.l.bf16 %v8126_v4  ;;  %v6968_v4 = vld [vmem:[%s9771_s8 + $0xc0] sm:$0xff] }
0x1d95   : > { %7594 = vmatmul.mubr.msk.f32.vlgmr.msra.gmra.mrb[44].mxu1 %vm1624_vm5, %v4059_v9  ;;  %v6965_v9 = vld [vmem:[%s9771_s8 + $0xa8] sm:$0xff] }
0x1d96   : > { %v8219_v53 = vpop.eup %8218  ;;  %7602 = vmatpush3.msk.msra.mxu1 %vm1641_vm6, %v4228_v39  ;;  %7603 = vmatprep.mubr.msk.f32.mxu1 %vm8358_vm1, %v8359_v11  ;;  %v7929_v5 = vpack.c.bf16 %v8128_v14, %v8127_v15  ;;  %v7947_v39 = vpack.c.bf16 %v6965_v9, %v6964_v52  ;;  %v6969_v14 = vld [vmem:[%s9771_s8 + $0xc8] sm:$0xff]  ;;  %v6970_v15 = vld [vmem:[%s9771_s8 + $0xd0] sm:$0xff] }
0x1d97   : > { %v4226_v12 = vmul.f32 %v8219_v53, %v8211_v38  ;;  %7934 = vmatprep.subr.bf16.mxu1 %v8357_v7  ;;  %v6966_v53 = vld [vmem:[%s9771_s8 + $0xb0] sm:$0xff] }
0x1d98   : > { %7930 = vmatpush3.bf16.msra.mxu0 %v7929_v5  ;;  %v7953_v5 = vpack.c.bf16 %v6969_v14, %v6968_v4  ;;  %v4757_v14 = vlaneseq }
0x1d99   : > { %7604 = vmatmul.mubr.msk.f32.vlgmr.msra.gmra.mrb[46].mxu1 %vm1624_vm5, %v4226_v12  ;;  %7931 = vmatprep.subr.bf16.mxu0 %v8357_v7  ;;  %v6967_v12 = vld [vmem:[%s9771_s8 + $0xb8] sm:$0xff] }
0x1d9a   : > { %7625 = vmatprep.mubr.msk.f32.mxu1 %vm8358_vm1, %v8359_v11  ;;  %v7950_v0 = vpack.c.bf16 %v6967_v12, %v6966_v53 }
0x1d9c   : > { %7933 = vmatpush3.bf16.msra.mxu0 %v7932_v6  ;;  %v6974_v6 = vld [vmem:[%s9771_s8 + $0xf0] sm:$0xff] }
0x1d9d   : > { %7940 = vmatprep.subr.bf16.mxu0 %v8357_v7 }
0x1df1   : > { %v3799_v41 = vpop.f32.mrb[40].mxu1 }
0x1df2   : > { %v7575_v17 = vpop.f32.mrb[41].mxu1 }
0x1e64   : > { %v3966_v10 = vpop.f32.mrb[42].mxu1 }
0x1e65   : > { %4305 = vrot.lane.b32.xlu1 %v3966_v10, %s9857_s14  ;;  %v7585_v8 = vpop.f32.mrb[43].mxu1  ;;  %v6975_v10 = vld [vmem:[%s9771_s8 + $0xf8] sm:$0xff] }
0x1e66   : > { %v7962_v8 = vpack.c.bf16 %v6975_v10, %v6974_v6 }
0x1e68   : > { %v4133_v16 = vpop.f32.mrb[44].mxu1 }
0x1e69   : > { %4309 = vrot.lane.b32.xlu0 %v4133_v16, %s9858_s19  ;;  %v7595_v54 = vpop.f32.mrb[45].mxu1  ;;  %v6958_v16 = vld [vmem:[%s9770_s7 + $0x1] ss:$0 sm:$0xff] }
0x1e6c   : > { %v4300_v55 = vpop.f32.mrb[46].mxu1 }
0x1e6d   : > { %4313 = vrot.lane.b32.xlu1 %v4300_v55, %s9859_s25  ;;  %v7605_v56 = vpop.f32.mrb[47].mxu1  ;;  %4409 = vrot.lane.b32.xlu0 %v9100_v33, %s9856_s27 }
0x1ed7   : > { %v4306_v57 = vpop.permute.xlu1 %4305 }
0x1ed8   : > { %v4316_v59 = vsel %vm570_vm2, %v3799_v41, %v4306_v57  ;;  %v6971_v41 = vld [vmem:[%s9771_s8 + $0xd8] sm:$0xff] }
0x1ed9   : > { %v7956_v17 = vpack.c.bf16 %v6971_v41, %v6970_v15  ;;  %v9382_v15 = vshrl.u32 %v4757_v14, 7 }
0x1edb   : > { %v4310_v58 = vpop.permute.xlu0 %4309 }
0x1edc   : > { %v4317_v60 = vsel %vm1255_vm3, %v4316_v59, %v4310_v58 }
0x1edf   : > { %v4314_v61 = vpop.permute.xlu1 %4313  ;;  %v4410_v63 = vpop.permute.xlu0 %4409 }
0x1ee0   : > { %v4318_v62 = vsel %vm1257_vm4, %v4317_v60, %v4314_v61 }
0x1ee1   : > { %7615 = vmatmul.mubr.msk.f32.vlgmr.msra.gmra.mrb[38].mxu0 %vm457_vm0, %v4318_v62 }
0x1ee2   : > { %7660 = vmatprep.mubr.msk.f32.mxu0 %vm8358_vm1, %v8359_v11  ;;  %7942 = vmatpush3.bf16.msra.mxu0 %v7941_v32  ;;  %v7968_v32 = vpack.c.bf16 %v9322_v31, %v9317_v30 }
0x1ee3   : > { %7943 = vmatprep.subr.bf16.mxu0 %v8357_v7 }
0x1ee6   : > { %7945 = vmatpush3.bf16.msra.mxu0 %v7944_v51 }
0x1ee7   : > { %7946 = vmatprep.subr.bf16.mxu0 %v8357_v7 }
0x1eea   : > { %7948 = vmatpush3.bf16.msra.mxu0 %v7947_v39 }
0x1eeb   : > { %7949 = vmatprep.subr.bf16.mxu0 %v8357_v7 }
0x1eee   : > { %7951 = vmatpush3.bf16.msra.mxu0 %v7950_v0 }
0x1eef   : > { %7952 = vmatprep.subr.bf16.mxu0 %v8357_v7 }
0x1ef2   : > { %7954 = vmatpush3.bf16.msra.mxu0 %v7953_v5  ;;  %v9384_v5 = vand.u32 127, %v4757_v14 }
0x1ef3   : > { %7955 = vmatprep.subr.bf16.mxu0 %v8357_v7 }
0x1ef4   : > { %vm4761_vm7 = vcmp.eq.s32.totalorder %v9382_v15, %v9384_v5 }
0x1ef6   : > { %7957 = vmatpush3.bf16.msra.mxu0 %v7956_v17 }
0x1ef7   : > { %7958 = vmatprep.subr.bf16.mxu0 %v8357_v7 }
0x1efa   : > { %7960 = vmatpush3.bf16.msra.mxu0 %v7959_v20 }
0x1efb   : > { %7961 = vmatprep.subr.bf16.mxu0 %v8357_v7 }
0x1efe   : > { %7963 = vmatpush3.bf16.msra.mxu0 %v7962_v8 }
0x1eff   : > { %7705 = vmatprep.subr.mxu0 %v8359_v11 }
0x1fb4   : > { %v4404_v27 = vpop.f32.mrb[38].mxu0 }
0x1fb5   : > { %v4408_v2 = vadd.f32 %v4404_v27, %v9090_v25  ;;  %v7616_v3 = vpop.f32.mrb[39].mxu0  ;;  %v6954_v25 = vld [vmem:[%s9862_s10 + $0x28] sm:$0xff] }
0x1fb6   : > { %v7935_v23 = vpack.c.bf16 %v6954_v25, %v6953_v22  ;;  %v6977_v3 = vld [vmem:[%s9772_s9 + $0x1] ss:$0 sm:$0xff] }
0x1fb7   : > { %v9203_v33 = vadd.f32 %v4410_v63, %v4408_v2 }
0x1fb8   : > { %7936 = vmatpush3.bf16.msra.mxu1 %v7935_v23 }
0x1fb9   : > { %v4417_v13 = vsel %vm457_vm0, %v9203_v33, 0.0  ;;  %v4421_v18 = vmul.f32 %v9203_v33, %v9203_v33  ;;  %7937 = vmatprep.subr.bf16.mxu1 %v8357_v7 }
0x1fba   : > { %4418 = vadd.xlane.f32.xlu1 %v4417_v13 }
0x1fbb   : > { %v4422_v21 = vsel %vm457_vm0, %v4421_v18, 0.0 }
0x1fbc   : > { %4423 = vadd.xlane.f32.xlu0 %v4422_v21  ;;  %7939 = vmatpush3.bf16.msra.mxu1 %v7938_v28  ;;  %v9309_v28 = vld [vmem:[%s9767_s4 + $0x88] sm:$0xff] }
0x1fbd   : > { %7964 = vmatprep.subr.bf16.mxu1 %v8357_v7 }
0x2047   : > { %v4419_v34 = vpop.xlane.xlu1 %4418 }
0x2048   : > { %v4420_v35 = vmul.f32 0.03125, %v4419_v34 }
0x2049   : > { %v4424_v37 = vpop.xlane.xlu0 %4423 }
0x204a   : > { %v4426_v38 = vmul.f32 %v4420_v35, %v4420_v35  ;;  %v4425_v29 = vmul.f32 0.03125, %v4424_v37  ;;  %v4428_v43 = vsub.f32 %v9203_v33, %v4420_v35 }
0x204c   : > { %v4427_v40 = vsub.f32 %v4425_v29, %v4426_v38 }
0x204e   : > { %v4429_v42 = vadd.f32 1e-05, %v4427_v40 }
0x2050   : > { %8220 = vrsqrt.f32 %v4429_v42 }
0x205a   : > { %v8221_v44 = vpop.eup %8220 }
0x205b   : > { %v4431_v1 = vmul.f32 %v8221_v44, %v4428_v43 }
0x205d   : > { %v4438_v47 = vmul.f32 %v6951_v45, %v4431_v1  ;;  %v6980_v45 = vld [vmem:[%s9766_s3 + $0xc] ss:$0 sm:$0xff] }
0x205f   : > { %v4445_v48 = vadd.f32 %v6952_v46, %v4438_v47  ;;  %v6981_v46 = vld [vmem:[%s9766_s3 + $0xd] ss:$0 sm:$0xff] }
0x2061   : > { %7626 = vmatmul.mubr.msk.f32.vlgmr.msra.gmra.mrb[48].mxu1 %vm457_vm0, %v4445_v48 }
0x2062   : > { %7671 = vmatprep.mubr.msk.f32.mxu1 %vm8358_vm1, %v8359_v11 }
0x2134   : > { %v4528_v54 = vpop.f32.mrb[48].mxu1 }
0x2135   : > { %v4529_v55 = vadd.f32 %v6958_v16, %v4528_v54  ;;  %v7627_v56 = vpop.f32.mrb[49].mxu1 }
0x2137   : > { %v4532_v57 = vmul.f32 %v4529_v55, %v4529_v55 }
0x2139   : > { %v4533_v58 = vmul.f32 %v4532_v57, %v4529_v55 }
0x213b   : > { %v4534_v59 = vmul.f32 0.044715, %v4533_v58 }
0x213d   : > { %v4535_v60 = vadd.f32 %v4534_v59, %v4529_v55 }
0x213f   : > { %v4536_v61 = vmul.f32 0.7978846, %v4535_v60 }
0x2141   : > { %8222 = vtanh.f32 %v4536_v61 }
0x214b   : > { %v8223_v62 = vpop.eup %8222 }
0x214c   : > { %v4538_v27 = vadd.f32 1.0, %v8223_v62 }
0x214e   : > { %v4539_v63 = vmul.f32 0.5, %v4538_v27 }
0x2150   : > { %v4540_v2 = vmul.f32 %v4539_v63, %v4529_v55 }
0x2152   : > { %7661 = vmatmul.mubr.f32.vlgmr.msra.gmra.mrb[40].mxu0 %v4540_v2 }
0x2153   : > { %7707 = vmatprep.mubr.msk.f32.mxu0 %vm8358_vm1, %v8359_v11 }
0x2225   : > { %v4632_v13 = vpop.f32.mrb[40].mxu0 }
0x2226   : > { %v4633_v18 = vadd.f32 %v6977_v3, %v4632_v13  ;;  %v7662_v21 = vpop.f32.mrb[41].mxu0 }
0x2228   : > { %v4636_v22 = vadd.f32 %v4633_v18, %v9203_v33  ;;  %v7965_v33 = vpack.c.bf16 %v9309_v28, %v9304_v26 }
0x222a   : > { %v4641_v25 = vsel %vm457_vm0, %v4636_v22, 0.0  ;;  %v4645_v23 = vmul.f32 %v4636_v22, %v4636_v22  ;;  %7966 = vmatpush3.bf16.msra.mxu1 %v7965_v33 }
0x222b   : > { %4642 = vadd.xlane.f32.xlu0 %v4641_v25  ;;  %7967 = vmatprep.subr.bf16.mxu1 %v8357_v7 }
0x222c   : > { %v4646_v24 = vsel %vm457_vm0, %v4645_v23, 0.0 }
0x222d   : > { %4647 = vadd.xlane.f32.xlu1 %v4646_v24 }
0x222e   : > { %7969 = vmatpush3.bf16.msra.mxu1 %v7968_v32 }
0x222f   : > { %7970 = vmatprep.subr.bf16.mxu1 %v8357_v7 }
0x22b8   : > { %v4643_v34 = vpop.xlane.xlu0 %4642 }
0x22b9   : > { %v4644_v35 = vmul.f32 0.03125, %v4643_v34 }
0x22ba   : > { %v4648_v37 = vpop.xlane.xlu1 %4647 }
0x22bb   : > { %v4650_v38 = vmul.f32 %v4644_v35, %v4644_v35  ;;  %v4649_v29 = vmul.f32 0.03125, %v4648_v37  ;;  %v4652_v43 = vsub.f32 %v4636_v22, %v4644_v35 }
0x22bd   : > { %v4651_v40 = vsub.f32 %v4649_v29, %v4650_v38 }
0x22bf   : > { %v4653_v42 = vadd.f32 1e-05, %v4651_v40 }
0x22c1   : > { %8224 = vrsqrt.f32 %v4653_v42 }
0x22cb   : > { %v8225_v44 = vpop.eup %8224 }
0x22cc   : > { %v4655_v1 = vmul.f32 %v8225_v44, %v4652_v43 }
0x22ce   : > { %v4662_v47 = vmul.f32 %v6980_v45, %v4655_v1 }
0x22d0   : > { %v4669_v48 = vadd.f32 %v6981_v46, %v4662_v47 }
0x22d2   : > { %7672 = vmatmul.mubr.msk.f32.vlgmr.msra.gmra.mrb[50].mxu1 %vm457_vm0, %v4669_v48  ;;  %4670 = vst.msk [vmem:[%s9338_s18] sm:$0xff] %vm457_vm0, %v4669_v48 }
0x22d3   : > { %7972 = vmatpush3.bf16.msra.mxu1 %v7965_v33  ;;  %7682 = vmatprep.mubr.msk.f32.mxu1 %vm8358_vm1, %v8359_v11 }
0x22d4   : > { %7973 = vmatprep.subr.bf16.mxu1 %v8357_v7 }
0x22d7   : > { %7975 = vmatpush3.bf16.msra.mxu1 %v7968_v32 }
0x22d8   : > { %7685 = vmatprep.subr.mxu1 %v8359_v11 }
0x22da   : > { %7683 = vmatmul.mubr.msk.f32.vlgmr.msra.gmra.mrb[52].mxu1 %vm457_vm0, %v9349_v49 }
0x22db   : > { %7687 = vmatprep.mubr.msk.f32.mxu1 %vm8358_vm1, %v8359_v11 }
0x23a5   : > { %v4753_v51 = vpop.f32.mrb[50].mxu1 }
0x23a6   : > { %v9361_v52 = vadd.f32 %v9358_v50, %v4753_v51  ;;  %v7673_v9 = vpop.f32.mrb[51].mxu1 }
0x23a8   : > { %4912 = vrot.lane.b32.xlu1 %v9361_v52, %s9846_s15 }
0x23ad   : > { %v4828_v39 = vpop.f32.mrb[52].mxu1 }
0x23ae   : > { %v9366_v53 = vadd.f32 %v9358_v50, %v4828_v39  ;;  %v7684_v12 = vpop.f32.mrb[53].mxu1 }
0x23b0   : > { %4833 = vrot.lane.b32.xlu0 %v9366_v53, %s9846_s15 }
0x241a   : > { %v4913_v4 = vpop.permute.xlu1 %4912 }
0x2422   : > { %v4834_v0 = vpop.permute.xlu0 %4833 }
0x2423   : > { %7686 = vmatpush3.xpose.msk.msra.mxu1 %vm570_vm2, %v4834_v0 }
0x2424   : > { %7690 = vmatprep.subr.mxu1 %v8359_v11 }
0x2426   : > { %7688 = vmatmul.mubr.msk.f32.vlgmr.msra.gmra.mrb[54].mxu1 %vm570_vm2, %v9366_v53 }
0x2427   : > { %7691 = vmatpush3.xpose.msk.msra.mxu1 %vm570_vm2, %v4913_v4  ;;  %7692 = vmatprep.mubr.msk.f32.mxu1 %vm8358_vm1, %v8359_v11 }
0x2428   : > { %7695 = vmatprep.subr.mxu1 %v8359_v11 }
0x242a   : > { %7693 = vmatmul.mubr.msk.f32.vlgmr.msra.gmra.mrb[56].mxu1 %vm570_vm2, %v9366_v53 }
0x242b   : > { %7697 = vmatprep.mubr.msk.f32.mxu1 %vm8358_vm1, %v8359_v11 }
0x24f9   : > { %v4905_v41 = vpop.f32.mrb[54].mxu1 }
0x24fa   : > { %v4909_v17 = vmul.f32 0.35355338, %v4905_v41  ;;  %v7689_v36 = vpop.f32.mrb[55].mxu1 }
0x24fc   : > { %v4910_v19 = vsel %vm4761_vm7, %v4909_v17, -3.4028235e+38 }
0x24fd   : > { %v4982_v20 = vpop.f32.mrb[56].mxu1  ;;  %v4988_v6 = vsel %vm4987_vm8, %v4910_v19, -inf }
0x24fe   : > { %v4986_v10 = vmul.f32 0.35355338, %v4982_v20  ;;  %4989 = vmax.xlane.f32.xlu1 %v4988_v6  ;;  %v7694_v8 = vpop.f32.mrb[57].mxu1 }
0x2500   : > { %v4992_v16 = vsel %vm4991_vm9, %v4986_v10, -inf }
0x2501   : > { %4993 = vmax.xlane.f32.xlu0 %v4992_v16 }
0x250f   : > { %5085 = vrot.lane.b32.xlu1 %v9366_v53, %s9853_s30 }
0x2513   : > { %5166 = vrot.lane.b32.xlu1 %v9366_v53, %s9861_s11 }
0x2517   : > { %5164 = vrot.lane.b32.xlu1 %v9366_v53, %s9848_s21  ;;  %5009 = vrot.lane.b32.xlu0 %v9361_v52, %s9853_s30  ;;  %s8375_s21 = smov [#allocation2]  }
0x251b   : > { %5494 = vrot.lane.b32.xlu1 %v9366_v53, %s9850_s20  ;;  %5244 = vrot.lane.b32.xlu0 %v9361_v52, %s9861_s11 }
0x251f   : > { %5826 = vrot.lane.b32.xlu1 %v9366_v53, %s9849_s16  ;;  %5496 = vrot.lane.b32.xlu0 %v9366_v53, %s9847_s22 }
0x2523   : > { %5904 = vrot.lane.b32.xlu1 %v9361_v52, %s9849_s16  ;;  %5574 = vrot.lane.b32.xlu0 %v9361_v52, %s9847_s22  ;;  %s8265_s16 = sshll.u32 %s8375_s21, 4  ;;  %s8266_s16 = int_to_ptr.vmem [resolvable:$false] %s8265_s16 }
0x2524   : > { %s8267_s20 = scalar_lea.vmem %s8266_s16, 256 }
0x2527   : > { %5339 = vrot.lane.b32.xlu1 %v9361_v52, %s9852_s24  ;;  %5824 = vrot.lane.b32.xlu0 %v9366_v53, %s9851_s23  ;;  %s9867_s23 = sld [smem:[#allocation20_spill]] }
0x258b   : > { %v4990_v54 = vpop.xlane.xlu1 %4989 }
0x258e   : > { %v4994_v55 = vpop.xlane.xlu0 %4993 }
0x258f   : > { %v4995_v56 = vmax.f32 %v4990_v54, %v4994_v55  ;;  %v5086_v57 = vpop.permute.xlu1 %5085 }
0x2591   : > { %v4999_v58 = vsub.f32 %v4986_v10, %v4995_v56  ;;  %v4996_v62 = vsub.f32 %v4910_v19, %v4995_v56 }
0x2592   : > { %v5010_v59 = vpop.permute.xlu0 %5009 }
0x2593   : > { %v5000_v60 = vmul.f32 1.442695, %v4999_v58  ;;  %v5167_v61 = vpop.permute.xlu1 %5166  ;;  %7696 = vmatpush3.msra.mxu1 %v5010_v59  ;;  %v4997_v63 = vmul.f32 1.442695, %v4996_v62 }
0x2594   : > { %7706 = vmatpush3.xpose.msk.msra.mxu0 %vm570_vm2, %v5167_v61  ;;  %7700 = vmatprep.subr.mxu1 %v8359_v11 }
0x2595   : > { %7715 = vmatprep.subr.mxu0 %v8359_v11  ;;  %8226 = vpow2.f32 %v5000_v60 }
0x2596   : > { %8228 = vpow2.f32 %v4997_v63  ;;  %v5245_v21 = vpop.permute.xlu0 %5244 }
0x2597   : > { %v5165_v27 = vpop.permute.xlu1 %5164 }
0x2598   : > { %7708 = vmatmul.mubr.msk.f32.vlgmr.msra.gmra.mrb[42].mxu0 %vm570_vm2, %v5165_v27 }
0x2599   : > { %7717 = vmatprep.mubr.msk.f32.mxu0 %vm8358_vm1, %v8359_v11 }
0x259a   : > { %v5497_v23 = vpop.permute.xlu0 %5496 }
0x259b   : > { %v5495_v2 = vpop.permute.xlu1 %5494 }
0x259e   : > { %v5575_v24 = vpop.permute.xlu0 %5574 }
0x259f   : > { %v5827_v3 = vpop.permute.xlu1 %5826  ;;  %v9423_v13 = vpop.eup %8226 }
0x25a0   : > { %7698 = vmatmul.mubr.msk.f32.vlgmr.msra.gmra.mrb[58].mxu1 %vm570_vm2, %v9423_v13  ;;  %v9431_v25 = vpop.eup %8228 }
0x25a1   : > { %7701 = vmatpush3.msk.msra.mxu1 %vm1641_vm6, %v5086_v57  ;;  %7702 = vmatprep.mubr.msk.f32.mxu1 %vm8358_vm1, %v8359_v11 }
0x25a2   : > { %7710 = vmatprep.subr.mxu1 %v8359_v11  ;;  %v5825_v33 = vpop.permute.xlu0 %5824 }
0x25a3   : > { %v5905_v18 = vpop.permute.xlu1 %5904 }
0x25a7   : > { %v5340_v22 = vpop.permute.xlu1 %5339 }
0x25a8   : > { %7716 = vmatpush3.msra.mxu0 %v5340_v22  ;;  %7703 = vmatmul.mubr.msk.f32.vlgmr.msra.gmra.mrb[58].mxu1 %vm1624_vm5, %v9431_v25 }
0x25a9   : > { %7720 = vmatprep.subr.mxu0 %v8359_v11  ;;  %7711 = vmatpush3.xpose.msk.msra.mxu1 %vm570_vm2, %v5245_v21 }
0x25aa   : > { %7712 = vmatprep.mubr.msk.f32.mxu1 %vm8358_vm1, %v8359_v11  ;;  %7725 = vmatprep.subr.mxu1 %v8359_v11 }
0x25ac   : > { %7713 = vmatmul.mubr.msk.f32.vlgmr.msra.gmra.mrb[60].mxu1 %vm570_vm2, %v5165_v27 }
0x25ad   : > { %7726 = vmatpush3.xpose.msk.msra.mxu1 %vm570_vm2, %v5497_v23  ;;  %7727 = vmatprep.mubr.msk.f32.mxu1 %vm8358_vm1, %v8359_v11 }
0x25ae   : > { %7730 = vmatprep.subr.mxu1 %v8359_v11 }
0x25b0   : > { %7728 = vmatmul.mubr.msk.f32.vlgmr.msra.gmra.mrb[62].mxu1 %vm570_vm2, %v5495_v2 }
0x25b1   : > { %7731 = vmatpush3.xpose.msk.msra.mxu1 %vm570_vm2, %v5575_v24  ;;  %7732 = vmatprep.mubr.msk.f32.mxu1 %vm8358_vm1, %v8359_v11 }
0x25b2   : > { %7745 = vmatprep.subr.mxu1 %v8359_v11 }
0x25b4   : > { %7733 = vmatmul.mubr.msk.f32.vlgmr.msra.gmra.mrb[64].mxu1 %vm570_vm2, %v5495_v2 }
0x25b5   : > { %7746 = vmatpush3.xpose.msk.msra.mxu1 %vm570_vm2, %v5827_v3  ;;  %7747 = vmatprep.mubr.msk.f32.mxu1 %vm8358_vm1, %v8359_v11 }
0x25b6   : > { %7750 = vmatprep.subr.mxu1 %v8359_v11 }
0x25b8   : > { %7748 = vmatmul.mubr.msk.f32.vlgmr.msra.gmra.mrb[66].mxu1 %vm570_vm2, %v5825_v33 }
0x25b9   : > { %7751 = vmatpush3.xpose.msk.msra.mxu1 %vm570_vm2, %v5905_v18  ;;  %7752 = vmatprep.mubr.msk.f32.mxu1 %vm8358_vm1, %v8359_v11 }
0x25ba   : > { %7976 = vmatprep.subr.bf16.mxu1 %v8357_v7 }
0x25bc   : > { %7753 = vmatmul.mubr.msk.f32.vlgmr.msra.gmra.mrb[68].mxu1 %vm570_vm2, %v5825_v33 }
0x25bd   : > { %7773 = vmatprep.mubr.msk.f32.mxu1 %vm8358_vm1, %v8359_v11 }
0x266b   : > { %v5238_v32 = vpop.f32.mrb[42].mxu0 }
0x266c   : > { %v5242_v34 = vmul.f32 0.35355338, %v5238_v32  ;;  %v7709_v35 = vpop.f32.mrb[43].mxu0 }
0x266e   : > { %v5243_v37 = vsel %vm4761_vm7, %v5242_v34, -3.4028235e+38 }
0x266f   : > { %v5319_v38 = vsel %vm4987_vm8, %v5243_v37, -inf }
0x2670   : > { %5320 = vmax.xlane.f32.xlu0 %v5319_v38 }
0x267b   : > { %v9467_v29 = vpop.f32.mrb[58].mxu1 }
0x267c   : > { %v7704_v40 = vpop.f32.mrb[59].mxu1 }
0x267f   : > { %v5314_v42 = vpop.f32.mrb[60].mxu1 }
0x2680   : > { %v5318_v43 = vmul.f32 0.35355338, %v5314_v42  ;;  %v7714_v44 = vpop.f32.mrb[61].mxu1 }
0x2682   : > { %v5322_v45 = vsel %vm4991_vm9, %v5318_v43, -inf }
0x2683   : > { %5323 = vmax.xlane.f32.xlu1 %v5322_v45  ;;  %v5568_v1 = vpop.f32.mrb[62].mxu1 }
0x2684   : > { %v5572_v46 = vmul.f32 0.35355338, %v5568_v1  ;;  %v7729_v47 = vpop.f32.mrb[63].mxu1 }
0x2686   : > { %v5573_v48 = vsel %vm4761_vm7, %v5572_v46, -3.4028235e+38 }
0x2687   : > { %v5644_v51 = vpop.f32.mrb[64].mxu1  ;;  %v5649_v9 = vsel %vm4987_vm8, %v5573_v48, -inf }
0x2688   : > { %v5648_v39 = vmul.f32 0.35355338, %v5644_v51  ;;  %v7734_v12 = vpop.f32.mrb[65].mxu1  ;;  %5650 = vmax.xlane.f32.xlu0 %v5649_v9  ;;  %v5005_v51 = vsel %vm4991_vm9, %v9423_v13, 0.0  ;;  %v8134_v9 = vpack.i.bf16 %v9309_v28, %v9304_v26 }
0x268a   : > { %v5652_v0 = vsel %vm4991_vm9, %v5648_v39, -inf }
0x268b   : > { %v5898_v4 = vpop.f32.mrb[66].mxu1 }
0x268c   : > { %v7749_v14 = vpop.f32.mrb[67].mxu1  ;;  %5653 = vmax.xlane.f32.xlu0 %v5652_v0  ;;  %v5902_v36 = vmul.f32 0.35355338, %v5898_v4 }
0x268e   : > { %v5903_v19 = vsel %vm4761_vm7, %v5902_v36, -3.4028235e+38 }
0x268f   : > { %v5974_v41 = vpop.f32.mrb[68].mxu1  ;;  %v5979_v20 = vsel %vm4987_vm8, %v5903_v19, -inf }
0x2690   : > { %v7754_v17 = vpop.f32.mrb[69].mxu1  ;;  %v5978_v6 = vmul.f32 0.35355338, %v5974_v41 }
0x2692   : > { %v5982_v10 = vsel %vm4991_vm9, %v5978_v6, -inf }
0x2694   : > { %5669 = vrot.lane.b32.xlu1 %v9361_v52, %s9854_s0 }
0x26a2   : > { %5415 = vrot.lane.b32.xlu0 %v9366_v53, %s9852_s24 }
0x26b8   : > { %5980 = vmax.xlane.f32.xlu1 %v5979_v20 }
0x26c1   : > { %5983 = vmax.xlane.f32.xlu0 %v5982_v10 }
0x26c9   : > { %5745 = vrot.lane.b32.xlu1 %v9366_v53, %s9854_s0  ;;  %s9691_s0 = scalar_lea.hbm %s9870_s29, %s7060_s28 }
0x26cd   : > { %6075 = vrot.lane.b32.xlu1 %v9366_v53, %s9855_s17 }
0x26d7   : > { %5999 = vrot.lane.b32.xlu0 %v9361_v52, %s9855_s17  ;;  %s9865_s17 = sld [smem:[#allocation21_spill]] }
0x26fd   : > { %v5321_v8 = vpop.xlane.xlu0 %5320 }
0x2710   : > { %v5324_v16 = vpop.xlane.xlu1 %5323 }
0x2711   : > { %v5325_v15 = vmax.f32 %v5321_v8, %v5324_v16 }
0x2713   : > { %v5326_v5 = vsub.f32 %v5243_v37, %v5325_v15  ;;  %v5329_v54 = vsub.f32 %v5318_v43, %v5325_v15 }
0x2714   : > { %v5670_v21 = vpop.permute.xlu1 %5669 }
0x2715   : > { %v5327_v55 = vmul.f32 1.442695, %v5326_v5  ;;  %v5330_v56 = vmul.f32 1.442695, %v5329_v54  ;;  %v5651_v57 = vpop.xlane.xlu0 %5650 }
0x2717   : > { %8230 = vpow2.f32 %v5327_v55 }
0x2718   : > { %8232 = vpow2.f32 %v5330_v56 }
0x2719   : > { %v5654_v58 = vpop.xlane.xlu0 %5653 }
0x271a   : > { %v5655_v59 = vmax.f32 %v5651_v57, %v5654_v58 }
0x271c   : > { %v5656_v60 = vsub.f32 %v5573_v48, %v5655_v59  ;;  %v5659_v61 = vsub.f32 %v5648_v39, %v5655_v59  ;;  %v5002_v48 = vsel %vm4987_vm8, %v9431_v25, 0.0  ;;  %v8139_v39 = vpack.i.bf16 %v9322_v31, %v9317_v30 }
0x271d   : > { %v5416_v2 = vpop.permute.xlu0 %5415 }
0x271e   : > { %v5657_v62 = vmul.f32 1.442695, %v5656_v60  ;;  %v5660_v27 = vmul.f32 1.442695, %v5659_v61 }
0x2720   : > { %8234 = vpow2.f32 %v5657_v62 }
0x2721   : > { %v8231_v53 = vpop.eup %8230  ;;  %8236 = vpow2.f32 %v5660_v27  ;;  %v6262_v27 = vld [vmem:[%s9865_s17 + $0x8] sm:$0xff] }
0x2722   : > { %v8233_v63 = vpop.eup %8232  ;;  %v5332_v52 = vsel %vm4987_vm8, %v8231_v53, 0.0 }
0x2723   : > { %7718 = vmatmul.mubr.msk.f32.vlgmr.msra.gmra.mrb[44].mxu0 %vm570_vm2, %v8233_v63  ;;  %v5335_v3 = vsel %vm4991_vm9, %v8233_v63, 0.0  ;;  %5333 = vadd.xlane.f32.xlu0 %v5332_v52 }
0x2724   : > { %7721 = vmatpush3.msk.msra.mxu0 %vm1641_vm6, %v5416_v2  ;;  %5336 = vadd.xlane.f32.xlu1 %v5335_v3 }
0x2725   : > { %7722 = vmatprep.mubr.msk.f32.mxu0 %vm8358_vm1, %v8359_v11  ;;  %7735 = vmatprep.subr.mxu0 %v8359_v11 }
0x272a   : > { %v8235_v18 = vpop.eup %8234 }
0x272b   : > { %7723 = vmatmul.mubr.msk.f32.vlgmr.msra.gmra.mrb[44].mxu0 %vm1624_vm5, %v8231_v53  ;;  %v5662_v22 = vsel %vm4987_vm8, %v8235_v18, 0.0  ;;  %v8237_v23 = vpop.eup %8236  ;;  %v6263_v53 = vld [vmem:[%s9865_s17 + $0x10] sm:$0xff] }
0x272c   : > { %7736 = vmatpush3.msra.mxu0 %v5670_v21  ;;  %5663 = vadd.xlane.f32.xlu0 %v5662_v22  ;;  %v5665_v24 = vsel %vm4991_vm9, %v8237_v23, 0.0 }
0x272d   : > { %7737 = vmatprep.mubr.msk.f32.mxu0 %vm8358_vm1, %v8359_v11  ;;  %7740 = vmatprep.subr.mxu0 %v8359_v11 }
0x272f   : > { %7738 = vmatmul.mubr.msk.f32.vlgmr.msra.gmra.mrb[46].mxu0 %vm570_vm2, %v8237_v23  ;;  %v7021_v23 = vld [vmem:[%s9865_s17 + $0x20] sm:$0xff] }
0x2730   : > { %5666 = vadd.xlane.f32.xlu0 %v5665_v24  ;;  %7742 = vmatprep.mubr.msk.f32.mxu0 %vm8358_vm1, %v8359_v11  ;;  %v7022_v24 = vld [vmem:[%s9865_s17 + $0x28] sm:$0xff] }
0x2745   : > { %v5981_v33 = vpop.xlane.xlu1 %5980 }
0x2749   : > { %v5746_v32 = vpop.permute.xlu1 %5745 }
0x274a   : > { %7741 = vmatpush3.msk.msra.mxu0 %vm1641_vm6, %v5746_v32 }
0x274b   : > { %7743 = vmatmul.mubr.msk.f32.vlgmr.msra.gmra.mrb[46].mxu0 %vm1624_vm5, %v8235_v18  ;;  %7755 = vmatprep.subr.mxu0 %v8359_v11 }
0x274c   : > { %7757 = vmatprep.mubr.msk.f32.mxu0 %vm8358_vm1, %v8359_v11 }
0x274d   : > { %v6076_v46 = vpop.permute.xlu1 %6075 }
0x274e   : > { %v5984_v34 = vpop.xlane.xlu0 %5983 }
0x274f   : > { %v5985_v35 = vmax.f32 %v5981_v33, %v5984_v34  ;;  %v7989_v34 = vpack.c.bf16 %v7022_v24, %v7021_v23 }
0x2751   : > { %v5986_v37 = vsub.f32 %v5903_v19, %v5985_v35  ;;  %v5989_v38 = vsub.f32 %v5978_v6, %v5985_v35 }
0x2752   : > { %v6000_v40 = vpop.permute.xlu0 %5999 }
0x2753   : > { %v5987_v42 = vmul.f32 1.442695, %v5986_v37  ;;  %v5990_v43 = vmul.f32 1.442695, %v5989_v38  ;;  %7756 = vmatpush3.msra.mxu0 %v6000_v40  ;;  %v7023_v38 = vld [vmem:[%s9865_s17 + $0x30] sm:$0xff]  ;;  %v7024_v40 = vld [vmem:[%s9865_s17 + $0x38] sm:$0xff] }
0x2754   : > { %7760 = vmatprep.subr.mxu0 %v8359_v11 }
0x2755   : > { %8238 = vpow2.f32 %v5987_v42 }
0x2756   : > { %8240 = vpow2.f32 %v5990_v43  ;;  %v7992_v43 = vpack.c.bf16 %v7024_v40, %v7023_v38  ;;  %v7042_v38 = vld [vmem:[%s9771_s8 + $0x110] sm:$0xff]  ;;  %v7043_v40 = vld [vmem:[%s9771_s8 + $0x118] sm:$0xff] }
0x275f   : > { %v8239_v44 = vpop.eup %8238 }
0x2760   : > { %v8241_v45 = vpop.eup %8240  ;;  %v5992_v1 = vsel %vm4987_vm8, %v8239_v44, 0.0 }
0x2761   : > { %7758 = vmatmul.mubr.msk.f32.vlgmr.msra.gmra.mrb[48].mxu0 %vm570_vm2, %v8241_v45  ;;  %v5995_v47 = vsel %vm4991_vm9, %v8241_v45, 0.0  ;;  %5993 = vadd.xlane.f32.xlu1 %v5992_v1 }
0x2762   : > { %7761 = vmatpush3.msk.msra.mxu0 %vm1641_vm6, %v6076_v46  ;;  %5996 = vadd.xlane.f32.xlu0 %v5995_v47  ;;  %v7026_v47 = vld [vmem:[%s9866_s13 + $0x1] ss:$0 sm:$0xff] }
0x2763   : > { %7762 = vmatprep.mubr.msk.f32.mxu0 %vm8358_vm1, %v8359_v11  ;;  %7982 = vmatprep.subr.bf16.mxu0 %v8357_v7 }
0x2765   : > { %5003 = vadd.xlane.f32.xlu1 %v5002_v48 }
0x2766   : > { %5006 = vadd.xlane.f32.xlu0 %v5005_v51 }
0x2769   : > { %7763 = vmatmul.mubr.msk.f32.vlgmr.msra.gmra.mrb[48].mxu0 %vm1624_vm5, %v8239_v44 }
0x276a   : > { %7784 = vmatprep.mubr.msk.f32.mxu0 %vm8358_vm1, %v8359_v11 }
0x2776   : > { %8135 = vrot.lane.b32.xlu1 %v8134_v9, %s9856_s27 }
0x277c   : > { %8140 = vrot.lane.b32.xlu0 %v8139_v39, %s9856_s27  ;;  %v7019_v39 = vld [vmem:[%s9866_s13] ss:$0 sm:$0xff] }
0x27b0   : > { %v5334_v25 = vpop.xlane.xlu0 %5333 }
0x27b1   : > { %v5337_v13 = vpop.xlane.xlu1 %5336 }
0x27b2   : > { %v5338_v41 = vadd.f32 %v5337_v13, %v5334_v25 }
0x27b4   : > { %8242 = vrcp.f32 %v5338_v41 }
0x27b9   : > { %v5664_v12 = vpop.xlane.xlu0 %5663 }
0x27bd   : > { %v5667_v0 = vpop.xlane.xlu0 %5666 }
0x27be   : > { %v8243_v30 = vpop.eup %8242  ;;  %v5668_v5 = vadd.f32 %v5667_v0, %v5664_v12 }
0x27ee   : > { %v5994_v4 = vpop.xlane.xlu1 %5993 }
0x27ef   : > { %v5997_v14 = vpop.xlane.xlu0 %5996 }
0x27f0   : > { %v5998_v62 = vadd.f32 %v5997_v14, %v5994_v4 }
0x27f2   : > { %v5004_v17 = vpop.xlane.xlu1 %5003 }
0x27f3   : > { %v5007_v36 = vpop.xlane.xlu0 %5006 }
0x27f4   : > { %v5008_v19 = vadd.f32 %v5007_v36, %v5004_v17 }
0x27f6   : > { %8244 = vrcp.f32 %v5008_v19  ;;  %v8136_v26 = vpop.permute.xlu1 %8135 }
0x27f7   : > { %v8138_v28 = vunpack.i.h.bf16 %v8136_v26  ;;  %v8137_v20 = vunpack.i.l.bf16 %v8136_v26  ;;  %8246 = vrcp.f32 %v5668_v5  ;;  %v8141_v54 = vpop.permute.xlu0 %8140 }
0x27f8   : > { %v8143_v55 = vunpack.i.h.bf16 %v8141_v54  ;;  %v8142_v56 = vunpack.i.l.bf16 %v8141_v54  ;;  %8248 = vrcp.f32 %v5998_v62 }
0x27f9   : > { %v7977_v6 = vpack.c.bf16 %v8138_v28, %v8137_v20 }
0x27fa   : > { %v7980_v57 = vpack.c.bf16 %v8143_v55, %v8142_v56  ;;  %v7032_v55 = vld [vmem:[%s9766_s3 + $0xf] ss:$0 sm:$0xff]  ;;  %v7031_v56 = vld [vmem:[%s9766_s3 + $0xe] ss:$0 sm:$0xff] }
0x27fb   : > { %7978 = vmatpush3.bf16.msra.mxu1 %v7977_v6 }
0x27fc   : > { %7979 = vmatprep.subr.bf16.mxu1 %v8357_v7 }
0x27fe   : > { %v5488_v31 = vpop.f32.mrb[44].mxu0 }
0x27ff   : > { %v5493_v10 = vmul.f32 %v8243_v30, %v5488_v31  ;;  %v7724_v8 = vpop.f32.mrb[45].mxu0  ;;  %7981 = vmatpush3.bf16.msra.mxu1 %v7980_v57  ;;  %v7033_v57 = vld [vmem:[%s9867_s23 + $0x40] sm:$0xff] }
0x2800   : > { %v8245_v16 = vpop.eup %8244  ;;  %7988 = vmatprep.subr.bf16.mxu1 %v8357_v7 }
0x2801   : > { %6155 = vrot.lane.b32.xlu1 %v5493_v10, %s9857_s14  ;;  %v5163_v15 = vmul.f32 %v8245_v16, %v9467_v29  ;;  %v8247_v58 = vpop.eup %8246  ;;  %v6261_v29 = vld [vmem:[%s9865_s17] sm:$0xff]  ;;  %s6724_s14 = sshll.u32 %s9338_s18, 4  ;;  %s6725_s14 = int_to_ptr.vmem [resolvable:$true] %s6724_s14 }
0x2802   : > { %v8249_v63 = vpop.eup %8248  ;;  %v7983_v2 = vpack.c.bf16 %v6262_v27, %v6261_v29  ;;  %s8261_s22 = scalar_lea.vmem %s6725_s14, 128  ;;  %p8268_p0 = scmp.lt.s32.totalorder %s6725_s14, %s8266_s16 }
0x2803   : > { %p8262_p11 = scmp.ne.s32.totalorder %s6725_s14, %s8261_s22  ;;  %p8269_p1 = scmp.lt.s32.totalorder %s8267_s20, %s8261_s22 }
0x2804   : > { %7984 = vmatpush3.bf16.msra.mxu0 %v7983_v2 }
0x2805   : > { %7985 = vmatprep.subr.bf16.mxu0 %v8357_v7  ;;  %p8263_p12 = pnand %p8262_p11, %p8485_p5  ;;  %p8270_p2 = por %p8269_p1, %p8268_p0 }
0x2807   : > { %p8264_p13 = pneg %p8263_p12 }
0x2809   : > { %p8271_p3 = pnand %p8270_p2, %p8264_p13 }
0x281e   : > { %v5818_v59 = vpop.f32.mrb[46].mxu0 }
0x281f   : > { %v5823_v60 = vmul.f32 %v8247_v58, %v5818_v59  ;;  %v7744_v61 = vpop.f32.mrb[47].mxu0  ;;  %v7034_v58 = vld [vmem:[%s9867_s23 + $0x48] sm:$0xff]  ;;  %v7035_v59 = vld [vmem:[%s9867_s23 + $0x50] sm:$0xff] }
0x2820   : > { %v7036_v61 = vld [vmem:[%s9867_s23 + $0x58] sm:$0xff] }
0x2821   : > { %6159 = vrot.lane.b32.xlu1 %v5823_v60, %s9858_s19  ;;  %v7995_v60 = vpack.c.bf16 %v7034_v58, %v7033_v57  ;;  %v7998_v62 = vpack.c.bf16 %v7036_v61, %v7035_v59 }
0x2825   : > { %6185 = vrot.lane.b32.xlu1 %v9358_v50, %s9856_s27  ;;  %v6264_v50 = vld [vmem:[%s9865_s17 + $0x18] sm:$0xff] }
0x2826   : > { %v7986_v21 = vpack.c.bf16 %v6264_v50, %v6263_v53 }
0x2828   : > { %7987 = vmatpush3.bf16.msra.mxu0 %v7986_v21 }
0x2829   : > { %7994 = vmatprep.subr.bf16.mxu0 %v8357_v7 }
0x283c   : > { %v6148_v52 = vpop.f32.mrb[48].mxu0 }
0x283d   : > { %v6153_v3 = vmul.f32 %v8249_v63, %v6148_v52  ;;  %v7764_v18 = vpop.f32.mrb[49].mxu0 }
0x283e   : > { %v7041_v18 = vld [vmem:[%s9771_s8 + $0x108] sm:$0xff] }
0x283f   : > { %6163 = vrot.lane.b32.xlu0 %v6153_v3, %s9859_s25  ;;  %v7040_v3 = vld [vmem:[%s9771_s8 + $0x100] sm:$0xff] }
0x2840   : > { %v8001_v21 = vpack.c.bf16 %v7041_v18, %v7040_v3 }
0x2873   : > { %v6156_v22 = vpop.permute.xlu1 %6155 }
0x2874   : > { %v6166_v32 = vsel %vm570_vm2, %v5163_v15, %v6156_v22 }
0x2893   : > { %v6160_v33 = vpop.permute.xlu1 %6159 }
0x2894   : > { %v6167_v35 = vsel %vm1255_vm3, %v6166_v32, %v6160_v33 }
0x2897   : > { %v6186_v44 = vpop.permute.xlu1 %6185 }
0x28b1   : > { %v6164_v37 = vpop.permute.xlu0 %6163 }
0x28b2   : > { %v6168_v42 = vsel %vm1257_vm4, %v6167_v35, %v6164_v37 }
0x28b3   : > { %7774 = vmatmul.mubr.msk.f32.vlgmr.msra.gmra.mrb[70].mxu1 %vm457_vm0, %v6168_v42  ;;  %v8004_v42 = vpack.c.bf16 %v7043_v40, %v7042_v38 }
0x28b4   : > { %7990 = vmatpush3.bf16.msra.mxu1 %v7989_v34  ;;  %7795 = vmatprep.mubr.msk.f32.mxu1 %vm8358_vm1, %v8359_v11 }
0x28b5   : > { %7991 = vmatprep.subr.bf16.mxu1 %v8357_v7 }
0x28b8   : > { %7993 = vmatpush3.bf16.msra.mxu1 %v7992_v43  ;;  %v7044_v43 = vld [vmem:[%s9771_s8 + $0x120] sm:$0xff] }
0x28b9   : > { %8000 = vmatprep.subr.bf16.mxu1 %v8357_v7 }
0x28bb   : > { %7796 = vmatmul.mubr.msk.f32.vlgmr.msra.gmra.mrb[72].mxu1 %vm457_vm0, %v9349_v49 }
0x28bc   : > { %7841 = vmatprep.mubr.msk.f32.mxu1 %vm8358_vm1, %v8359_v11  ;;  %8002 = vmatpush3.bf16.msra.mxu1 %v8001_v21 }
0x28bd   : > { %8003 = vmatprep.subr.bf16.mxu1 %v8357_v7 }
0x28c0   : > { %8005 = vmatpush3.bf16.msra.mxu1 %v8004_v42 }
0x28c1   : > { %8006 = vmatprep.subr.bf16.mxu1 %v8357_v7 }
0x2986   : > { %v6257_v45 = vpop.f32.mrb[70].mxu1 }
0x2987   : > { %v6258_v1 = vadd.f32 %v6257_v45, %v6186_v44  ;;  %v7775_v46 = vpop.f32.mrb[71].mxu1  ;;  %v7045_v44 = vld [vmem:[%s9771_s8 + $0x128] sm:$0xff] }
0x2988   : > { %v8007_v45 = vpack.c.bf16 %v7045_v44, %v7044_v43  ;;  %v7047_v46 = vld [vmem:[%s9771_s8 + $0x138] sm:$0xff] }
0x2989   : > { %7785 = vmatmul.mubr.msk.f32.vlgmr.msra.gmra.mrb[50].mxu0 %vm457_vm0, %v6258_v1  ;;  %v7046_v1 = vld [vmem:[%s9771_s8 + $0x130] sm:$0xff] }
0x298a   : > { %7806 = vmatprep.mubr.msk.f32.mxu0 %vm8358_vm1, %v8359_v11  ;;  %7996 = vmatpush3.bf16.msra.mxu0 %v7995_v60 }
0x298b   : > { %7997 = vmatprep.subr.bf16.mxu0 %v8357_v7  ;;  %8008 = vmatpush3.bf16.msra.mxu1 %v8007_v45 }
0x298c   : > { %8009 = vmatprep.subr.bf16.mxu1 %v8357_v7 }
0x298e   : > { %v6424_v48 = vpop.f32.mrb[72].mxu1  ;;  %7999 = vmatpush3.bf16.msra.mxu0 %v7998_v62 }
0x298f   : > { %v6425_v51 = vadd.f32 %v7026_v47, %v6424_v48  ;;  %v7797_v9 = vpop.f32.mrb[73].mxu1  ;;  %v8010_v47 = vpack.c.bf16 %v7047_v46, %v7046_v1  ;;  %v7048_v48 = vld [vmem:[%s9771_s8 + $0x140] sm:$0xff] }
0x2990   : > { %v7050_v9 = vld [vmem:[%s9771_s8 + $0x150] sm:$0xff] }
0x2991   : > { %6436 = vrot.lane.b32.xlu0 %v6425_v51, %s9853_s30  ;;  %8011 = vmatpush3.bf16.msra.mxu1 %v8010_v47 }
0x2992   : > { %8012 = vmatprep.subr.bf16.mxu1 %v8357_v7 }
0x2a03   : > { %v6437_v41 = vpop.permute.xlu0 %6436 }
0x2a5c   : > { %v6341_v25 = vpop.f32.mrb[50].mxu0 }
0x2a5d   : > { %v6342_v12 = vadd.f32 %v7019_v39, %v6341_v25  ;;  %v7786_v13 = vpop.f32.mrb[51].mxu0  ;;  %v7051_v25 = vld [vmem:[%s9771_s8 + $0x158] sm:$0xff] }
0x2a5e   : > { %v7052_v13 = vld [vmem:[%s9771_s8 + $0x160] sm:$0xff] }
0x2a5f   : > { %v6428_v0 = vadd.f32 %v6425_v51, %v6342_v12  ;;  %v7049_v51 = vld [vmem:[%s9771_s8 + $0x148] sm:$0xff] }
0x2a60   : > { %v8013_v39 = vpack.c.bf16 %v7049_v51, %v7048_v48 }
0x2a61   : > { %v7028_v4 = vmul.f32 -1.442695, %v6428_v0  ;;  %v7053_v0 = vld [vmem:[%s9771_s8 + $0x168] sm:$0xff] }
0x2a62   : > { %8014 = vmatpush3.bf16.msra.mxu1 %v8013_v39 }
0x2a63   : > { %8250 = vpow2.f32 %v7028_v4  ;;  %8015 = vmatprep.subr.bf16.mxu1 %v8357_v7  ;;  %v8019_v4 = vpack.c.bf16 %v7053_v0, %v7052_v13 }
0x2a6d   : > { %v8251_v11 = vpop.eup %8250 }
0x2a6e   : > { %v6432_v14 = vadd.f32 1.0, %v8251_v11  ;;  %v7054_v11 = vld [vmem:[%s9771_s8 + $0x170] sm:$0xff] }
0x2a70   : > { %8252 = vrcp.f32 %v6432_v14  ;;  %v7055_v14 = vld [vmem:[%s9771_s8 + $0x178] sm:$0xff] }
0x2a7a   : > { %v8253_v17 = vpop.eup %8252 }
0x2a7b   : > { %v6439_v36 = vmul.f32 %v8253_v17, %v6437_v41  ;;  %v6446_v6 = vsub.f32 1.0, %v8253_v17  ;;  %v8022_v41 = vpack.c.bf16 %v7055_v14, %v7054_v11 }
0x2a7d   : > { %6441 = vrot.lane.b32.xlu1 %v6439_v36, %s9853_s30  ;;  %s6706_s30 = scalar_lea.sflag [#allocation3], %s9328_s26 }
0x2a81   : > { %6452 = vrot.lane.b32.xlu1 %v9349_v49, %s9856_s27 }
0x2aef   : > { %v6442_v19 = vpop.permute.xlu1 %6441 }
0x2af0   : > { %v6444_v26 = vadd.f32 %v6442_v19, %v6342_v12  ;;  %v8016_v12 = vpack.c.bf16 %v7051_v25, %v7050_v9 }
0x2af2   : > { %8254 = vtanh.f32 %v6444_v26  ;;  %8017 = vmatpush3.bf16.msra.mxu1 %v8016_v12 }
0x2af3   : > { %v6453_v20 = vpop.permute.xlu1 %6452  ;;  %8018 = vmatprep.subr.bf16.mxu1 %v8357_v7 }
0x2af4   : > { %v6455_v31 = vmul.f32 %v8253_v17, %v6453_v20  ;;  %v7038_v17 = vld [vmem:[%s9770_s7 + $0x2] ss:$0 sm:$0xff] }
0x2af6   : > { %8020 = vmatpush3.bf16.msra.mxu1 %v8019_v4 }
0x2af7   : > { %8021 = vmatprep.subr.bf16.mxu1 %v8357_v7 }
0x2afa   : > { %8023 = vmatpush3.bf16.msra.mxu1 %v8022_v41 }
0x2afc   : > { %v8255_v28 = vpop.eup %8254 }
0x2afd   : > { %6448 = vrot.lane.b32.xlu0 %v8255_v28, %s9846_s15 }
0x2b6f   : > { %v6449_v30 = vpop.permute.xlu0 %6448 }
0x2b70   : > { %v6451_v10 = vmul.f32 %v6449_v30, %v6446_v6 }
0x2b72   : > { %v9592_v8 = vadd.f32 %v6455_v31, %v6451_v10 }
0x2b74   : > { %6462 = vrot.lane.b32.xlu0 %v9592_v8, %s9846_s15  ;;  %v6470_v16 = vmul.f32 %v9592_v8, %v9592_v8 }
0x2b76   : > { %6472 = vrot.lane.b32.xlu1 %v6470_v16, %s9846_s15 }
0x2be6   : > { %v6463_v49 = vpop.permute.xlu0 %6462 }
0x2be7   : > { %v6466_v15 = vsel %vm6465_vm10, %v6463_v49, 0.0 }
0x2be8   : > { %6467 = vadd.xlane.f32.xlu0 %v6466_v15  ;;  %v6473_v5 = vpop.permute.xlu1 %6472  ;;  %v7057_v15 = vld [vmem:[%s9772_s9 + $0x2] ss:$0 sm:$0xff] }
0x2be9   : > { %v6475_v54 = vsel %vm6465_vm10, %v6473_v5, 0.0 }
0x2bea   : > { %6476 = vadd.xlane.f32.xlu1 %v6475_v54 }
0x2bfb   : > { %6499 = vrot.lane.b32.xlu1 %v7032_v55, %s9856_s27 }
0x2bfe   : > { %6490 = vrot.lane.b32.xlu0 %v7031_v56, %s9856_s27 }
0x2c75   : > { %v6468_v29 = vpop.xlane.xlu0 %6467 }
0x2c76   : > { %v6469_v27 = vmul.f32 0.03125, %v6468_v29 }
0x2c77   : > { %v6477_v53 = vpop.xlane.xlu1 %6476 }
0x2c78   : > { %v6479_v63 = vmul.f32 %v6469_v27, %v6469_v27  ;;  %v6478_v52 = vmul.f32 0.03125, %v6477_v53  ;;  %v6481_v22 = vsub.f32 %v9592_v8, %v6469_v27 }
0x2c79   : > { %v6491_v24 = vpop.permute.xlu0 %6490 }
0x2c7a   : > { %v6480_v2 = vsub.f32 %v6478_v52, %v6479_v63 }
0x2c7b   : > { %v6500_v32 = vpop.permute.xlu1 %6499 }
0x2c7c   : > { %v6482_v50 = vadd.f32 1e-05, %v6480_v2 }
0x2c7e   : > { %8256 = vrsqrt.f32 %v6482_v50 }
0x2c88   : > { %v8257_v23 = vpop.eup %8256 }
0x2c89   : > { %v6484_v33 = vmul.f32 %v8257_v23, %v6481_v22 }
0x2c8b   : > { %v6493_v34 = vmul.f32 %v6491_v24, %v6484_v33 }
0x2c8d   : > { %v6502_v35 = vadd.f32 %v6500_v32, %v6493_v34 }
0x2c8f   : > { %6517 = vrot.lane.b32.xlu0 %v6502_v35, %s9846_s15 }
0x2d01   : > { %v6518_v37 = vpop.permute.xlu0 %6517 }
0x2d02   : > { %7807 = vmatmul.mubr.msk.f32.vlgmr.msra.gmra.mrb[52].mxu0 %vm457_vm0, %v6518_v37 }
0x2dd5   : > { %v6587_v36 = vpop.f32.mrb[52].mxu0 }
0x2dd6   : > { %v6588_v19 = vadd.f32 %v7038_v17, %v6587_v36  ;;  %v7808_v26 = vpop.f32.mrb[53].mxu0 }
0x2dd8   : > { %v6591_v28 = vmul.f32 %v6588_v19, %v6588_v19 }
0x2dda   : > { %v6592_v20 = vmul.f32 %v6591_v28, %v6588_v19 }
0x2ddc   : > { %v6593_v6 = vmul.f32 0.044715, %v6592_v20 }
0x2dde   : > { %v6594_v30 = vadd.f32 %v6593_v6, %v6588_v19 }
0x2de0   : > { %v6595_v31 = vmul.f32 0.7978846, %v6594_v30 }
0x2de2   : > { %8258 = vtanh.f32 %v6595_v31 }
0x2dec   : > { %v8259_v10 = vpop.eup %8258 }
0x2ded   : > { %v6597_v16 = vadd.f32 1.0, %v8259_v10 }
0x2def   : > { %v6598_v7 = vmul.f32 0.5, %v6597_v16 }
0x2df1   : > { %v6599_v49 = vmul.f32 %v6598_v7, %v6588_v19 }
0x2df3   : > { %7842 = vmatmul.mubr.f32.vlgmr.msra.gmra.mrb[74].mxu1 %v6599_v49 }
0x2ec6   : > { %v6691_v5 = vpop.f32.mrb[74].mxu1 }
0x2ec7   : > { %v6692_v54 = vadd.f32 %v7057_v15, %v6691_v5  ;;  %v7843_v55 = vpop.f32.mrb[75].mxu1 }
0x2ec9   : > { %6696 = vrot.lane.b32.xlu1 %v6692_v54, %s9856_s27 }
0x2eca   : > { %8274 = shalt.err (!%p8271_p3)
}
0x2ecb   : > { %s8275_s27 = scalar_lea.hbm %s9691_s0, 128  ;;  %s8279_s23 = scalar_lea.hbm %s9870_s29, 256 }
0x2ecc   : > { %p8276_p4 = scmp.ne.s32.totalorder %s9691_s0, %s8275_s27  ;;  %p8280_p9 = scmp.lt.u32.totalorder %s9691_s0, %s9870_s29 }
0x2ecd   : > { %p8281_p10 = scmp.lt.u32.totalorder %s8279_s23, %s8275_s27  ;;  %p8283_p12 = scmp.lt.u32.totalorder %s8275_s27, %s9691_s0 }
0x2ece   : > { %p8277_p7 = pnand %p8276_p4, %p8485_p5 }
0x2ecf   : > { %p8282_p11 = por %p8281_p10, %p8280_p9 }
0x2ed0   : > { %p8278_p8 = pneg %p8277_p7 }
0x2ed1   : > { %p8284_p13 = por %p8283_p12, %p8282_p11 }
0x2ed3   : > { %p8285_p0 = pnand %p8284_p13, %p8278_p8 }
0x2ed5   : > { %8288 = shalt.err (!%p8285_p0)
}
0x2ed6   : > { %8032 = dma.vmem_to_hbm [thread:$0]  (%p8485_p5), %s6725_s14, 128, %s9691_s0, %s6706_s30  }
0x2ed7   : > { %s6833_s25 = sshll.u32 %s9328_s26, 2  ;;  %s7061_s12 = sshll.u32 %s9868_s2, 6 }
0x2ed8   : > { %s442_s28 = scalar_lea.vmem [#allocation4], %s6833_s25  ;;  %s9871_s21 = sld [smem:[#allocation24_spill]] }
0x2ed9   : > { %s6737_s1 = sshll.u32 %s442_s28, 4  ;;  %s6711_s0 = scalar_lea.sflag [#allocation5], %s9328_s26  ;;  %s9721_s1 = int_to_ptr.vmem [resolvable:$true] %s6737_s1 }
0x2eda   : > { %s8289_s14 = scalar_lea.vmem %s9721_s1, 64 }
0x2edb   : > { %p8290_p1 = scmp.ne.s32.totalorder %s9721_s1, %s8289_s14 }
0x2edd   : > { %p8291_p2 = pnand %p8290_p1, %p8485_p5 }
0x2ede   : > { %s9719_s16 = scalar_lea.hbm %s9871_s21, %s7061_s12 }
0x2edf   : > { %p8292_p3 = pneg %p8291_p2 }
0x2f3b   : > { %v6697_v56 = vpop.permute.xlu1 %6696 }
0x2f3c   : > { %v6699_v57 = vadd.f32 %v6697_v56, %v9592_v8 }
0x2f3e   : > { %6701 = vrot.lane.b32.xlu0 %v6699_v57, %s9846_s15  ;;  %s8376_s15 = smov [#allocation4]  }
0x2f3f   : > { %s8293_s2 = sshll.u32 %s8376_s15, 4  ;;  %s8294_s2 = int_to_ptr.vmem [resolvable:$false] %s8293_s2 }
0x2f40   : > { %s8295_s30 = scalar_lea.vmem %s8294_s2, 128  ;;  %p8296_p4 = scmp.lt.s32.totalorder %s9721_s1, %s8294_s2 }
0x2f41   : > { %p8297_p7 = scmp.lt.s32.totalorder %s8295_s30, %s8289_s14 }
0x2f43   : > { %p8298_p8 = por %p8297_p7, %p8296_p4 }
0x2f45   : > { %p8299_p9 = pnand %p8298_p8, %p8292_p3 }
0x2fb0   : > { %v6702_v58 = vpop.permute.xlu0 %6701 }
0x2fb1   : > { %6704 = vst.msk [vmem:[%s442_s28] sm:$0xf] %vm6465_vm10, %v6702_v58 }
0x2fb2   : > { %8302 = shalt.err (!%p8299_p9)
}
0x2fb3   : > { %s8303_s26 = scalar_lea.hbm %s9719_s16, 64  ;;  %s8307_s18 = scalar_lea.hbm %s9871_s21, 128 }
0x2fb4   : > { %p8304_p10 = scmp.ne.s32.totalorder %s9719_s16, %s8303_s26  ;;  %p8308_p13 = scmp.lt.u32.totalorder %s9719_s16, %s9871_s21 }
0x2fb5   : > { %p8309_p0 = scmp.lt.u32.totalorder %s8307_s18, %s8303_s26  ;;  %p8311_p2 = scmp.lt.u32.totalorder %s8303_s26, %s9719_s16 }
0x2fb6   : > { %p8305_p11 = pnand %p8304_p10, %p8485_p5 }
0x2fb7   : > { %p8310_p1 = por %p8309_p0, %p8308_p13 }
0x2fb8   : > { %p8306_p12 = pneg %p8305_p11 }
0x2fb9   : > { %p8312_p3 = por %p8311_p2, %p8310_p1 }
0x2fbb   : > { %p8313_p4 = pnand %p8312_p3, %p8306_p12 }
0x2fbd   : > { %8316 = shalt.err (!%p8313_p4)
}
0x2fbe   : > { %8033 = dma.vmem_to_hbm [thread:$0]  (%p8485_p5), %s9721_s1, 64, %s9719_s16, %s6711_s0  }
0x2fbf PF: > { %s9872_s24 = sld [smem:[#allocation11_spill]]  ;;  %s9873_s11 = sld [smem:[#allocation8_spill]] }
0x2fc5   : > { %p8043_p7 = scmp.ge.s32.totalorder %s9872_s24, 2  ;;  %s6749_s12 = sand.u32 1, %s9873_s11  }
0x2fc6   : > { %s6750_s28 = scalar_lea.sflag [#allocation3], %s6749_s12 }
0x2fc7   : > { %p8037_p8 = pnand %p8043_p7, %p8489_p6 }
0x2fc9   : > { %8334 = dma.done.wait (!%p8037_p8), %s6750_s28, 128  }
0x2fca   : > { %8336 = vsyncadd (!%p8037_p8), %s6750_s28, 4294967168  ;;  %s6759_s6 = scalar_lea.sflag [#allocation5], %s6749_s12 }
0x2fcb   : > { %8338 = dma.done.wait (!%p8037_p8), %s6759_s6, 64  }
0x2fcc   : > { %8340 = vsyncadd (!%p8037_p8), %s6759_s6, 4294967232  ;;  %s9875_s28 = sld [smem:[#allocation13_spill]]  ;;  %s9876_s25 = sld [smem:[#allocation9_spill]] }
0x2fcd   : > { %s9877_s26 = sld [smem:[#allocation10_spill]]  ;;  %s9878_s27 = sld [smem:[#allocation14_spill]] }
0x2fd2   : > { %p27_p5 = scmp.ge.s32.totalorder %s9875_s28, 4  }
0x2fd4   :  { %29 = sbr.rel (!%p27_p5) target bundleno = 14 (0xe), region = 160 }
0x2fdb   :  { %6764 = vsyncpa [#allocation3], 1 }
0x2fdc   :  { %6766 = vsyncpa [#allocation3 + $0x1], 1 }
0x2fdd   :  { %6767 = vsyncpa [#allocation5], 1 }
0x2fde   :  { %6769 = vsyncpa [#allocation5 + $0x1], 1 }

</bundles_post_ra>
